<compile_context>
chip_gen: v7x
topology: tpu7x:2x2x1
jax: 0.10.0
libtpu: 0.0.40
codegen_flags: <defaults>
</compile_context>

<pallas_src>
import numpy as np
import jax
import jax.numpy as jnp
from jax import lax
from jax.experimental import pallas as pl
from jax.experimental.pallas import tpu as pltpu


# ----------------------------------------------------------------------------
# Kernel 1: fused 3x3 same-pad conv + bias + ReLU + 2x2 max-pool (one image)
# ----------------------------------------------------------------------------
def conv_relu_pool_kernel(x_ref, w_ref, b_ref, o_ref,
                          xpad_ref, p_ref, cr_ref, m1_ref):
    """Fused conv block for one image (batch dim handled by the grid).

    x_ref  : (H, W, Cin)       input feature map (NHWC, batch squeezed)
    w_ref  : (9*Cin, Cout)     im2col conv weights, rows ordered (ki, kj, cin), bf16
    b_ref  : (1, Cout)         bias (f32)
    o_ref  : (Ho, Wo, Cout)    pooled output (bf16)
    xpad_ref : VMEM (H+2, W+2, Cin) f32   zero-padded input (halo built in VMEM)
    p_ref    : VMEM (H*W, 9*Cin)    bf16  im2col patch matrix
    cr_ref   : VMEM (H, W, Cout)    f32   conv + bias + ReLU (pre-pool)
    m1_ref   : VMEM (H, Wo, Cout)   f32   after pooling along W
    """
    H, W, Cin = x_ref.shape
    Cout = w_ref.shape[1]
    Ho, Wo = H // 2, W // 2

    # --- zero-padded halo built in VMEM (no jnp.pad round trip in HBM) ---
    xpad_ref[...] = jnp.zeros_like(xpad_ref)
    xpad_ref[1:H + 1, 1:W + 1, :] = x_ref[...].astype(xpad_ref.dtype)

    # --- im2col: the 9 shifted 3x3-tap windows become column groups of P ---
    for ki in range(3):
        for kj in range(3):
            t = ki * 3 + kj
            patch = xpad_ref[ki:ki + H, kj:kj + W, :]          # (H, W, Cin)
            p_ref[:, t * Cin:(t + 1) * Cin] = (
                patch.reshape(H * W, Cin).astype(p_ref.dtype))

    # --- one MXU matmul with K = 9*Cin (bf16 in, f32 accumulate) ---
    acc = jnp.dot(p_ref[...], w_ref[...], preferred_element_type=jnp.float32)
    cr_ref[...] = jnp.maximum(acc + b_ref[...], 0.0).reshape(H, W, Cout)

    # --- 2x2 max-pool on the VPU via stride-2 slices (no MXU, no gathers) ---
    # pool along W (even/odd columns of each row)
    m1_ref[...] = jnp.maximum(cr_ref[:, pl.ds(0, Wo, 2), :],
                              cr_ref[:, pl.ds(1, Wo, 2), :])
    # pool along H (even/odd rows of the W-pooled map)
    pooled = jnp.maximum(m1_ref[pl.ds(0, Ho, 2), :, :],
                         m1_ref[pl.ds(1, Ho, 2), :, :])         # (Ho, Wo, Cout)
    o_ref[...] = pooled.astype(o_ref.dtype)


def conv_relu_pool(x_nhwc, w_mat, b):
    """x_nhwc: (N, H, W, Cin) -> (N, H//2, W//2, Cout) in bf16."""
    N, H, W, Cin = x_nhwc.shape
    KC, Cout = w_mat.shape
    assert KC == 9 * Cin, "weight matrix must be (9*Cin, Cout)"
    assert H % 2 == 0 and W % 2 == 0, "H and W must be even for MaxPool2d(2)"
    Ho, Wo = H // 2, W // 2
    b2 = b.reshape(1, Cout).astype(jnp.float32)

    flops = 2 * N * H * W * KC * Cout
    bytes_accessed = (N * H * W * Cin * x_nhwc.dtype.itemsize
                      + KC * Cout * 2 + Cout * 4 + N * Ho * Wo * Cout * 2)

    return pl.pallas_call(
        conv_relu_pool_kernel,
        out_shape=jax.ShapeDtypeStruct((N, Ho, Wo, Cout), jnp.bfloat16),
        grid=(N,),
        in_specs=[
            pl.BlockSpec((None, H, W, Cin), lambda n: (n, 0, 0, 0)),
            pl.BlockSpec((KC, Cout), lambda n: (0, 0)),
            pl.BlockSpec((1, Cout), lambda n: (0, 0)),
        ],
        out_specs=pl.BlockSpec((None, Ho, Wo, Cout), lambda n: (n, 0, 0, 0)),
        scratch_shapes=[
            pltpu.VMEM((H + 2, W + 2, Cin), jnp.float32),   # padded input
            pltpu.VMEM((H * W, KC), jnp.bfloat16),          # im2col patches
            pltpu.VMEM((H, W, Cout), jnp.float32),          # conv+bias+relu
            pltpu.VMEM((H, Wo, Cout), jnp.float32),         # W-pooled map
        ],
        compiler_params=pltpu.CompilerParams(
            dimension_semantics=("parallel",)),
        cost_estimate=pl.CostEstimate(flops=flops, transcendentals=0,
                                      bytes_accessed=bytes_accessed),
    )(x_nhwc, w_mat, b2)


# ----------------------------------------------------------------------------
# Kernel 2: final Linear layer, tiled over the reduction dim F
# ----------------------------------------------------------------------------
def linear_kernel(x_ref, w_ref, b_ref, o_ref, acc_ref):
    @pl.when(pl.program_id(0) == 0)
    def _():
        acc_ref[...] = jnp.zeros_like(acc_ref)

    acc_ref[...] += jnp.dot(x_ref[...], w_ref[...],
                            preferred_element_type=jnp.float32)

    @pl.when(pl.program_id(0) == pl.num_programs(0) - 1)
    def _():
        o_ref[...] = acc_ref[...] + b_ref[...]


def linear(x, w, b, *, tk=128):
    N, F = x.shape
    _, C = w.shape
    if F % tk != 0:                     # keep the toy/real sizes both valid
        tk = F
    b2 = b.reshape(1, C).astype(jnp.float32)

    flops = 2 * N * F * C
    bytes_accessed = N * F * 2 + F * C * 2 + C * 4 + N * C * 4

    return pl.pallas_call(
        linear_kernel,
        out_shape=jax.ShapeDtypeStruct((N, C), jnp.float32),
        grid=(F // tk,),
        in_specs=[
            pl.BlockSpec((N, tk), lambda k: (0, k)),
            pl.BlockSpec((tk, C), lambda k: (k, 0)),
            pl.BlockSpec((1, C), lambda k: (0, 0)),
        ],
        out_specs=pl.BlockSpec((N, C), lambda k: (0, 0)),
        scratch_shapes=[pltpu.VMEM((N, C), jnp.float32)],
        compiler_params=pltpu.CompilerParams(
            dimension_semantics=("arbitrary",)),
        cost_estimate=pl.CostEstimate(flops=flops, transcendentals=0,
                                      bytes_accessed=bytes_accessed),
    )(x, w, b2)


# ----------------------------------------------------------------------------
# Full forward (glue in plain JAX)
# ----------------------------------------------------------------------------
def plant_disease_forward(x_nchw, params):
    # Single layout change at the input: NCHW -> NHWC (channels on lanes).
    x = jnp.transpose(x_nchw, (0, 2, 3, 1))
    h1 = conv_relu_pool(x, params["w1"], params["b1"])     # (N, H/2, W/2, 16)
    h2 = conv_relu_pool(h1, params["w2"], params["b2"])    # (N, H/4, W/4, 32)
    # NHWC flatten; the NCHW permutation is folded into params["wf"] at init,
    # so no per-forward transpose of the activation is needed.
    feats = h2.reshape(h2.shape[0], -1)                    # bf16
    return linear(feats, params["wf"], params["bf"])


# ----------------------------------------------------------------------------
# Parameters: PyTorch layouts -> kernel layouts
# ----------------------------------------------------------------------------
def init_pt_params(key, num_classes, H, W):
    """Parameters in the original PyTorch layouts."""
    k1, k2, k3, k4, k5, k6 = jax.random.split(key, 6)
    F = 32 * (H // 4) * (W // 4)                            # flatten_size
    return {
        "conv1_w": jax.random.normal(k1, (16, 3, 3, 3), jnp.float32) * 0.1,
        "conv1_b": jax.random.normal(k2, (16,), jnp.float32) * 0.1,
        "conv2_w": jax.random.normal(k3, (32, 16, 3, 3), jnp.float32) * 0.05,
        "conv2_b": jax.random.normal(k4, (32,), jnp.float32) * 0.05,
        "fc_w": jax.random.normal(k5, (num_classes, F), jnp.float32) * 0.05,
        "fc_b": jax.random.normal(k6, (num_classes,), jnp.float32) * 0.05,
    }


def convert_params(pt, H, W):
    """PyTorch layouts -> kernel layouts (im2col weights, NHWC-flat FC, bf16)."""
    def conv_to_im2col(w):  # (Cout, Cin, 3, 3) -> (9*Cin, Cout), rows = (ki, kj, cin)
        cout = w.shape[0]
        return jnp.transpose(w, (2, 3, 1, 0)).reshape(-1, cout)

    ncls, F = pt["fc_w"].shape
    C2, Ho2, Wo2 = 32, H // 4, W // 4
    # Fold torch's NCHW flatten permutation into the FC weight rows (-> NHWC).
    wf = (pt["fc_w"].reshape(ncls, C2, Ho2, Wo2)
          .transpose(2, 3, 1, 0)
          .reshape(F, ncls))
    return {
        "w1": conv_to_im2col(pt["conv1_w"]).astype(jnp.bfloat16),
        "b1": pt["conv1_b"],
        "w2": conv_to_im2col(pt["conv2_w"]).astype(jnp.bfloat16),
        "b2": pt["conv2_b"],
        "wf": wf.astype(jnp.bfloat16),
        "bf": pt["fc_b"],
    }


# Pure-JAX reference on the PyTorch-layout params (correctness check only).
def reference_forward(x_nchw, pt):
    def block(x, w, b):
        y = lax.conv_general_dilated(
            x, w, window_strides=(1, 1), padding=((1, 1), (1, 1)),
            dimension_numbers=("NCHW", "OIHW", "NCHW"))
        y = jnp.maximum(y + b.reshape(1, -1, 1, 1), 0.0)
        return lax.reduce_window(y, -jnp.inf, lax.max,
                                 (1, 1, 2, 2), (1, 1, 2, 2), "VALID")

    h = block(x_nchw, pt["conv1_w"], pt["conv1_b"])
    h = block(h, pt["conv2_w"], pt["conv2_b"])
    feats = h.reshape(h.shape[0], -1)            # NCHW flatten (= torch .view)
    return feats @ pt["fc_w"].T + pt["fc_b"]


if __name__ == "__main__":
    key = jax.random.PRNGKey(0)
    kx, kp = jax.random.split(key)
    N, C, H, W = 2, 3, 16, 16          # small stand-in for (N, 3, 224, 224)
    num_classes = 38
    x = jax.random.normal(kx, (N, C, H, W), jnp.float32)
    pt_params = init_pt_params(kp, num_classes, H, W)
    params = convert_params(pt_params, H, W)

    fwd = jax.jit(plant_disease_forward)
    out = jax.block_until_ready(fwd(x, params))
    assert out.shape == (N, num_classes)

    ref = reference_forward(x, pt_params)
    # bf16 MXU operands with f32 accumulation -> slightly loose tolerance.
    np.testing.assert_allclose(np.asarray(out), np.asarray(ref),
                               rtol=5e-2, atol=5e-2)
    print("KERNEL_OK")
</pallas_src>

<mosaic_0001>
module attributes {stable_mosaic.version = 11 : i64} {
  func.func @conv_relu_pool_kernel(%arg0: i32, %arg1: memref<1x16x16x3xf32, #tpu.memory_space<vmem>>, %arg2: memref<27x16xbf16, #tpu.memory_space<vmem>>, %arg3: memref<1x16xf32, #tpu.memory_space<vmem>>, %arg4: memref<1x8x8x16xbf16, #tpu.memory_space<vmem>>, %arg5: memref<18x18x3xf32, #tpu.memory_space<vmem>>, %arg6: memref<256x27xbf16, #tpu.memory_space<vmem>>, %arg7: memref<16x16x16xf32, #tpu.memory_space<vmem>>, %arg8: memref<16x8x16xf32, #tpu.memory_space<vmem>>) attributes {dimension_semantics = [#tpu.dimension_semantics<parallel>], iteration_bounds = array<i64: 2>, scalar_prefetch = 0 : i64, scratch_operands = 4 : i64, tpu.core_type = #tpu.core_type<tc>, window_params = [{transform_indices = @transform_0, window_bounds = array<i64: 1, 16, 16, 3>}, {pipeline_mode = #tpu.pipeline_mode<synchronous>, transform_indices = @transform_1, window_bounds = array<i64: 27, 16>}, {pipeline_mode = #tpu.pipeline_mode<synchronous>, transform_indices = @transform_2, window_bounds = array<i64: 1, 16>}, {transform_indices = @transform_3, window_bounds = array<i64: 1, 8, 8, 16>}]} {
    %cst = arith.constant 0.000000e+00 : f32
    %0 = vector.broadcast %cst : f32 to vector<18x18x3xf32>
    %c0 = arith.constant 0 : index
    %c0_0 = arith.constant 0 : index
    %c0_1 = arith.constant 0 : index
    %1 = vector.load %arg5[%c0, %c0_0, %c0_1] : memref<18x18x3xf32, #tpu.memory_space<vmem>>, vector<18x18x3xf32>
    tpu.vector_store %arg5[%c0, %c0_0, %c0_1], %0 {strides = array<i32>} : memref<18x18x3xf32, #tpu.memory_space<vmem>>, vector<18x18x3xf32>,
    %c0_2 = arith.constant 0 : index
    %c0_3 = arith.constant 0 : index
    %c0_4 = arith.constant 0 : index
    %c0_5 = arith.constant 0 : index
    %2 = vector.load %arg1[%c0_2, %c0_3, %c0_4, %c0_5] : memref<1x16x16x3xf32, #tpu.memory_space<vmem>>, vector<1x16x16x3xf32>
    %3 = vector.shape_cast %2 : vector<1x16x16x3xf32> to vector<16x16x3xf32>
    %c1 = arith.constant 1 : index
    %c1_6 = arith.constant 1 : index
    %c0_7 = arith.constant 0 : index
    %4 = vector.load %arg5[%c1, %c1_6, %c0_7] : memref<18x18x3xf32, #tpu.memory_space<vmem>>, vector<16x16x3xf32>
    tpu.vector_store %arg5[%c1, %c1_6, %c0_7], %3 {strides = array<i32>} : memref<18x18x3xf32, #tpu.memory_space<vmem>>, vector<16x16x3xf32>,
    %c0_8 = arith.constant 0 : index
    %c0_9 = arith.constant 0 : index
    %c0_10 = arith.constant 0 : index
    %5 = vector.load %arg5[%c0_8, %c0_9, %c0_10] : memref<18x18x3xf32, #tpu.memory_space<vmem>>, vector<16x16x3xf32>
    %6 = vector.shape_cast %5 : vector<16x16x3xf32> to vector<256x3xf32>
    %7 = arith.truncf %6 : vector<256x3xf32> to vector<256x3xbf16>
    %c0_11 = arith.constant 0 : index
    %c0_12 = arith.constant 0 : index
    %8 = vector.load %arg6[%c0_11, %c0_12] : memref<256x27xbf16, #tpu.memory_space<vmem>>, vector<256x3xbf16>
    tpu.vector_store %arg6[%c0_11, %c0_12], %7 {strides = array<i32>} : memref<256x27xbf16, #tpu.memory_space<vmem>>, vector<256x3xbf16>,
    %c0_13 = arith.constant 0 : index
    %c1_14 = arith.constant 1 : index
    %c0_15 = arith.constant 0 : index
    %9 = vector.load %arg5[%c0_13, %c1_14, %c0_15] : memref<18x18x3xf32, #tpu.memory_space<vmem>>, vector<16x16x3xf32>
    %10 = vector.shape_cast %9 : vector<16x16x3xf32> to vector<256x3xf32>
    %11 = arith.truncf %10 : vector<256x3xf32> to vector<256x3xbf16>
    %c0_16 = arith.constant 0 : index
    %c3 = arith.constant 3 : index
    %12 = vector.load %arg6[%c0_16, %c3] : memref<256x27xbf16, #tpu.memory_space<vmem>>, vector<256x3xbf16>
    tpu.vector_store %arg6[%c0_16, %c3], %11 {strides = array<i32>} : memref<256x27xbf16, #tpu.memory_space<vmem>>, vector<256x3xbf16>,
    %c0_17 = arith.constant 0 : index
    %c2 = arith.constant 2 : index
    %c0_18 = arith.constant 0 : index
    %13 = vector.load %arg5[%c0_17, %c2, %c0_18] : memref<18x18x3xf32, #tpu.memory_space<vmem>>, vector<16x16x3xf32>
    %14 = vector.shape_cast %13 : vector<16x16x3xf32> to vector<256x3xf32>
    %15 = arith.truncf %14 : vector<256x3xf32> to vector<256x3xbf16>
    %c0_19 = arith.constant 0 : index
    %c6 = arith.constant 6 : index
    %16 = vector.load %arg6[%c0_19, %c6] : memref<256x27xbf16, #tpu.memory_space<vmem>>, vector<256x3xbf16>
    tpu.vector_store %arg6[%c0_19, %c6], %15 {strides = array<i32>} : memref<256x27xbf16, #tpu.memory_space<vmem>>, vector<256x3xbf16>,
    %c1_20 = arith.constant 1 : index
    %c0_21 = arith.constant 0 : index
    %c0_22 = arith.constant 0 : index
    %17 = vector.load %arg5[%c1_20, %c0_21, %c0_22] : memref<18x18x3xf32, #tpu.memory_space<vmem>>, vector<16x16x3xf32>
    %18 = vector.shape_cast %17 : vector<16x16x3xf32> to vector<256x3xf32>
    %19 = arith.truncf %18 : vector<256x3xf32> to vector<256x3xbf16>
    %c0_23 = arith.constant 0 : index
    %c9 = arith.constant 9 : index
    %20 = vector.load %arg6[%c0_23, %c9] : memref<256x27xbf16, #tpu.memory_space<vmem>>, vector<256x3xbf16>
    tpu.vector_store %arg6[%c0_23, %c9], %19 {strides = array<i32>} : memref<256x27xbf16, #tpu.memory_space<vmem>>, vector<256x3xbf16>,
    %c1_24 = arith.constant 1 : index
    %c1_25 = arith.constant 1 : index
    %c0_26 = arith.constant 0 : index
    %21 = vector.load %arg5[%c1_24, %c1_25, %c0_26] : memref<18x18x3xf32, #tpu.memory_space<vmem>>, vector<16x16x3xf32>
    %22 = vector.shape_cast %21 : vector<16x16x3xf32> to vector<256x3xf32>
    %23 = arith.truncf %22 : vector<256x3xf32> to vector<256x3xbf16>
    %c0_27 = arith.constant 0 : index
    %c12 = arith.constant 12 : index
    %24 = vector.load %arg6[%c0_27, %c12] : memref<256x27xbf16, #tpu.memory_space<vmem>>, vector<256x3xbf16>
    tpu.vector_store %arg6[%c0_27, %c12], %23 {strides = array<i32>} : memref<256x27xbf16, #tpu.memory_space<vmem>>, vector<256x3xbf16>,
    %c1_28 = arith.constant 1 : index
    %c2_29 = arith.constant 2 : index
    %c0_30 = arith.constant 0 : index
    %25 = vector.load %arg5[%c1_28, %c2_29, %c0_30] : memref<18x18x3xf32, #tpu.memory_space<vmem>>, vector<16x16x3xf32>
    %26 = vector.shape_cast %25 : vector<16x16x3xf32> to vector<256x3xf32>
    %27 = arith.truncf %26 : vector<256x3xf32> to vector<256x3xbf16>
    %c0_31 = arith.constant 0 : index
    %c15 = arith.constant 15 : index
    %28 = vector.load %arg6[%c0_31, %c15] : memref<256x27xbf16, #tpu.memory_space<vmem>>, vector<256x3xbf16>
    tpu.vector_store %arg6[%c0_31, %c15], %27 {strides = array<i32>} : memref<256x27xbf16, #tpu.memory_space<vmem>>, vector<256x3xbf16>,
    %c2_32 = arith.constant 2 : index
    %c0_33 = arith.constant 0 : index
    %c0_34 = arith.constant 0 : index
    %29 = vector.load %arg5[%c2_32, %c0_33, %c0_34] : memref<18x18x3xf32, #tpu.memory_space<vmem>>, vector<16x16x3xf32>
    %30 = vector.shape_cast %29 : vector<16x16x3xf32> to vector<256x3xf32>
    %31 = arith.truncf %30 : vector<256x3xf32> to vector<256x3xbf16>
    %c0_35 = arith.constant 0 : index
    %c18 = arith.constant 18 : index
    %32 = vector.load %arg6[%c0_35, %c18] : memref<256x27xbf16, #tpu.memory_space<vmem>>, vector<256x3xbf16>
    tpu.vector_store %arg6[%c0_35, %c18], %31 {strides = array<i32>} : memref<256x27xbf16, #tpu.memory_space<vmem>>, vector<256x3xbf16>,
    %c2_36 = arith.constant 2 : index
    %c1_37 = arith.constant 1 : index
    %c0_38 = arith.constant 0 : index
    %33 = vector.load %arg5[%c2_36, %c1_37, %c0_38] : memref<18x18x3xf32, #tpu.memory_space<vmem>>, vector<16x16x3xf32>
    %34 = vector.shape_cast %33 : vector<16x16x3xf32> to vector<256x3xf32>
    %35 = arith.truncf %34 : vector<256x3xf32> to vector<256x3xbf16>
    %c0_39 = arith.constant 0 : index
    %c21 = arith.constant 21 : index
    %36 = vector.load %arg6[%c0_39, %c21] : memref<256x27xbf16, #tpu.memory_space<vmem>>, vector<256x3xbf16>
    tpu.vector_store %arg6[%c0_39, %c21], %35 {strides = array<i32>} : memref<256x27xbf16, #tpu.memory_space<vmem>>, vector<256x3xbf16>,
    %c2_40 = arith.constant 2 : index
    %c2_41 = arith.constant 2 : index
    %c0_42 = arith.constant 0 : index
    %37 = vector.load %arg5[%c2_40, %c2_41, %c0_42] : memref<18x18x3xf32, #tpu.memory_space<vmem>>, vector<16x16x3xf32>
    %38 = vector.shape_cast %37 : vector<16x16x3xf32> to vector<256x3xf32>
    %39 = arith.truncf %38 : vector<256x3xf32> to vector<256x3xbf16>
    %c0_43 = arith.constant 0 : index
    %c24 = arith.constant 24 : index
    %40 = vector.load %arg6[%c0_43, %c24] : memref<256x27xbf16, #tpu.memory_space<vmem>>, vector<256x3xbf16>
    tpu.vector_store %arg6[%c0_43, %c24], %39 {strides = array<i32>} : memref<256x27xbf16, #tpu.memory_space<vmem>>, vector<256x3xbf16>,
    %c0_44 = arith.constant 0 : index
    %c0_45 = arith.constant 0 : index
    %41 = vector.load %arg6[%c0_44, %c0_45] : memref<256x27xbf16, #tpu.memory_space<vmem>>, vector<256x27xbf16>
    %c0_46 = arith.constant 0 : index
    %c0_47 = arith.constant 0 : index
    %42 = vector.load %arg2[%c0_46, %c0_47] : memref<27x16xbf16, #tpu.memory_space<vmem>>, vector<27x16xbf16>
    %cst_48 = arith.constant dense<0.000000e+00> : vector<256x16xf32>
    %43 = tpu.matmul %41, %42, %cst_48 {dimension_numbers = #tpu.dot_dimension_numbers<[1], [0], [0], [1], [0, 0, 1, 1], [], []>} : vector<256x27xbf16>, vector<27x16xbf16>, vector<256x16xf32> -> vector<256x16xf32>
    %c0_49 = arith.constant 0 : index
    %c0_50 = arith.constant 0 : index
    %44 = vector.load %arg3[%c0_49, %c0_50] : memref<1x16xf32, #tpu.memory_space<vmem>>, vector<1x16xf32>
    %45 = vector.broadcast %44 : vector<1x16xf32> to vector<256x16xf32>
    %46 = arith.addf %43, %45 : vector<256x16xf32>
    %cst_51 = arith.constant 0.000000e+00 : f32
    %47 = vector.broadcast %cst_51 : f32 to vector<256x16xf32>
    %48 = arith.maximumf %46, %47 : vector<256x16xf32>
    %49 = vector.shape_cast %48 : vector<256x16xf32> to vector<16x16x16xf32>
    %c0_52 = arith.constant 0 : index
    %c0_53 = arith.constant 0 : index
    %c0_54 = arith.constant 0 : index
    %50 = vector.load %arg7[%c0_52, %c0_53, %c0_54] : memref<16x16x16xf32, #tpu.memory_space<vmem>>, vector<16x16x16xf32>
    tpu.vector_store %arg7[%c0_52, %c0_53, %c0_54], %49 {strides = array<i32>} : memref<16x16x16xf32, #tpu.memory_space<vmem>>, vector<16x16x16xf32>,
    %c0_55 = arith.constant 0 : index
    %c0_56 = arith.constant 0 : index
    %c0_57 = arith.constant 0 : index
    %51 = tpu.strided_load %arg7[%c0_55, %c0_56, %c0_57] {strides = array<i32: 1, 2, 1>} : memref<16x16x16xf32, #tpu.memory_space<vmem>>, vector<16x8x16xf32>
    %c0_58 = arith.constant 0 : index
    %c1_59 = arith.constant 1 : index
    %c0_60 = arith.constant 0 : index
    %52 = tpu.strided_load %arg7[%c0_58, %c1_59, %c0_60] {strides = array<i32: 1, 2, 1>} : memref<16x16x16xf32, #tpu.memory_space<vmem>>, vector<16x8x16xf32>
    %53 = arith.maximumf %51, %52 : vector<16x8x16xf32>
    %c0_61 = arith.constant 0 : index
    %c0_62 = arith.constant 0 : index
    %c0_63 = arith.constant 0 : index
    %54 = vector.load %arg8[%c0_61, %c0_62, %c0_63] : memref<16x8x16xf32, #tpu.memory_space<vmem>>, vector<16x8x16xf32>
    tpu.vector_store %arg8[%c0_61, %c0_62, %c0_63], %53 {strides = array<i32>} : memref<16x8x16xf32, #tpu.memory_space<vmem>>, vector<16x8x16xf32>,
    %c0_64 = arith.constant 0 : index
    %c0_65 = arith.constant 0 : index
    %c0_66 = arith.constant 0 : index
    %55 = tpu.strided_load %arg8[%c0_64, %c0_65, %c0_66] {strides = array<i32: 2, 1, 1>} : memref<16x8x16xf32, #tpu.memory_space<vmem>>, vector<8x8x16xf32>
    %c1_67 = arith.constant 1 : index
    %c0_68 = arith.constant 0 : index
    %c0_69 = arith.constant 0 : index
    %56 = tpu.strided_load %arg8[%c1_67, %c0_68, %c0_69] {strides = array<i32: 2, 1, 1>} : memref<16x8x16xf32, #tpu.memory_space<vmem>>, vector<8x8x16xf32>
    %57 = arith.maximumf %55, %56 : vector<8x8x16xf32>
    %58 = arith.truncf %57 : vector<8x8x16xf32> to vector<8x8x16xbf16>
    %c0_70 = arith.constant 0 : index
    %c0_71 = arith.constant 0 : index
    %c0_72 = arith.constant 0 : index
    %c0_73 = arith.constant 0 : index
    %59 = vector.load %arg4[%c0_70, %c0_71, %c0_72, %c0_73] : memref<1x8x8x16xbf16, #tpu.memory_space<vmem>>, vector<1x8x8x16xbf16>
    %60 = vector.shape_cast %59 : vector<1x8x8x16xbf16> to vector<8x8x16xbf16>
    %61 = vector.shape_cast %58 : vector<8x8x16xbf16> to vector<1x8x8x16xbf16>
    tpu.vector_store %arg4[%c0_70, %c0_71, %c0_72, %c0_73], %61 {strides = array<i32>} : memref<1x8x8x16xbf16, #tpu.memory_space<vmem>>, vector<1x8x8x16xbf16>,
    return
  }
  func.func @transform_0(%arg0: i32) -> (i32, i32, i32, i32) {
    %c0_i32 = arith.constant 0 : i32
    %c0_i32_0 = arith.constant 0 : i32
    %c0_i32_1 = arith.constant 0 : i32
    %c0_i32_2 = arith.constant 0 : i32
    return %arg0, %c0_i32, %c0_i32_0, %c0_i32_1 : i32, i32, i32, i32
  }
  func.func @transform_1(%arg0: i32) -> (i32, i32) {
    %c0_i32 = arith.constant 0 : i32
    %c0_i32_0 = arith.constant 0 : i32
    %c0_i32_1 = arith.constant 0 : i32
    return %c0_i32, %c0_i32_0 : i32, i32
  }
  func.func @transform_2(%arg0: i32) -> (i32, i32) {
    %c0_i32 = arith.constant 0 : i32
    %c0_i32_0 = arith.constant 0 : i32
    %c0_i32_1 = arith.constant 0 : i32
    return %c0_i32, %c0_i32_0 : i32, i32
  }
  func.func @transform_3(%arg0: i32) -> (i32, i32, i32, i32) {
    %c0_i32 = arith.constant 0 : i32
    %c0_i32_0 = arith.constant 0 : i32
    %c0_i32_1 = arith.constant 0 : i32
    %c0_i32_2 = arith.constant 0 : i32
    return %arg0, %c0_i32, %c0_i32_0, %c0_i32_1 : i32, i32, i32, i32
  }
}

module attributes {stable_mosaic.version = 11 : i64} {
  func.func @conv_relu_pool_kernel(%arg0: i32, %arg1: memref<1x8x8x16xbf16, #tpu.memory_space<vmem>>, %arg2: memref<144x32xbf16, #tpu.memory_space<vmem>>, %arg3: memref<1x32xf32, #tpu.memory_space<vmem>>, %arg4: memref<1x4x4x32xbf16, #tpu.memory_space<vmem>>, %arg5: memref<10x10x16xf32, #tpu.memory_space<vmem>>, %arg6: memref<64x144xbf16, #tpu.memory_space<vmem>>, %arg7: memref<8x8x32xf32, #tpu.memory_space<vmem>>, %arg8: memref<8x4x32xf32, #tpu.memory_space<vmem>>) attributes {dimension_semantics = [#tpu.dimension_semantics<parallel>], iteration_bounds = array<i64: 2>, scalar_prefetch = 0 : i64, scratch_operands = 4 : i64, tpu.core_type = #tpu.core_type<tc>, window_params = [{transform_indices = @transform_0, window_bounds = array<i64: 1, 8, 8, 16>}, {pipeline_mode = #tpu.pipeline_mode<synchronous>, transform_indices = @transform_1, window_bounds = array<i64: 144, 32>}, {pipeline_mode = #tpu.pipeline_mode<synchronous>, transform_indices = @transform_2, window_bounds = array<i64: 1, 32>}, {transform_indices = @transform_3, window_bounds = array<i64: 1, 4, 4, 32>}]} {
    %cst = arith.constant 0.000000e+00 : f32
    %0 = vector.broadcast %cst : f32 to vector<10x10x16xf32>
    %c0 = arith.constant 0 : index
    %c0_0 = arith.constant 0 : index
    %c0_1 = arith.constant 0 : index
    %1 = vector.load %arg5[%c0, %c0_0, %c0_1] : memref<10x10x16xf32, #tpu.memory_space<vmem>>, vector<10x10x16xf32>
    tpu.vector_store %arg5[%c0, %c0_0, %c0_1], %0 {strides = array<i32>} : memref<10x10x16xf32, #tpu.memory_space<vmem>>, vector<10x10x16xf32>,
    %c0_2 = arith.constant 0 : index
    %c0_3 = arith.constant 0 : index
    %c0_4 = arith.constant 0 : index
    %c0_5 = arith.constant 0 : index
    %2 = vector.load %arg1[%c0_2, %c0_3, %c0_4, %c0_5] : memref<1x8x8x16xbf16, #tpu.memory_space<vmem>>, vector<1x8x8x16xbf16>
    %3 = vector.shape_cast %2 : vector<1x8x8x16xbf16> to vector<8x8x16xbf16>
    %4 = arith.extf %3 : vector<8x8x16xbf16> to vector<8x8x16xf32>
    %c1 = arith.constant 1 : index
    %c1_6 = arith.constant 1 : index
    %c0_7 = arith.constant 0 : index
    %5 = vector.load %arg5[%c1, %c1_6, %c0_7] : memref<10x10x16xf32, #tpu.memory_space<vmem>>, vector<8x8x16xf32>
    tpu.vector_store %arg5[%c1, %c1_6, %c0_7], %4 {strides = array<i32>} : memref<10x10x16xf32, #tpu.memory_space<vmem>>, vector<8x8x16xf32>,
    %c0_8 = arith.constant 0 : index
    %c0_9 = arith.constant 0 : index
    %c0_10 = arith.constant 0 : index
    %6 = vector.load %arg5[%c0_8, %c0_9, %c0_10] : memref<10x10x16xf32, #tpu.memory_space<vmem>>, vector<8x8x16xf32>
    %7 = vector.shape_cast %6 : vector<8x8x16xf32> to vector<64x16xf32>
    %8 = arith.truncf %7 : vector<64x16xf32> to vector<64x16xbf16>
    %c0_11 = arith.constant 0 : index
    %c0_12 = arith.constant 0 : index
    %9 = vector.load %arg6[%c0_11, %c0_12] : memref<64x144xbf16, #tpu.memory_space<vmem>>, vector<64x16xbf16>
    tpu.vector_store %arg6[%c0_11, %c0_12], %8 {strides = array<i32>} : memref<64x144xbf16, #tpu.memory_space<vmem>>, vector<64x16xbf16>,
    %c0_13 = arith.constant 0 : index
    %c1_14 = arith.constant 1 : index
    %c0_15 = arith.constant 0 : index
    %10 = vector.load %arg5[%c0_13, %c1_14, %c0_15] : memref<10x10x16xf32, #tpu.memory_space<vmem>>, vector<8x8x16xf32>
    %11 = vector.shape_cast %10 : vector<8x8x16xf32> to vector<64x16xf32>
    %12 = arith.truncf %11 : vector<64x16xf32> to vector<64x16xbf16>
    %c0_16 = arith.constant 0 : index
    %c16 = arith.constant 16 : index
    %13 = vector.load %arg6[%c0_16, %c16] : memref<64x144xbf16, #tpu.memory_space<vmem>>, vector<64x16xbf16>
    tpu.vector_store %arg6[%c0_16, %c16], %12 {strides = array<i32>} : memref<64x144xbf16, #tpu.memory_space<vmem>>, vector<64x16xbf16>,
    %c0_17 = arith.constant 0 : index
    %c2 = arith.constant 2 : index
    %c0_18 = arith.constant 0 : index
    %14 = vector.load %arg5[%c0_17, %c2, %c0_18] : memref<10x10x16xf32, #tpu.memory_space<vmem>>, vector<8x8x16xf32>
    %15 = vector.shape_cast %14 : vector<8x8x16xf32> to vector<64x16xf32>
    %16 = arith.truncf %15 : vector<64x16xf32> to vector<64x16xbf16>
    %c0_19 = arith.constant 0 : index
    %c32 = arith.constant 32 : index
    %17 = vector.load %arg6[%c0_19, %c32] : memref<64x144xbf16, #tpu.memory_space<vmem>>, vector<64x16xbf16>
    tpu.vector_store %arg6[%c0_19, %c32], %16 {strides = array<i32>} : memref<64x144xbf16, #tpu.memory_space<vmem>>, vector<64x16xbf16>,
    %c1_20 = arith.constant 1 : index
    %c0_21 = arith.constant 0 : index
    %c0_22 = arith.constant 0 : index
    %18 = vector.load %arg5[%c1_20, %c0_21, %c0_22] : memref<10x10x16xf32, #tpu.memory_space<vmem>>, vector<8x8x16xf32>
    %19 = vector.shape_cast %18 : vector<8x8x16xf32> to vector<64x16xf32>
    %20 = arith.truncf %19 : vector<64x16xf32> to vector<64x16xbf16>
    %c0_23 = arith.constant 0 : index
    %c48 = arith.constant 48 : index
    %21 = vector.load %arg6[%c0_23, %c48] : memref<64x144xbf16, #tpu.memory_space<vmem>>, vector<64x16xbf16>
    tpu.vector_store %arg6[%c0_23, %c48], %20 {strides = array<i32>} : memref<64x144xbf16, #tpu.memory_space<vmem>>, vector<64x16xbf16>,
    %c1_24 = arith.constant 1 : index
    %c1_25 = arith.constant 1 : index
    %c0_26 = arith.constant 0 : index
    %22 = vector.load %arg5[%c1_24, %c1_25, %c0_26] : memref<10x10x16xf32, #tpu.memory_space<vmem>>, vector<8x8x16xf32>
    %23 = vector.shape_cast %22 : vector<8x8x16xf32> to vector<64x16xf32>
    %24 = arith.truncf %23 : vector<64x16xf32> to vector<64x16xbf16>
    %c0_27 = arith.constant 0 : index
    %c64 = arith.constant 64 : index
    %25 = vector.load %arg6[%c0_27, %c64] : memref<64x144xbf16, #tpu.memory_space<vmem>>, vector<64x16xbf16>
    tpu.vector_store %arg6[%c0_27, %c64], %24 {strides = array<i32>} : memref<64x144xbf16, #tpu.memory_space<vmem>>, vector<64x16xbf16>,
    %c1_28 = arith.constant 1 : index
    %c2_29 = arith.constant 2 : index
    %c0_30 = arith.constant 0 : index
    %26 = vector.load %arg5[%c1_28, %c2_29, %c0_30] : memref<10x10x16xf32, #tpu.memory_space<vmem>>, vector<8x8x16xf32>
    %27 = vector.shape_cast %26 : vector<8x8x16xf32> to vector<64x16xf32>
    %28 = arith.truncf %27 : vector<64x16xf32> to vector<64x16xbf16>
    %c0_31 = arith.constant 0 : index
    %c80 = arith.constant 80 : index
    %29 = vector.load %arg6[%c0_31, %c80] : memref<64x144xbf16, #tpu.memory_space<vmem>>, vector<64x16xbf16>
    tpu.vector_store %arg6[%c0_31, %c80], %28 {strides = array<i32>} : memref<64x144xbf16, #tpu.memory_space<vmem>>, vector<64x16xbf16>,
    %c2_32 = arith.constant 2 : index
    %c0_33 = arith.constant 0 : index
    %c0_34 = arith.constant 0 : index
    %30 = vector.load %arg5[%c2_32, %c0_33, %c0_34] : memref<10x10x16xf32, #tpu.memory_space<vmem>>, vector<8x8x16xf32>
    %31 = vector.shape_cast %30 : vector<8x8x16xf32> to vector<64x16xf32>
    %32 = arith.truncf %31 : vector<64x16xf32> to vector<64x16xbf16>
    %c0_35 = arith.constant 0 : index
    %c96 = arith.constant 96 : index
    %33 = vector.load %arg6[%c0_35, %c96] : memref<64x144xbf16, #tpu.memory_space<vmem>>, vector<64x16xbf16>
    tpu.vector_store %arg6[%c0_35, %c96], %32 {strides = array<i32>} : memref<64x144xbf16, #tpu.memory_space<vmem>>, vector<64x16xbf16>,
    %c2_36 = arith.constant 2 : index
    %c1_37 = arith.constant 1 : index
    %c0_38 = arith.constant 0 : index
    %34 = vector.load %arg5[%c2_36, %c1_37, %c0_38] : memref<10x10x16xf32, #tpu.memory_space<vmem>>, vector<8x8x16xf32>
    %35 = vector.shape_cast %34 : vector<8x8x16xf32> to vector<64x16xf32>
    %36 = arith.truncf %35 : vector<64x16xf32> to vector<64x16xbf16>
    %c0_39 = arith.constant 0 : index
    %c112 = arith.constant 112 : index
    %37 = vector.load %arg6[%c0_39, %c112] : memref<64x144xbf16, #tpu.memory_space<vmem>>, vector<64x16xbf16>
    tpu.vector_store %arg6[%c0_39, %c112], %36 {strides = array<i32>} : memref<64x144xbf16, #tpu.memory_space<vmem>>, vector<64x16xbf16>,
    %c2_40 = arith.constant 2 : index
    %c2_41 = arith.constant 2 : index
    %c0_42 = arith.constant 0 : index
    %38 = vector.load %arg5[%c2_40, %c2_41, %c0_42] : memref<10x10x16xf32, #tpu.memory_space<vmem>>, vector<8x8x16xf32>
    %39 = vector.shape_cast %38 : vector<8x8x16xf32> to vector<64x16xf32>
    %40 = arith.truncf %39 : vector<64x16xf32> to vector<64x16xbf16>
    %c0_43 = arith.constant 0 : index
    %c128 = arith.constant 128 : index
    %41 = vector.load %arg6[%c0_43, %c128] : memref<64x144xbf16, #tpu.memory_space<vmem>>, vector<64x16xbf16>
    tpu.vector_store %arg6[%c0_43, %c128], %40 {strides = array<i32>} : memref<64x144xbf16, #tpu.memory_space<vmem>>, vector<64x16xbf16>,
    %c0_44 = arith.constant 0 : index
    %c0_45 = arith.constant 0 : index
    %42 = vector.load %arg6[%c0_44, %c0_45] : memref<64x144xbf16, #tpu.memory_space<vmem>>, vector<64x144xbf16>
    %c0_46 = arith.constant 0 : index
    %c0_47 = arith.constant 0 : index
    %43 = vector.load %arg2[%c0_46, %c0_47] : memref<144x32xbf16, #tpu.memory_space<vmem>>, vector<144x32xbf16>
    %cst_48 = arith.constant dense<0.000000e+00> : vector<64x32xf32>
    %44 = tpu.matmul %42, %43, %cst_48 {dimension_numbers = #tpu.dot_dimension_numbers<[1], [0], [0], [1], [0, 0, 1, 1], [], []>} : vector<64x144xbf16>, vector<144x32xbf16>, vector<64x32xf32> -> vector<64x32xf32>
    %c0_49 = arith.constant 0 : index
    %c0_50 = arith.constant 0 : index
    %45 = vector.load %arg3[%c0_49, %c0_50] : memref<1x32xf32, #tpu.memory_space<vmem>>, vector<1x32xf32>
    %46 = vector.broadcast %45 : vector<1x32xf32> to vector<64x32xf32>
    %47 = arith.addf %44, %46 : vector<64x32xf32>
    %cst_51 = arith.constant 0.000000e+00 : f32
    %48 = vector.broadcast %cst_51 : f32 to vector<64x32xf32>
    %49 = arith.maximumf %47, %48 : vector<64x32xf32>
    %50 = vector.shape_cast %49 : vector<64x32xf32> to vector<8x8x32xf32>
    %c0_52 = arith.constant 0 : index
    %c0_53 = arith.constant 0 : index
    %c0_54 = arith.constant 0 : index
    %51 = vector.load %arg7[%c0_52, %c0_53, %c0_54] : memref<8x8x32xf32, #tpu.memory_space<vmem>>, vector<8x8x32xf32>
    tpu.vector_store %arg7[%c0_52, %c0_53, %c0_54], %50 {strides = array<i32>} : memref<8x8x32xf32, #tpu.memory_space<vmem>>, vector<8x8x32xf32>,
    %c0_55 = arith.constant 0 : index
    %c0_56 = arith.constant 0 : index
    %c0_57 = arith.constant 0 : index
    %52 = tpu.strided_load %arg7[%c0_55, %c0_56, %c0_57] {strides = array<i32: 1, 2, 1>} : memref<8x8x32xf32, #tpu.memory_space<vmem>>, vector<8x4x32xf32>
    %c0_58 = arith.constant 0 : index
    %c1_59 = arith.constant 1 : index
    %c0_60 = arith.constant 0 : index
    %53 = tpu.strided_load %arg7[%c0_58, %c1_59, %c0_60] {strides = array<i32: 1, 2, 1>} : memref<8x8x32xf32, #tpu.memory_space<vmem>>, vector<8x4x32xf32>
    %54 = arith.maximumf %52, %53 : vector<8x4x32xf32>
    %c0_61 = arith.constant 0 : index
    %c0_62 = arith.constant 0 : index
    %c0_63 = arith.constant 0 : index
    %55 = vector.load %arg8[%c0_61, %c0_62, %c0_63] : memref<8x4x32xf32, #tpu.memory_space<vmem>>, vector<8x4x32xf32>
    tpu.vector_store %arg8[%c0_61, %c0_62, %c0_63], %54 {strides = array<i32>} : memref<8x4x32xf32, #tpu.memory_space<vmem>>, vector<8x4x32xf32>,
    %c0_64 = arith.constant 0 : index
    %c0_65 = arith.constant 0 : index
    %c0_66 = arith.constant 0 : index
    %56 = tpu.strided_load %arg8[%c0_64, %c0_65, %c0_66] {strides = array<i32: 2, 1, 1>} : memref<8x4x32xf32, #tpu.memory_space<vmem>>, vector<4x4x32xf32>
    %c1_67 = arith.constant 1 : index
    %c0_68 = arith.constant 0 : index
    %c0_69 = arith.constant 0 : index
    %57 = tpu.strided_load %arg8[%c1_67, %c0_68, %c0_69] {strides = array<i32: 2, 1, 1>} : memref<8x4x32xf32, #tpu.memory_space<vmem>>, vector<4x4x32xf32>
    %58 = arith.maximumf %56, %57 : vector<4x4x32xf32>
    %59 = arith.truncf %58 : vector<4x4x32xf32> to vector<4x4x32xbf16>
    %c0_70 = arith.constant 0 : index
    %c0_71 = arith.constant 0 : index
    %c0_72 = arith.constant 0 : index
    %c0_73 = arith.constant 0 : index
    %60 = vector.load %arg4[%c0_70, %c0_71, %c0_72, %c0_73] : memref<1x4x4x32xbf16, #tpu.memory_space<vmem>>, vector<1x4x4x32xbf16>
    %61 = vector.shape_cast %60 : vector<1x4x4x32xbf16> to vector<4x4x32xbf16>
    %62 = vector.shape_cast %59 : vector<4x4x32xbf16> to vector<1x4x4x32xbf16>
    tpu.vector_store %arg4[%c0_70, %c0_71, %c0_72, %c0_73], %62 {strides = array<i32>} : memref<1x4x4x32xbf16, #tpu.memory_space<vmem>>, vector<1x4x4x32xbf16>,
    return
  }
  func.func @transform_0(%arg0: i32) -> (i32, i32, i32, i32) {
    %c0_i32 = arith.constant 0 : i32
    %c0_i32_0 = arith.constant 0 : i32
    %c0_i32_1 = arith.constant 0 : i32
    %c0_i32_2 = arith.constant 0 : i32
    return %arg0, %c0_i32, %c0_i32_0, %c0_i32_1 : i32, i32, i32, i32
  }
  func.func @transform_1(%arg0: i32) -> (i32, i32) {
    %c0_i32 = arith.constant 0 : i32
    %c0_i32_0 = arith.constant 0 : i32
    %c0_i32_1 = arith.constant 0 : i32
    return %c0_i32, %c0_i32_0 : i32, i32
  }
  func.func @transform_2(%arg0: i32) -> (i32, i32) {
    %c0_i32 = arith.constant 0 : i32
    %c0_i32_0 = arith.constant 0 : i32
    %c0_i32_1 = arith.constant 0 : i32
    return %c0_i32, %c0_i32_0 : i32, i32
  }
  func.func @transform_3(%arg0: i32) -> (i32, i32, i32, i32) {
    %c0_i32 = arith.constant 0 : i32
    %c0_i32_0 = arith.constant 0 : i32
    %c0_i32_1 = arith.constant 0 : i32
    %c0_i32_2 = arith.constant 0 : i32
    return %arg0, %c0_i32, %c0_i32_0, %c0_i32_1 : i32, i32, i32, i32
  }
}

module attributes {stable_mosaic.version = 11 : i64} {
  func.func @linear_kernel(%arg0: i32, %arg1: memref<2x128xbf16, #tpu.memory_space<vmem>>, %arg2: memref<128x38xbf16, #tpu.memory_space<vmem>>, %arg3: memref<1x38xf32, #tpu.memory_space<vmem>>, %arg4: memref<2x38xf32, #tpu.memory_space<vmem>>, %arg5: memref<2x38xf32, #tpu.memory_space<vmem>>) attributes {dimension_semantics = [#tpu.dimension_semantics<arbitrary>], iteration_bounds = array<i64: 4>, scalar_prefetch = 0 : i64, scratch_operands = 1 : i64, tpu.core_type = #tpu.core_type<tc>, window_params = [{transform_indices = @transform_0, window_bounds = array<i64: 2, 128>}, {transform_indices = @transform_1, window_bounds = array<i64: 128, 38>}, {pipeline_mode = #tpu.pipeline_mode<synchronous>, transform_indices = @transform_2, window_bounds = array<i64: 1, 38>}, {pipeline_mode = #tpu.pipeline_mode<synchronous>, transform_indices = @transform_3, window_bounds = array<i64: 2, 38>}]} {
    %c0_i32 = arith.constant 0 : i32
    %0 = arith.cmpi eq, %arg0, %c0_i32 : i32
    %1 = arith.extui %0 : i1 to i32
    %c0_i32_0 = arith.constant 0 : i32
    %2 = arith.cmpi ne, %1, %c0_i32_0 : i32
    scf.if %2 {
      %cst_9 = arith.constant 0.000000e+00 : f32
      %12 = vector.broadcast %cst_9 : f32 to vector<2x38xf32>
      %c0_10 = arith.constant 0 : index
      %c0_11 = arith.constant 0 : index
      %13 = vector.load %arg5[%c0_10, %c0_11] : memref<2x38xf32, #tpu.memory_space<vmem>>, vector<2x38xf32>
      tpu.vector_store %arg5[%c0_10, %c0_11], %12 {strides = array<i32>} : memref<2x38xf32, #tpu.memory_space<vmem>>, vector<2x38xf32>,
    } else {
    }
    %c0 = arith.constant 0 : index
    %c0_1 = arith.constant 0 : index
    %3 = vector.load %arg5[%c0, %c0_1] : memref<2x38xf32, #tpu.memory_space<vmem>>, vector<2x38xf32>
    %c0_2 = arith.constant 0 : index
    %c0_3 = arith.constant 0 : index
    %4 = vector.load %arg1[%c0_2, %c0_3] : memref<2x128xbf16, #tpu.memory_space<vmem>>, vector<2x128xbf16>
    %c0_4 = arith.constant 0 : index
    %c0_5 = arith.constant 0 : index
    %5 = vector.load %arg2[%c0_4, %c0_5] : memref<128x38xbf16, #tpu.memory_space<vmem>>, vector<128x38xbf16>
    %cst = arith.constant dense<0.000000e+00> : vector<2x38xf32>
    %6 = tpu.matmul %4, %5, %cst {dimension_numbers = #tpu.dot_dimension_numbers<[1], [0], [0], [1], [0, 0, 1, 1], [], []>} : vector<2x128xbf16>, vector<128x38xbf16>, vector<2x38xf32> -> vector<2x38xf32>
    %7 = arith.addf %3, %6 : vector<2x38xf32>
    %c0_6 = arith.constant 0 : index
    %c0_7 = arith.constant 0 : index
    %8 = vector.load %arg5[%c0_6, %c0_7] : memref<2x38xf32, #tpu.memory_space<vmem>>, vector<2x38xf32>
    tpu.vector_store %arg5[%c0_6, %c0_7], %7 {strides = array<i32>} : memref<2x38xf32, #tpu.memory_space<vmem>>, vector<2x38xf32>,
    %c3_i32 = arith.constant 3 : i32
    %9 = arith.cmpi eq, %arg0, %c3_i32 : i32
    %10 = arith.extui %9 : i1 to i32
    %c0_i32_8 = arith.constant 0 : i32
    %11 = arith.cmpi ne, %10, %c0_i32_8 : i32
    scf.if %11 {
      %c0_9 = arith.constant 0 : index
      %c0_10 = arith.constant 0 : index
      %12 = vector.load %arg5[%c0_9, %c0_10] : memref<2x38xf32, #tpu.memory_space<vmem>>, vector<2x38xf32>
      %c0_11 = arith.constant 0 : index
      %c0_12 = arith.constant 0 : index
      %13 = vector.load %arg3[%c0_11, %c0_12] : memref<1x38xf32, #tpu.memory_space<vmem>>, vector<1x38xf32>
      %14 = vector.broadcast %13 : vector<1x38xf32> to vector<2x38xf32>
      %15 = arith.addf %12, %14 : vector<2x38xf32>
      %c0_13 = arith.constant 0 : index
      %c0_14 = arith.constant 0 : index
      %16 = vector.load %arg4[%c0_13, %c0_14] : memref<2x38xf32, #tpu.memory_space<vmem>>, vector<2x38xf32>
      tpu.vector_store %arg4[%c0_13, %c0_14], %15 {strides = array<i32>} : memref<2x38xf32, #tpu.memory_space<vmem>>, vector<2x38xf32>,
    } else {
    }
    return
  }
  func.func @transform_0(%arg0: i32) -> (i32, i32) {
    %c0_i32 = arith.constant 0 : i32
    %c0_i32_0 = arith.constant 0 : i32
    return %c0_i32, %arg0 : i32, i32
  }
  func.func @transform_1(%arg0: i32) -> (i32, i32) {
    %c0_i32 = arith.constant 0 : i32
    %c0_i32_0 = arith.constant 0 : i32
    return %arg0, %c0_i32 : i32, i32
  }
  func.func @transform_2(%arg0: i32) -> (i32, i32) {
    %c0_i32 = arith.constant 0 : i32
    %c0_i32_0 = arith.constant 0 : i32
    %c0_i32_1 = arith.constant 0 : i32
    return %c0_i32, %c0_i32_0 : i32, i32
  }
  func.func @transform_3(%arg0: i32) -> (i32, i32) {
    %c0_i32 = arith.constant 0 : i32
    %c0_i32_0 = arith.constant 0 : i32
    %c0_i32_1 = arith.constant 0 : i32
    return %c0_i32, %c0_i32_0 : i32, i32
  }
}

</mosaic_0001>

<bundles_post_ra>
// kernel: plant_disease_forward.5
= control target key start
LH: loop header
LB: loop body
LE: loop exit
PB: predicated region body
PF: predicated region fallthrough
CT: control target
= control target key end

     0   :  { %8 = vsyncpa [#allocation4], 0  ;;  %s496_s12 = smov 0   ;;  %s564_s0 = inlined_call_operand.vmem [shape: bf16[2,512], index: 0, kind: input, shape index: {}]   ;;  %s565_s1 = inlined_call_operand.vmem [shape: bf16[512,38], index: 1, kind: input, shape index: {}]   ;;  %s566_s2 = inlined_call_operand.vmem [shape: f32[1,38], index: 2, kind: input, shape index: {}]   ;;  %s567_s3 = inlined_call_operand.hbm [shape: f32[2,38], index: 3, kind: output, shape index: {}]  }
   0x1 LB: > { %s502_s13 = sadd.s32 4294967295, %s470_s12   ;;  %p361_p0 = scmp.ge.s32.totalorder %s470_s12, 1  ;;  %s470_s12 = sphi %s496_s12, %s14_s12  }
   0x2   : > { %p142_p1 = scmp.lt.s32.totalorder %s470_s12, 5 }
   0x4   : > { %p143_p2 = pnand %p361_p0, %p142_p1 }
   0x5   : > { %p164_p3 = scmp.lt.s32.totalorder (!%p143_p2), %s502_s13, 3  ;;  %s362_s14 = sshll.u32 (!%p143_p2), %s502_s13, 4 }
   0x6   : > { %146 = sbr.rel (%p143_p2) target bundleno = 304 (0x130), region = 32  ;;  %p168_p4 = scmp.lt.s32.totalorder (!%p143_p2), %s362_s14, 63 }
   0x7   : > { %p364_p5 = scmp.ne.s32.totalorder (!%p143_p2), %s502_s13, 0 }
   0xd   : > { %s509_s15 = scalar_select %p164_p3, %s502_s13, 3 }
   0xe   : > { %s569_s14 = smov (!%p168_p4, %s362_s14), 63  ;;  %177 = sbr.rel (%p364_p5) target bundleno = 21 (0x15), region = 36 }
   0xf   : > { %s166_s18 = scalar_lea.vmem %s564_s0, %s509_s15  ;;  %s363_s19 = sshll.u32 %s569_s14, 2  ;;  %vm178_vm0 = vcmask (!%p364_p5), 304128   ;;  %v472_v0 = vmov (!%p364_p5), 0.0  }
  0x10   : > { %s518_s22 = scalar_lea.vmem %s565_s1, %s363_s19  ;;  %179 = vst.msk [vmem:[#allocation2] sm:$0x3] (!%p364_p5), %vm178_vm0, %v472_v0 }
  0x15 PF: > { %v426_v1 = vld [vmem:[%s518_s22] sm:$0xff]   ;;  %v473_v2 = vmov 0.0   ;;  %v427_v3 = vld [vmem:[%s518_s22 + $0x8] sm:$0xff]   ;;  %vm474_vm1 = vmmov 0   ;;  %v428_v4 = vld [vmem:[%s518_s22 + $0x10] sm:$0xff]   ;;  %vm287_vm2 = vcmask 304128  }
  0x16   : > { %388 = vmatprep.subr.bf16.mxu0 %v473_v2  ;;  %404 = vmatprep.mubr.msk.bf16.mxu0 %vm474_vm1, %v473_v2  ;;  %v429_v5 = vld [vmem:[%s518_s22 + $0x18] sm:$0xff]   ;;  %v430_v6 = vld [vmem:[%s518_s22 + $0x20] sm:$0xff]   ;;  %v431_v7 = vld [vmem:[%s518_s22 + $0x28] sm:$0xff]   ;;  %p373_p6 = scmp.ne.s32.totalorder %s502_s13, 3 }
  0x17   : > { %389 = vmatpush3.bf16.msra.mxu0 %v426_v1  ;;  %v432_v8 = vld [vmem:[%s518_s22 + $0x30] sm:$0xff]   ;;  %v433_v9 = vld [vmem:[%s518_s22 + $0x38] sm:$0xff]   ;;  %v181_v10 = vld [vmem:[%s166_s18] sm:$0x1] }
  0x18   : > { %390 = vmatprep.subr.bf16.mxu0 %v473_v2  ;;  %v180_v11 = vld [vmem:[#allocation2] sm:$0x3] }
  0x19   : > { %v374_v18 = vld [vmem:[%s566_s2] ss:$0 sm:$0xff] (!%p373_p6) }
  0x1b   : > { %391 = vmatpush3.bf16.msra.mxu0 %v427_v3 }
  0x1c   : > { %392 = vmatprep.subr.bf16.mxu0 %v473_v2 }
  0x1f   : > { %393 = vmatpush3.bf16.msra.mxu0 %v428_v4 }
  0x20   : > { %394 = vmatprep.subr.bf16.mxu0 %v473_v2 }
  0x23   : > { %395 = vmatpush3.bf16.msra.mxu0 %v429_v5 }
  0x24   : > { %396 = vmatprep.subr.bf16.mxu0 %v473_v2 }
  0x27   : > { %397 = vmatpush3.bf16.msra.mxu0 %v430_v6 }
  0x28   : > { %398 = vmatprep.subr.bf16.mxu0 %v473_v2 }
  0x2b   : > { %399 = vmatpush3.bf16.msra.mxu0 %v431_v7 }
  0x2c   : > { %400 = vmatprep.subr.bf16.mxu0 %v473_v2 }
  0x2f   : > { %401 = vmatpush3.bf16.msra.mxu0 %v432_v8 }
  0x30   : > { %402 = vmatprep.subr.bf16.mxu0 %v473_v2 }
  0x33   : > { %403 = vmatpush3.bf16.msra.mxu0 %v433_v9 }
  0x36   : > { %405 = vmatmul.mubr.bf16.vlgmr.msra.gmra.mrb[0].mxu0 %v181_v10 }
 0x106   : > { %292 = sbr.rel (%p373_p6) target bundleno = 279 (0x117), region = 40 }
 0x109   : > { %v280_v12 = vpop.f32.mrb[0].mxu0 }
 0x10a   : > { %v286_v13 = vadd.f32 %v280_v12, %v180_v11  ;;  %v406_v14 = vpop.f32.mrb[1].mxu0 }
 0x10b   : > { %v283_v15 = vpop.f32.mrb[2].mxu0 }
 0x10c   : > { %288 = vst.msk [vmem:[#allocation2] sm:$0x3] %vm287_vm2, %v286_v13  ;;  %v407_v16 = vpop.f32.mrb[3].mxu0 }
 0x113   : > { %v293_v17 = vld [vmem:[#allocation2] sm:$0x3] }
 0x114   : > { %v301_v19 = vadd.f32 %v374_v18, %v293_v17 }
 0x116   : > { %302 = vst.msk [vmem:[#allocation3] sm:$0x3] %vm287_vm2, %v301_v19 }
 0x117 PF: > { %p412_p7 = scmp.eq.s32.totalorder %s502_s13, 3  ;;  %s475_s27 = smov [#allocation3]  }
 0x118   : > { %s310_s28 = sshll.u32 %s475_s27, 4  ;;  %s311_s28 = int_to_ptr.vmem [resolvable:$true] %s310_s28 }
 0x119   : > { %s434_s29 = scalar_lea.vmem %s311_s28, 32  ;;  %p441_p11 = scmp.lt.s32.totalorder %s311_s28, %s311_s28 }
 0x11a   : > { %p435_p8 = scmp.ne.s32.totalorder %s311_s28, %s434_s29  ;;  %p442_p12 = scmp.lt.s32.totalorder %s434_s29, %s434_s29 }
 0x11c   : > { %p436_p9 = pnand %p435_p8, %p412_p7  ;;  %p443_p13 = por %p442_p12, %p441_p11 }
 0x11e   : > { %p437_p10 = pneg %p436_p9 }
 0x120   : > { %p444_p0 = pnand %p443_p13, %p437_p10 }
 0x122   : > { %447 = shalt.err (!%p444_p0)
}
 0x123   : > { %s448_s5 = scalar_lea.hbm %s567_s3, 32 }
 0x124   : > { %p449_p1 = scmp.ne.s32.totalorder %s567_s3, %s448_s5  ;;  %p454_p4 = scmp.lt.u32.totalorder %s448_s5, %s567_s3 }
 0x126   : > { %p450_p2 = pnand %p449_p1, %p412_p7 }
 0x128   : > { %p451_p3 = pneg %p450_p2 }
 0x12a   : > { %p456_p5 = pnand %p454_p4, %p451_p3 }
 0x12c   : > { %459 = shalt.err (!%p456_p5)
}
 0x12d   : > { %409 = dma.vmem_to_hbm [thread:$0]  (%p412_p7), %s311_s28, 32, %s567_s3, [#allocation4]  }
 0x12e   : > { %465 = dma.done.wait (%p412_p7), [#allocation4], 32  }
 0x12f   : > { %467 = vsyncadd (%p412_p7), [#allocation4], 4294967264 }
 0x130 PF: > { %s14_s12 = sadd.s32 1, %s470_s12  }
 0x131   : > { %p11_p6 = scmp.ge.s32.totalorder %s14_s12, 6  }
 0x133   :  { %13 = sbr.rel (!%p11_p6) target bundleno = 1 (0x1), region = 70 }
 0x13a   :  { %323 = vsyncpa [#allocation4], 1 }
 0x13b   :  { %325 = vsyncpa [#allocation4 + $0x1], 1 }

// kernel: plant_disease_forward.4
= control target key start
LH: loop header
LB: loop body
LE: loop exit
PB: predicated region body
PF: predicated region fallthrough
CT: control target
= control target key end

     0   :  { %s916_s12 = smov 0   ;;  %s1175_s0 = inlined_call_operand.vmem [shape: bf16[2,8,8,16], index: 0, kind: input, shape index: {}]   ;;  %s1176_s1 = inlined_call_operand.vmem [shape: bf16[144,32], index: 1, kind: input, shape index: {}]   ;;  %s1177_s2 = inlined_call_operand.vmem [shape: f32[1,32], index: 2, kind: input, shape index: {}]   ;;  %s1178_s3 = inlined_call_operand.vmem [shape: bf16[2,4,4,32], index: 3, kind: output, shape index: {}]  }
   0x1 LB: > { %s789_s13 = sadd.s32 4294967295, %s885_s12   ;;  %p793_p0 = scmp.ge.s32.totalorder %s885_s12, 1  ;;  %s885_s12 = sphi %s916_s12, %s13_s12  }
   0x2   : > { %p137_p1 = scmp.lt.s32.totalorder %s885_s12, 3 }
   0x4   : > { %p138_p2 = pnand %p793_p0, %p137_p1 }
   0x5   : > { %p926_p3 = scmp.lt.s32.totalorder (!%p138_p2), %s789_s13, 1  ;;  %vm172_vm0 = vcmask (!%p138_p2), 130048   ;;  %vm174_vm1 = vcmask (!%p138_p2), 123904   ;;  %v887_v0 = vmov (!%p138_p2), 0.0   ;;  %v888_v1 = vmov (!%p138_p2), 0   ;;  %v870_v2 = vld [vmem:[%s1176_s1] sm:$0xff] (!%p138_p2)  }
   0x6   : > { %141 = sbr.rel (%p138_p2) target bundleno = 446 (0x1be), region = 32  ;;  %173 = vst.msk [vmem:[#allocation2] sm:$0xff] (!%p138_p2), %vm172_vm0, %v887_v0  ;;  %176 = vst.msk [vmem:[#allocation2 + $0x10] sm:$0xff] (!%p138_p2), %vm172_vm0, %v887_v0  ;;  %582 = vmatprep.subr.bf16.mxu0 (!%p138_p2), %v888_v1  ;;  %835 = vmatprep.subr.bf16.mxu1 (!%p138_p2), %v888_v1  ;;  %v871_v3 = vld [vmem:[%s1176_s1 + $0x8] sm:$0xff] (!%p138_p2)   ;;  %v872_v16 = vld [vmem:[%s1176_s1 + $0x10] sm:$0xff] (!%p138_p2)   ;;  %s889_s27 = smov (!%p138_p2), 32  }
   0x7   : > { %175 = vst.msk [vmem:[#allocation2 + $0x8] sm:$0x3] (!%p138_p2), %vm174_vm1, %v887_v0  ;;  %177 = vst.msk [vmem:[#allocation2 + $0x18] sm:$0x3] (!%p138_p2), %vm174_vm1, %v887_v0  ;;  %583 = vmatpush1.bf16.msra.mxu0 (!%p138_p2), %v870_v2  ;;  %844 = vmatpush1.bf16.msra.mxu1 (!%p138_p2), %v870_v2  ;;  %v873_v17 = vld [vmem:[%s1176_s1 + $0x18] sm:$0xff] (!%p138_p2)   ;;  %s890_s28 = smov (!%p138_p2), 16  }
   0x8   : > { %178 = vst.msk [vmem:[#allocation2 + $0x20] sm:$0xff] (!%p138_p2), %vm172_vm0, %v887_v0  ;;  %180 = vst.msk [vmem:[#allocation2 + $0x30] sm:$0xff] (!%p138_p2), %vm172_vm0, %v887_v0  ;;  %584 = vmatprep.subr.bf16.mxu0 (!%p138_p2), %v888_v1  ;;  %836 = vmatprep.subr.bf16.mxu1 (!%p138_p2), %v888_v1  ;;  %v874_v51 = vld [vmem:[%s1176_s1 + $0x20] sm:$0xff] (!%p138_p2)   ;;  %v875_v53 = vld [vmem:[%s1176_s1 + $0x28] sm:$0xff] (!%p138_p2)   ;;  %s891_s6 = smov (!%p138_p2), 48   ;;  %s892_s9 = smov (!%p138_p2), 64  }
   0x9   : > { %179 = vst.msk [vmem:[#allocation2 + $0x28] sm:$0x3] (!%p138_p2), %vm174_vm1, %v887_v0  ;;  %181 = vst.msk [vmem:[#allocation2 + $0x38] sm:$0x3] (!%p138_p2), %vm174_vm1, %v887_v0  ;;  %v876_v56 = vld [vmem:[%s1176_s1 + $0x30] sm:$0xff] (!%p138_p2)   ;;  %v877_v59 = vld [vmem:[%s1176_s1 + $0x38] sm:$0xff] (!%p138_p2)  }
   0xa   : > { %182 = vst.msk [vmem:[#allocation2 + $0x40] sm:$0xff] (!%p138_p2), %vm172_vm0, %v887_v0  ;;  %184 = vst.msk [vmem:[#allocation2 + $0x50] sm:$0xff] (!%p138_p2), %vm172_vm0, %v887_v0  ;;  %s893_s14 = smov (!%p138_p2), 80   ;;  %s895_s18 = smov (!%p138_p2), 112   ;;  %vm263_vm2 = vcmask (!%p138_p2), 261248   ;;  %vm296_vm3 = vcmask (!%p138_p2), 392448  }
   0xb   : > { %183 = vst.msk [vmem:[#allocation2 + $0x48] sm:$0x3] (!%p138_p2), %vm174_vm1, %v887_v0  ;;  %185 = vst.msk [vmem:[#allocation2 + $0x58] sm:$0x3] (!%p138_p2), %vm174_vm1, %v887_v0  ;;  %585 = vmatpush1.bf16.msra.mxu0 (!%p138_p2), %v871_v3  ;;  %845 = vmatpush1.bf16.msra.mxu1 (!%p138_p2), %v871_v3  ;;  %vm329_vm4 = vcmask (!%p138_p2), 523648   ;;  %vm362_vm5 = vcmask (!%p138_p2), 654848  }
   0xc   : > { %186 = vst.msk [vmem:[#allocation2 + $0x60] sm:$0xff] (!%p138_p2), %vm172_vm0, %v887_v0  ;;  %188 = vst.msk [vmem:[#allocation2 + $0x70] sm:$0xff] (!%p138_p2), %vm172_vm0, %v887_v0  ;;  %586 = vmatprep.subr.bf16.mxu0 (!%p138_p2), %v888_v1  ;;  %837 = vmatprep.subr.bf16.mxu1 (!%p138_p2), %v888_v1  ;;  %vm395_vm6 = vcmask (!%p138_p2), 786048   ;;  %vm429_vm7 = vcmask (!%p138_p2), 917248   ;;  %vm462_vm8 = vcmask (!%p138_p2), 1048448   ;;  %vm655_vm9 = vcmask (!%p138_p2), 261120  }
   0xd   : > { %187 = vst.msk [vmem:[#allocation2 + $0x68] sm:$0x3] %vm174_vm1, %v887_v0  ;;  %189 = vst.msk [vmem:[#allocation2 + $0x78] sm:$0x3] %vm174_vm1, %v887_v0  ;;  %s1181_s13 = smov (!%p926_p3, %s789_s13), 1  ;;  %v219_v20 = vld [vmem:[#allocation2] sm:$0xff] }
   0xe   : > { %190 = vst.msk [vmem:[#allocation2 + $0x80] sm:$0xff] %vm172_vm0, %v887_v0  ;;  %192 = vst.msk [vmem:[#allocation2 + $0x90] sm:$0xff] %vm172_vm0, %v887_v0  ;;  %s814_s17 = sshll.u32 %s1181_s13, 5  ;;  %v268_v18 = vld [vmem:[#allocation2 + $0x2] sm:$0xff]  ;;  %vm703_vm10 = vcmask 257024   ;;  %s815_s21 = sshll.u32 %s1181_s13, 3 }
   0xf   : > { %191 = vst.msk [vmem:[#allocation2 + $0x88] sm:$0x3] %vm174_vm1, %v887_v0  ;;  %193 = vst.msk [vmem:[#allocation2 + $0x98] sm:$0x3] %vm174_vm1, %v887_v0  ;;  %s165_s20 = scalar_lea.vmem %s1175_s0, %s814_s17  ;;  %587 = vmatpush1.bf16.msra.mxu0 %v872_v16  ;;  %846 = vmatpush1.bf16.msra.mxu1 %v872_v16  ;;  %v235_v19 = vld [vmem:[#allocation2 + $0x1] sm:$0xff]  ;;  %s894_s17 = smov 96  }
  0x10   : > { %v817_v4 = vld [vmem:[%s165_s20] sm:$0xff]   ;;  %v832_v5 = vld [vmem:[%s165_s20 + $0x8] sm:$0xff]   ;;  %v833_v6 = vld [vmem:[%s165_s20 + $0x10] sm:$0xff]   ;;  %588 = vmatprep.subr.bf16.mxu0 %v888_v1  ;;  %838 = vmatprep.subr.bf16.mxu1 %v888_v1  ;;  %s1150_s24 = scalar_lea.vmem %s1178_s3, %s815_s21  ;;  %vm729_vm11 = vcmask 254976  }
  0x11   : > { %v818_v7 = vunpack.c.l.bf16 %v817_v4  ;;  %v819_v8 = vunpack.c.h.bf16 %v817_v4  ;;  %v823_v9 = vunpack.c.h.bf16 %v832_v5  ;;  %v826_v10 = vunpack.c.l.bf16 %v833_v6  ;;  %v834_v11 = vld [vmem:[%s165_s20 + $0x18] sm:$0xff]   ;;  %v878_v0 = vld [vmem:[%s1176_s1 + $0x40] sm:$0xff]  }
  0x12   : > { %v827_v12 = vunpack.c.h.bf16 %v833_v6  ;;  %v830_v13 = vunpack.c.l.bf16 %v834_v11  ;;  %v822_v14 = vunpack.c.l.bf16 %v832_v5  ;;  %v831_v15 = vunpack.c.h.bf16 %v834_v11 }
  0x13   : > { %211 = vst.msk [vmem:[#allocation2 + $0x11] sm:$0xff] %vm172_vm0, %v818_v7  ;;  %212 = vst.msk [vmem:[#allocation2 + $0x21] sm:$0xff] %vm172_vm0, %v819_v8  ;;  %589 = vmatpush1.bf16.msra.mxu0 %v873_v17  ;;  %847 = vmatpush1.bf16.msra.mxu1 %v873_v17 }
  0x14   : > { %214 = vst.msk [vmem:[#allocation2 + $0x41] sm:$0xff] %vm172_vm0, %v823_v9  ;;  %215 = vst.msk [vmem:[#allocation2 + $0x51] sm:$0xff] %vm172_vm0, %v826_v10  ;;  %590 = vmatprep.subr.bf16.mxu0 %v888_v1  ;;  %839 = vmatprep.subr.bf16.mxu1 %v888_v1 }
  0x15   : > { %216 = vst.msk [vmem:[#allocation2 + $0x61] sm:$0xff] %vm172_vm0, %v827_v12  ;;  %217 = vst.msk [vmem:[#allocation2 + $0x71] sm:$0xff] %vm172_vm0, %v830_v13 }
  0x16   : > { %213 = vst.msk [vmem:[#allocation2 + $0x31] sm:$0xff] %vm172_vm0, %v822_v14  ;;  %218 = vst.msk [vmem:[#allocation2 + $0x81] sm:$0xff] %vm172_vm0, %v831_v15  ;;  %v474_v8 = vld [vmem:[#allocation2 + $0x92] sm:$0xff] }
  0x17   : > { %591 = vmatpush1.bf16.msra.mxu0 %v874_v51  ;;  %848 = vmatpush1.bf16.msra.mxu1 %v874_v51  ;;  %v408_v14 = vld [vmem:[#allocation2 + $0x90] sm:$0xff] }
  0x18   : > { %592 = vmatprep.subr.bf16.mxu0 %v888_v1  ;;  %840 = vmatprep.subr.bf16.mxu1 %v888_v1  ;;  %v441_v16 = vld [vmem:[#allocation2 + $0x91] sm:$0xff] }
  0x1a   : > { %v988_v21 = vld [vmem:[#allocation2 + $0x12] sm:$0xff]  ;;  %v302_v35 = vld [vmem:[#allocation2 + $0x20] sm:$0xff] }
  0x1b   : > { %v990_v22 = vld [vmem:[#allocation2 + $0x11] sm:$0xff]  ;;  %v992_v23 = vld [vmem:[#allocation2 + $0x42] sm:$0xff]  ;;  %v276_v24 = vpack.c.bf16 %v988_v21, %v268_v18  ;;  %593 = vmatpush1.bf16.msra.mxu0 %v875_v53  ;;  %849 = vmatpush1.bf16.msra.mxu1 %v875_v53 }
  0x1c   : > { %v243_v25 = vpack.c.bf16 %v990_v22, %v235_v19  ;;  %v996_v26 = vld [vmem:[#allocation2 + $0x52] sm:$0xff]  ;;  %v998_v27 = vld [vmem:[#allocation2 + $0x41] sm:$0xff]  ;;  %594 = vmatprep.subr.bf16.mxu0 %v888_v1  ;;  %841 = vmatprep.subr.bf16.mxu1 %v888_v1 }
  0x1d   : > { %v240_v28 = vld [vmem:[#allocation2 + $0x51] sm:$0xff]  ;;  %v278_v29 = vpack.c.bf16 %v996_v26, %v992_v23  ;;  %284 = vrot.lane.b32.xlu1 %v276_v24, %s889_s27  ;;  %v306_v33 = vld [vmem:[#allocation2 + $0x60] sm:$0xff] }
  0x1e   : > { %v301_v30 = vld [vmem:[#allocation2 + $0x10] sm:$0xff]  ;;  %251 = vrot.lane.b32.xlu0 %v243_v25, %s890_s28  ;;  %v1007_v31 = vpack.c.bf16 %v240_v28, %v998_v27  ;;  %v372_v37 = vld [vmem:[#allocation2 + $0x62] sm:$0xff] }
  0x1f   : > { %v305_v32 = vld [vmem:[#allocation2 + $0x50] sm:$0xff]  ;;  %v227_v34 = vpack.c.bf16 %v301_v30, %v219_v20  ;;  %480 = vst.msk [vmem:[#allocation3 + $0x18] sm:$0xff] %vm172_vm0, %v278_v29  ;;  %v368_v41 = vld [vmem:[#allocation2 + $0x22] sm:$0xff]  ;;  %v309_v45 = vpack.c.bf16 %v302_v35, %v301_v30  ;;  %v377_v57 = vpack.c.bf16 %v372_v37, %v996_v26  ;;  %595 = vmatpush1.bf16.msra.mxu0 %v876_v56 }
  0x20   : > { %v1009_v36 = vld [vmem:[#allocation2 + $0x70] sm:$0xff]  ;;  %v311_v40 = vpack.c.bf16 %v306_v33, %v305_v32  ;;  %v339_v46 = vld [vmem:[#allocation2 + $0x61] sm:$0xff]  ;;  %v375_v58 = vpack.c.bf16 %v368_v41, %v988_v21  ;;  %850 = vmatpush1.bf16.msra.mxu1 %v876_v56  ;;  %596 = vmatprep.subr.bf16.mxu0 %v888_v1 }
  0x21   : > { %v411_v38 = vpack.c.bf16 %v1009_v36, %v306_v33  ;;  %v1013_v39 = vld [vmem:[#allocation2 + $0x30] sm:$0xff]  ;;  %231 = vst.msk [vmem:[#allocation3] sm:$0xff] %vm172_vm0, %v227_v34  ;;  %288 = vrot.lane.b32.xlu1 %v278_v29, %s889_s27  ;;  %v335_v49 = vld [vmem:[#allocation2 + $0x21] sm:$0xff]  ;;  %v344_v54 = vpack.c.bf16 %v339_v46, %v240_v28  ;;  %842 = vmatprep.subr.bf16.mxu1 %v888_v1 }
  0x22   : > { %v409_v42 = vpack.c.bf16 %v1013_v39, %v302_v35  ;;  %v1017_v43 = vld [vmem:[#allocation2 + $0x72] sm:$0xff]  ;;  %255 = vrot.lane.b32.xlu0 %v1007_v31, %s890_s28  ;;  %v1027_v50 = vld [vmem:[#allocation2 + $0x40] sm:$0xff]  ;;  %v342_v55 = vpack.c.bf16 %v335_v49, %v990_v22 }
  0x23   : > { %v1019_v44 = vld [vmem:[#allocation2 + $0x32] sm:$0xff]  ;;  %v279_v47 = vpack.c.bf16 %v1017_v43, %v372_v37  ;;  %234 = vst.msk [vmem:[#allocation3 + $0x30] sm:$0xff] %vm172_vm0, %v411_v38  ;;  %v1034_v52 = vpack.c.bf16 %v305_v32, %v1027_v50  ;;  %597 = vmatpush1.bf16.msra.mxu0 %v877_v59  ;;  %v308_v4 = vld [vmem:[#allocation2 + $0x80] sm:$0xff] }
  0x24   : > { %v277_v48 = vpack.c.bf16 %v1019_v44, %v368_v41  ;;  %232 = vst.msk [vmem:[#allocation3 + $0x10] sm:$0xff] %vm172_vm0, %v409_v42  ;;  %v439_v62 = vld [vmem:[#allocation2 + $0x71] sm:$0xff]  ;;  %851 = vmatpush1.bf16.msra.mxu1 %v877_v59  ;;  %598 = vmatprep.subr.bf16.mxu0 %v888_v1  ;;  %v312_v5 = vpack.c.bf16 %v308_v4, %v1009_v36  ;;  %v341_v6 = vld [vmem:[#allocation2 + $0x81] sm:$0xff] }
  0x25   : > { %481 = vst.msk [vmem:[#allocation3 + $0x28] sm:$0xff] %vm172_vm0, %v279_v47  ;;  %321 = vrot.lane.b32.xlu1 %v311_v40, %s891_s6  ;;  %233 = vst.msk [vmem:[#allocation3 + $0x20] sm:$0xff] %vm172_vm0, %v1034_v52  ;;  %v435_v63 = vld [vmem:[#allocation2 + $0x31] sm:$0xff]  ;;  %v444_v2 = vpack.c.bf16 %v439_v62, %v339_v46  ;;  %843 = vmatprep.subr.bf16.mxu1 %v888_v1  ;;  %v310_v1 = vpack.c.bf16 %v1027_v50, %v1013_v39  ;;  %v374_v7 = vld [vmem:[#allocation2 + $0x82] sm:$0xff] }
  0x26   : > { %479 = vst.msk [vmem:[#allocation3 + $0x8] sm:$0xff] %vm172_vm0, %v277_v48  ;;  %317 = vrot.lane.b32.xlu0 %v309_v45, %s891_s6  ;;  %v442_v3 = vpack.c.bf16 %v435_v63, %v335_v49  ;;  %v345_v9 = vpack.c.bf16 %v341_v6, %v439_v62  ;;  %v343_v10 = vpack.c.bf16 %v998_v27, %v435_v63  ;;  %v486_v34 = vld [vmem:[#allocation3 + $0x18] sm:$0xff] }
  0x27   : > { %599 = vmatpush1.bf16.msra.mxu0 %v878_v0  ;;  %v478_v11 = vpack.c.bf16 %v474_v8, %v374_v7  ;;  %v378_v12 = vpack.c.bf16 %v374_v7, %v1017_v43  ;;  %v376_v13 = vpack.c.bf16 %v992_v23, %v1019_v44  ;;  %v412_v15 = vpack.c.bf16 %v408_v14, %v308_v4 }
  0x28   : > { %852 = vmatpush1.bf16.msra.mxu1 %v878_v0  ;;  %v445_v17 = vpack.c.bf16 %v441_v16, %v341_v6 }
  0x29   : > { %354 = vrot.lane.b32.xlu1 %v344_v54, %s892_s9  ;;  %482 = vst.msk [vmem:[#allocation3 + $0x38] sm:$0xff] %vm172_vm0, %v478_v11 }
  0x2a   : > { %350 = vrot.lane.b32.xlu0 %v342_v55, %s892_s9 }
  0x2c   : > { %v488_v61 = vld [vmem:[#allocation3 + $0x28] sm:$0xff] }
  0x2d   : > { %v484_v60 = vld [vmem:[#allocation3 + $0x8] sm:$0xff]  ;;  %387 = vrot.lane.b32.xlu1 %v377_v57, %s893_s14  ;;  %810 = vmatprep.mubr.msk.bf16.mxu1 %vm172_vm0, %v488_v61 }
  0x2e   : > { %383 = vrot.lane.b32.xlu0 %v375_v58, %s893_s14  ;;  %808 = vmatprep.mubr.msk.bf16.mxu0 %vm172_vm0, %v484_v60 }
  0x30   : > { %v490_v35 = vld [vmem:[#allocation3 + $0x38] sm:$0xff] }
  0x31   : > { %421 = vrot.lane.b32.xlu1 %v411_v38, %s894_s17 }
  0x32   : > { %417 = vrot.lane.b32.xlu0 %v409_v42, %s894_s17 }
  0x35   : > { %454 = vrot.lane.b32.xlu1 %v444_v2, %s895_s18 }
  0x36   : > { %450 = vrot.lane.b32.xlu0 %v442_v3, %s895_s18 }
  0x39   : > { %257 = vrot.lane.b32.xlu1 %v444_v2, %s890_s28 }
  0x3a   : > { %253 = vrot.lane.b32.xlu0 %v442_v3, %s890_s28 }
  0x3d   : > { %290 = vrot.lane.b32.xlu1 %v279_v47, %s889_s27 }
  0x3e   : > { %286 = vrot.lane.b32.xlu0 %v277_v48, %s889_s27 }
  0x41   : > { %323 = vrot.lane.b32.xlu1 %v312_v5, %s891_s6 }
  0x42   : > { %319 = vrot.lane.b32.xlu0 %v310_v1, %s891_s6 }
  0x45   : > { %356 = vrot.lane.b32.xlu1 %v345_v9, %s892_s9 }
  0x46   : > { %352 = vrot.lane.b32.xlu0 %v343_v10, %s892_s9 }
  0x49   : > { %389 = vrot.lane.b32.xlu1 %v378_v12, %s893_s14 }
  0x4a   : > { %385 = vrot.lane.b32.xlu0 %v376_v13, %s893_s14 }
  0x4d   : > { %423 = vrot.lane.b32.xlu1 %v412_v15, %s894_s17 }
  0x4e   : > { %419 = vrot.lane.b32.xlu0 %v1034_v52, %s894_s17  ;;  %v1132_v52 = vld [vmem:[%s1177_s2] ss:$0 sm:$0xff] }
  0x51   : > { %456 = vrot.lane.b32.xlu1 %v445_v17, %s895_s18 }
  0x52   : > { %452 = vrot.lane.b32.xlu0 %v1007_v31, %s895_s18 }
  0x8f   : > { %v285_v18 = vpop.permute.xlu1 %284 }
  0x90   : > { %v252_v19 = vpop.permute.xlu0 %251 }
  0x91   : > { %264 = vst.msk [vmem:[#allocation3] sm:$0xff] %vm263_vm2, %v252_v19 }
  0x92   : > { %297 = vst.msk [vmem:[#allocation3] sm:$0xff] %vm296_vm3, %v285_v18 }
  0x93   : > { %v289_v20 = vpop.permute.xlu1 %288 }
  0x94   : > { %v256_v21 = vpop.permute.xlu0 %255 }
  0x95   : > { %266 = vst.msk [vmem:[#allocation3 + $0x20] sm:$0xff] %vm263_vm2, %v256_v21 }
  0x96   : > { %299 = vst.msk [vmem:[#allocation3 + $0x20] sm:$0xff] %vm296_vm3, %v289_v20 }
  0x97   : > { %v322_v22 = vpop.permute.xlu1 %321 }
  0x98   : > { %v318_v23 = vpop.permute.xlu0 %317  ;;  %332 = vst.msk [vmem:[#allocation3 + $0x20] sm:$0xff] %vm329_vm4, %v322_v22 }
  0x99   : > { %330 = vst.msk [vmem:[#allocation3] sm:$0xff] %vm329_vm4, %v318_v23 }
  0x9b   : > { %v355_v24 = vpop.permute.xlu1 %354 }
  0x9c   : > { %v351_v25 = vpop.permute.xlu0 %350  ;;  %365 = vst.msk [vmem:[#allocation3 + $0x20] sm:$0xff] %vm362_vm5, %v355_v24 }
  0x9d   : > { %363 = vst.msk [vmem:[#allocation3] sm:$0xff] %vm362_vm5, %v351_v25 }
  0x9f   : > { %v388_v26 = vpop.permute.xlu1 %387 }
  0xa0   : > { %v384_v27 = vpop.permute.xlu0 %383  ;;  %398 = vst.msk [vmem:[#allocation3 + $0x20] sm:$0xff] %vm395_vm6, %v388_v26 }
  0xa1   : > { %396 = vst.msk [vmem:[#allocation3] sm:$0xff] %vm395_vm6, %v384_v27 }
  0xa3   : > { %v422_v28 = vpop.permute.xlu1 %421 }
  0xa4   : > { %v418_v29 = vpop.permute.xlu0 %417  ;;  %432 = vst.msk [vmem:[#allocation3 + $0x20] sm:$0xff] %vm429_vm7, %v422_v28 }
  0xa5   : > { %430 = vst.msk [vmem:[#allocation3] sm:$0xff] %vm429_vm7, %v418_v29 }
  0xa7   : > { %v455_v30 = vpop.permute.xlu1 %454 }
  0xa8   : > { %v451_v31 = vpop.permute.xlu0 %450  ;;  %465 = vst.msk [vmem:[#allocation3 + $0x20] sm:$0xff] %vm462_vm8, %v455_v30 }
  0xa9   : > { %463 = vst.msk [vmem:[#allocation3] sm:$0xff] %vm462_vm8, %v451_v31 }
  0xab   : > { %v258_v32 = vpop.permute.xlu1 %257 }
  0xac   : > { %v254_v33 = vpop.permute.xlu0 %253  ;;  %267 = vst.msk [vmem:[#allocation3 + $0x30] sm:$0xff] %vm263_vm2, %v258_v32 }
  0xad   : > { %265 = vst.msk [vmem:[#allocation3 + $0x10] sm:$0xff] %vm263_vm2, %v254_v33 }
  0xaf   : > { %v291_v36 = vpop.permute.xlu1 %290  ;;  %v487_v39 = vld [vmem:[#allocation3 + $0x20] sm:$0xff] }
  0xb0   : > { %v287_v37 = vpop.permute.xlu0 %286  ;;  %v483_v38 = vld [vmem:[#allocation3] sm:$0xff]  ;;  %300 = vst.msk [vmem:[#allocation3 + $0x30] sm:$0xff] %vm296_vm3, %v291_v36  ;;  %631 = vmatmul.mubr.bf16.vlgmr.msra.gmra.mrb[0].mxu1 %v487_v39 }
  0xb1   : > { %298 = vst.msk [vmem:[#allocation3 + $0x10] sm:$0xff] %vm296_vm3, %v287_v37  ;;  %615 = vmatmul.mubr.bf16.vlgmr.msra.gmra.mrb[0].mxu0 %v483_v38  ;;  %811 = vmatprep.mubr.msk.bf16.mxu1 %vm172_vm0, %v490_v35 }
  0xb2   : > { %809 = vmatprep.mubr.msk.bf16.mxu0 %vm172_vm0, %v486_v34 }
  0xb3   : > { %v324_v40 = vpop.permute.xlu1 %323 }
  0xb4   : > { %v320_v41 = vpop.permute.xlu0 %319  ;;  %333 = vst.msk [vmem:[#allocation3 + $0x30] sm:$0xff] %vm329_vm4, %v324_v40 }
  0xb5   : > { %331 = vst.msk [vmem:[#allocation3 + $0x10] sm:$0xff] %vm329_vm4, %v320_v41 }
  0xb7   : > { %v357_v42 = vpop.permute.xlu1 %356 }
  0xb8   : > { %v353_v43 = vpop.permute.xlu0 %352  ;;  %366 = vst.msk [vmem:[#allocation3 + $0x30] sm:$0xff] %vm362_vm5, %v357_v42 }
  0xb9   : > { %364 = vst.msk [vmem:[#allocation3 + $0x10] sm:$0xff] %vm362_vm5, %v353_v43 }
  0xbb   : > { %v390_v44 = vpop.permute.xlu1 %389 }
  0xbc   : > { %v386_v45 = vpop.permute.xlu0 %385  ;;  %399 = vst.msk [vmem:[#allocation3 + $0x30] sm:$0xff] %vm395_vm6, %v390_v44 }
  0xbd   : > { %397 = vst.msk [vmem:[#allocation3 + $0x10] sm:$0xff] %vm395_vm6, %v386_v45 }
  0xbf   : > { %v424_v46 = vpop.permute.xlu1 %423 }
  0xc0   : > { %v420_v47 = vpop.permute.xlu0 %419  ;;  %433 = vst.msk [vmem:[#allocation3 + $0x30] sm:$0xff] %vm429_vm7, %v424_v46 }
  0xc1   : > { %431 = vst.msk [vmem:[#allocation3 + $0x10] sm:$0xff] %vm429_vm7, %v420_v47 }
  0xc3   : > { %v457_v48 = vpop.permute.xlu1 %456 }
  0xc4   : > { %v453_v49 = vpop.permute.xlu0 %452  ;;  %466 = vst.msk [vmem:[#allocation3 + $0x30] sm:$0xff] %vm462_vm8, %v457_v48 }
  0xc5   : > { %464 = vst.msk [vmem:[#allocation3 + $0x10] sm:$0xff] %vm462_vm8, %v453_v49 }
  0xcb   : > { %v489_v51 = vld [vmem:[#allocation3 + $0x30] sm:$0xff] }
  0xcc   : > { %v485_v50 = vld [vmem:[#allocation3 + $0x10] sm:$0xff]  ;;  %639 = vmatmul.mubr.bf16.gmra.mrb[4].mxu1 %v489_v51 }
  0xcd   : > { %623 = vmatmul.mubr.bf16.gmra.mrb[4].mxu0 %v485_v50 }
 0x183   : > { %v632_v54 = vpop.f32.mrb[0].mxu1 }
 0x184   : > { %v616_v53 = vpop.f32.mrb[0].mxu0  ;;  %v633_v56 = vadd.f32 %v1132_v52, %v632_v54  ;;  %v634_v58 = vpop.f32.mrb[1].mxu1 }
 0x185   : > { %v617_v55 = vadd.f32 %v1132_v52, %v616_v53  ;;  %v618_v57 = vpop.f32.mrb[1].mxu0  ;;  %v635_v60 = vpop.f32.mrb[2].mxu1 }
 0x186   : > { %v619_v59 = vpop.f32.mrb[2].mxu0  ;;  %v651_v62 = vmax.f32 %v633_v56, 0.0  ;;  %v636_v0 = vadd.f32 %v1132_v52, %v635_v60  ;;  %v637_v3 = vpop.f32.mrb[3].mxu1 }
 0x187   : > { %v647_v61 = vmax.f32 %v617_v55, 0.0  ;;  %v620_v63 = vadd.f32 %v1132_v52, %v619_v59  ;;  %v621_v2 = vpop.f32.mrb[3].mxu0 }
 0x188   : > { %660 = vst.msk [vmem:[#allocation4 + $0x20] sm:$0xff] %vm655_vm9, %v651_v62  ;;  %v652_v5 = vmax.f32 %v636_v0, 0.0 }
 0x189   : > { %656 = vst.msk [vmem:[#allocation4] sm:$0xff] %vm655_vm9, %v647_v61  ;;  %v648_v4 = vmax.f32 %v620_v63, 0.0 }
 0x18a   : > { %661 = vst.msk [vmem:[#allocation4 + $0x28] sm:$0xff] %vm655_vm9, %v652_v5 }
 0x18b   : > { %657 = vst.msk [vmem:[#allocation4 + $0x8] sm:$0xff] %vm655_vm9, %v648_v4 }
 0x18f   : > { %v672_v8 = vld [vmem:[#allocation4 + $0x20] ss:$2 sm:$0xf]  ;;  %v688_v9 = vld [vmem:[#allocation4 + $0x21] ss:$2 sm:$0xf] }
 0x190   : > { %v664_v1 = vld [vmem:[#allocation4] ss:$2 sm:$0xf]  ;;  %v680_v6 = vld [vmem:[#allocation4 + $0x1] ss:$2 sm:$0xf]  ;;  %v699_v10 = vmax.f32 %v672_v8, %v688_v9 }
 0x191   : > { %v695_v7 = vmax.f32 %v664_v1, %v680_v6  ;;  %v674_v14 = vld [vmem:[#allocation4 + $0x28] ss:$2 sm:$0xf]  ;;  %v690_v15 = vld [vmem:[#allocation4 + $0x29] ss:$2 sm:$0xf] }
 0x192   : > { %v666_v11 = vld [vmem:[#allocation4 + $0x8] ss:$2 sm:$0xf]  ;;  %v682_v12 = vld [vmem:[#allocation4 + $0x9] ss:$2 sm:$0xf]  ;;  %v700_v16 = vmax.f32 %v674_v14, %v690_v15 }
 0x193   : > { %704 = vst.msk [vmem:[#allocation5] sm:$0xf] %vm703_vm10, %v695_v7  ;;  %v696_v13 = vmax.f32 %v666_v11, %v682_v12  ;;  %708 = vst.msk [vmem:[#allocation5 + $0x10] sm:$0xf] %vm703_vm10, %v699_v10 }
 0x194   : > { %709 = vst.msk [vmem:[#allocation5 + $0x14] sm:$0xf] %vm703_vm10, %v700_v16 }
 0x195   : > { %705 = vst.msk [vmem:[#allocation5 + $0x4] sm:$0xf] %vm703_vm10, %v696_v13 }
 0x19a   : > { %v712_v17 = vld [vmem:[#allocation5] sm:$0xf]  ;;  %v714_v19 = vld [vmem:[#allocation5 + $0x10] sm:$0xf] }
 0x19b   : > { %v719_v21 = vld [vmem:[#allocation5 + $0x14] sm:$0xf] }
 0x19c   : > { %v717_v18 = vld [vmem:[#allocation5 + $0x4] sm:$0xf]  ;;  %v723_v22 = vmax.f32 %v714_v19, %v719_v21 }
 0x19d   : > { %v721_v20 = vmax.f32 %v712_v17, %v717_v18 }
 0x19e   : > { %v727_v24 = vpack.c.bf16 %v723_v22, %v723_v22 }
 0x19f   : > { %v725_v23 = vpack.c.bf16 %v721_v20, %v721_v20  ;;  %v640_v26 = vpop.f32.mrb[4].mxu1 }
 0x1a0   : > { %v624_v25 = vpop.f32.mrb[4].mxu0  ;;  %v641_v28 = vadd.f32 %v1132_v52, %v640_v26  ;;  %v642_v30 = vpop.f32.mrb[5].mxu1  ;;  %732 = vst.msk [vmem:[%s1150_s24 + $0x4] sm:$0x3] %vm729_vm11, %v727_v24 }
 0x1a1   : > { %730 = vst.msk [vmem:[%s1150_s24] sm:$0x3] %vm729_vm11, %v725_v23  ;;  %v625_v27 = vadd.f32 %v1132_v52, %v624_v25  ;;  %v626_v29 = vpop.f32.mrb[5].mxu0  ;;  %v643_v32 = vpop.f32.mrb[6].mxu1 }
 0x1a2   : > { %v627_v31 = vpop.f32.mrb[6].mxu0  ;;  %v653_v34 = vmax.f32 %v641_v28, 0.0  ;;  %v644_v36 = vadd.f32 %v1132_v52, %v643_v32  ;;  %v645_v38 = vpop.f32.mrb[7].mxu1 }
 0x1a3   : > { %v649_v33 = vmax.f32 %v625_v27, 0.0  ;;  %v628_v35 = vadd.f32 %v1132_v52, %v627_v31  ;;  %v629_v37 = vpop.f32.mrb[7].mxu0 }
 0x1a4   : > { %662 = vst.msk [vmem:[#allocation4 + $0x30] sm:$0xff] %vm655_vm9, %v653_v34  ;;  %v654_v40 = vmax.f32 %v644_v36, 0.0 }
 0x1a5   : > { %658 = vst.msk [vmem:[#allocation4 + $0x10] sm:$0xff] %vm655_vm9, %v649_v33  ;;  %v650_v39 = vmax.f32 %v628_v35, 0.0 }
 0x1a6   : > { %663 = vst.msk [vmem:[#allocation4 + $0x38] sm:$0xff] %vm655_vm9, %v654_v40 }
 0x1a7   : > { %659 = vst.msk [vmem:[#allocation4 + $0x18] sm:$0xff] %vm655_vm9, %v650_v39 }
 0x1ab   : > { %v676_v44 = vld [vmem:[#allocation4 + $0x30] ss:$2 sm:$0xf]  ;;  %v692_v45 = vld [vmem:[#allocation4 + $0x31] ss:$2 sm:$0xf] }
 0x1ac   : > { %v668_v41 = vld [vmem:[#allocation4 + $0x10] ss:$2 sm:$0xf]  ;;  %v684_v42 = vld [vmem:[#allocation4 + $0x11] ss:$2 sm:$0xf]  ;;  %v701_v46 = vmax.f32 %v676_v44, %v692_v45 }
 0x1ad   : > { %v697_v43 = vmax.f32 %v668_v41, %v684_v42  ;;  %v678_v50 = vld [vmem:[#allocation4 + $0x38] ss:$2 sm:$0xf]  ;;  %v694_v51 = vld [vmem:[#allocation4 + $0x39] ss:$2 sm:$0xf] }
 0x1ae   : > { %v670_v47 = vld [vmem:[#allocation4 + $0x18] ss:$2 sm:$0xf]  ;;  %v686_v48 = vld [vmem:[#allocation4 + $0x19] ss:$2 sm:$0xf]  ;;  %v702_v52 = vmax.f32 %v678_v50, %v694_v51 }
 0x1af   : > { %706 = vst.msk [vmem:[#allocation5 + $0x8] sm:$0xf] %vm703_vm10, %v697_v43  ;;  %v698_v49 = vmax.f32 %v670_v47, %v686_v48  ;;  %710 = vst.msk [vmem:[#allocation5 + $0x18] sm:$0xf] %vm703_vm10, %v701_v46 }
 0x1b0   : > { %711 = vst.msk [vmem:[#allocation5 + $0x1c] sm:$0xf] %vm703_vm10, %v702_v52 }
 0x1b1   : > { %707 = vst.msk [vmem:[#allocation5 + $0xc] sm:$0xf] %vm703_vm10, %v698_v49 }
 0x1b6   : > { %v713_v53 = vld [vmem:[#allocation5 + $0x8] sm:$0xf]  ;;  %v715_v55 = vld [vmem:[#allocation5 + $0x18] sm:$0xf] }
 0x1b7   : > { %v720_v57 = vld [vmem:[#allocation5 + $0x1c] sm:$0xf] }
 0x1b8   : > { %v718_v54 = vld [vmem:[#allocation5 + $0xc] sm:$0xf]  ;;  %v724_v58 = vmax.f32 %v715_v55, %v720_v57 }
 0x1b9   : > { %v722_v56 = vmax.f32 %v713_v53, %v718_v54 }
 0x1ba   : > { %v728_v60 = vpack.c.bf16 %v724_v58, %v724_v58 }
 0x1bb   : > { %v726_v59 = vpack.c.bf16 %v722_v56, %v722_v56 }
 0x1bc   : > { %733 = vst.msk [vmem:[%s1150_s24 + $0x6] sm:$0x3] %vm729_vm11, %v728_v60 }
 0x1bd   : > { %731 = vst.msk [vmem:[%s1150_s24 + $0x2] sm:$0x3] %vm729_vm11, %v726_v59 }
 0x1be PF: > { %s13_s12 = sadd.s32 1, %s885_s12  }
 0x1bf   : > { %p10_p4 = scmp.ge.s32.totalorder %s13_s12, 4  }
 0x1c1   :  { %12 = sbr.rel (!%p10_p4) target bundleno = 1 (0x1), region = 80 }

// kernel: plant_disease_forward.3
= control target key start
LH: loop header
LB: loop body
LE: loop exit
PB: predicated region body
PF: predicated region fallthrough
CT: control target
= control target key end

     0   :  { %s2050_s12 = smov 0   ;;  %s2763_s0 = inlined_call_operand.vmem [shape: f32[2,16,16,3], index: 0, kind: input, shape index: {}]   ;;  %s2764_s1 = inlined_call_operand.vmem [shape: bf16[27,16], index: 1, kind: input, shape index: {}]   ;;  %s2765_s2 = inlined_call_operand.vmem [shape: f32[1,16], index: 2, kind: input, shape index: {}]   ;;  %s2766_s3 = inlined_call_operand.vmem [shape: bf16[2,8,8,16], index: 3, kind: output, shape index: {}]  }
   0x1 LB: > { %s1902_s13 = sadd.s32 4294967295, %s2018_s12   ;;  %p1906_p0 = scmp.ge.s32.totalorder %s2018_s12, 1  ;;  %s2018_s12 = sphi %s2050_s12, %s13_s12  }
   0x2   : > { %p137_p1 = scmp.lt.s32.totalorder %s2018_s12, 3 }
   0x4   : > { %p138_p2 = pnand %p1906_p0, %p137_p1 }
   0x5   : > { %vm172_vm0 = vcmask (!%p138_p2), 23552   ;;  %vm175_vm1 = vcmask (!%p138_p2), 17408   ;;  %p2060_p3 = scmp.lt.s32.totalorder (!%p138_p2), %s1902_s13, 1  ;;  %v2020_v0 = vmov (!%p138_p2), 0.0   ;;  %s2021_s19 = smov (!%p138_p2), 3   ;;  %vm1477_vm2 = vcmask (!%p138_p2), 1044480  }
   0x6   : > { %141 = sbr.rel (%p138_p2) target bundleno = 660 (0x294), region = 32  ;;  %173 = vst.msk [vmem:[#allocation2] sm:$0xff] (!%p138_p2), %vm172_vm0, %v2020_v0  ;;  %174 = vst.msk [vmem:[#allocation2 + $0x8] sm:$0xff] (!%p138_p2), %vm172_vm0, %v2020_v0  ;;  %s2022_s20 = smov (!%p138_p2), 6   ;;  %vm1478_vm3 = vcmask (!%p138_p2), 1045504   ;;  %vm469_vm4 = vcmask (!%p138_p2), 48152  }
   0x7   : > { %176 = vst.msk [vmem:[#allocation2 + $0x10] sm:$0x3] (!%p138_p2), %vm175_vm1, %v2020_v0  ;;  %179 = vst.msk [vmem:[#allocation2 + $0x28] sm:$0x3] (!%p138_p2), %vm175_vm1, %v2020_v0  ;;  %s2023_s21 = smov (!%p138_p2), 9   ;;  %s2024_s22 = smov (!%p138_p2), 12  }
   0x8   : > { %177 = vst.msk [vmem:[#allocation2 + $0x18] sm:$0xff] (!%p138_p2), %vm172_vm0, %v2020_v0  ;;  %178 = vst.msk [vmem:[#allocation2 + $0x20] sm:$0xff] (!%p138_p2), %vm172_vm0, %v2020_v0  ;;  %s2025_s23 = smov (!%p138_p2), 15   ;;  %s2026_s24 = smov (!%p138_p2), 18   ;;  %vm598_vm5 = vcmask (!%p138_p2), 72752   ;;  %vm727_vm6 = vcmask (!%p138_p2), 97352  }
   0x9   : > { %180 = vst.msk [vmem:[#allocation2 + $0x30] sm:$0xff] (!%p138_p2), %vm172_vm0, %v2020_v0  ;;  %181 = vst.msk [vmem:[#allocation2 + $0x38] sm:$0xff] (!%p138_p2), %vm172_vm0, %v2020_v0  ;;  %s2027_s25 = smov (!%p138_p2), 21   ;;  %s2029_s30 = smov (!%p138_p2), 24   ;;  %vm856_vm7 = vcmask (!%p138_p2), 121952   ;;  %vm985_vm8 = vcmask (!%p138_p2), 146552  }
   0xa   : > { %182 = vst.msk [vmem:[#allocation2 + $0x40] sm:$0x3] (!%p138_p2), %vm175_vm1, %v2020_v0  ;;  %185 = vst.msk [vmem:[#allocation2 + $0x58] sm:$0x3] (!%p138_p2), %vm175_vm1, %v2020_v0  ;;  %vm1115_vm9 = vcmask (!%p138_p2), 171152   ;;  %vm1244_vm10 = vcmask (!%p138_p2), 195752  }
   0xb   : > { %183 = vst.msk [vmem:[#allocation2 + $0x48] sm:$0xff] (!%p138_p2), %vm172_vm0, %v2020_v0  ;;  %184 = vst.msk [vmem:[#allocation2 + $0x50] sm:$0xff] (!%p138_p2), %vm172_vm0, %v2020_v0  ;;  %vm1373_vm11 = vcmask (!%p138_p2), 220352   ;;  %vm1428_vm12 = vcmask (!%p138_p2), 220160   ;;  %vm1677_vm13 = vcmask (!%p138_p2), 130048   ;;  %vm1838_vm14 = vcmask (!%p138_p2), 125952  }
   0xc   : > { %186 = vst.msk [vmem:[#allocation2 + $0x60] sm:$0xff] (!%p138_p2), %vm172_vm0, %v2020_v0  ;;  %187 = vst.msk [vmem:[#allocation2 + $0x68] sm:$0xff] (!%p138_p2), %vm172_vm0, %v2020_v0 }
   0xd   : > { %188 = vst.msk [vmem:[#allocation2 + $0x70] sm:$0x3] %vm175_vm1, %v2020_v0  ;;  %191 = vst.msk [vmem:[#allocation2 + $0x88] sm:$0x3] %vm175_vm1, %v2020_v0  ;;  %s2769_s13 = smov (!%p2060_p3, %s1902_s13), 1  ;;  %v357_v7 = vld [vmem:[#allocation2 + $0x1] sm:$0xff] }
   0xe   : > { %189 = vst.msk [vmem:[#allocation2 + $0x78] sm:$0xff] %vm172_vm0, %v2020_v0  ;;  %190 = vst.msk [vmem:[#allocation2 + $0x80] sm:$0xff] %vm172_vm0, %v2020_v0  ;;  %s1932_s15 = sshll.u32 %s2769_s13, 8  ;;  %v358_v8 = vld [vmem:[#allocation2 + $0x9] sm:$0xff]  ;;  %s1933_s6 = sshll.u32 %s2769_s13, 5 }
   0xf   : > { %192 = vst.msk [vmem:[#allocation2 + $0x90] sm:$0xff] %vm172_vm0, %v2020_v0  ;;  %193 = vst.msk [vmem:[#allocation2 + $0x98] sm:$0xff] %vm172_vm0, %v2020_v0  ;;  %s2128_s18 = scalar_lea.vmem %s2763_s0, %s1932_s15  ;;  %v486_v9 = vld [vmem:[#allocation2 + $0x2] sm:$0xff]  ;;  %v389_v10 = vpack.c.bf16 %v358_v8, %v357_v7  ;;  %v487_v11 = vld [vmem:[#allocation2 + $0xa] sm:$0xff]  ;;  %s2682_s9 = scalar_lea.vmem %s2766_s3, %s1933_s6 }
  0x10   : > { %194 = vst.msk [vmem:[#allocation2 + $0xa0] sm:$0x3] %vm175_vm1, %v2020_v0  ;;  %197 = vst.msk [vmem:[#allocation2 + $0xb8] sm:$0x3] %vm175_vm1, %v2020_v0  ;;  %v228_v1 = vld [vmem:[%s2128_s18] sm:$0xff]  ;;  %v229_v2 = vld [vmem:[%s2128_s18 + $0x8] sm:$0xff]  ;;  %v518_v17 = vpack.c.bf16 %v487_v11, %v486_v9 }
  0x11   : > { %195 = vst.msk [vmem:[#allocation2 + $0xa8] sm:$0xff] %vm172_vm0, %v2020_v0  ;;  %196 = vst.msk [vmem:[#allocation2 + $0xb0] sm:$0xff] %vm172_vm0, %v2020_v0  ;;  %v244_v3 = vld [vmem:[%s2128_s18 + $0x80] sm:$0xff]  ;;  %v245_v4 = vld [vmem:[%s2128_s18 + $0x88] sm:$0xff]  ;;  %421 = vrot.lane.b32.xlu0 %v389_v10, %s2021_s19 }
  0x12   : > { %198 = vst.msk [vmem:[#allocation2 + $0xc0] sm:$0xff] %vm172_vm0, %v2020_v0  ;;  %199 = vst.msk [vmem:[#allocation2 + $0xc8] sm:$0xff] %vm172_vm0, %v2020_v0  ;;  %v242_v5 = vld [vmem:[%s2128_s18 + $0x70] sm:$0xff]  ;;  %v243_v6 = vld [vmem:[%s2128_s18 + $0x78] sm:$0xff] }
  0x13   : > { %200 = vst.msk [vmem:[#allocation2 + $0xd0] sm:$0x3] %vm175_vm1, %v2020_v0  ;;  %203 = vst.msk [vmem:[#allocation2 + $0xe8] sm:$0x3] %vm175_vm1, %v2020_v0  ;;  %v230_v12 = vld [vmem:[%s2128_s18 + $0x10] sm:$0xff]  ;;  %v231_v13 = vld [vmem:[%s2128_s18 + $0x18] sm:$0xff] }
  0x14   : > { %201 = vst.msk [vmem:[#allocation2 + $0xd8] sm:$0xff] %vm172_vm0, %v2020_v0  ;;  %202 = vst.msk [vmem:[#allocation2 + $0xe0] sm:$0xff] %vm172_vm0, %v2020_v0  ;;  %v246_v14 = vld [vmem:[%s2128_s18 + $0x90] sm:$0xff]  ;;  %v247_v15 = vld [vmem:[%s2128_s18 + $0x98] sm:$0xff] }
  0x15   : > { %204 = vst.msk [vmem:[#allocation2 + $0xf0] sm:$0xff] %vm172_vm0, %v2020_v0  ;;  %205 = vst.msk [vmem:[#allocation2 + $0xf8] sm:$0xff] %vm172_vm0, %v2020_v0  ;;  %v232_v16 = vld [vmem:[%s2128_s18 + $0x20] sm:$0xff]  ;;  %v233_v18 = vld [vmem:[%s2128_s18 + $0x28] sm:$0xff]  ;;  %550 = vrot.lane.b32.xlu0 %v518_v17, %s2022_s20 }
  0x16   : > { %206 = vst.msk [vmem:[#allocation2 + $0x100] sm:$0x3] %vm175_vm1, %v2020_v0  ;;  %209 = vst.msk [vmem:[#allocation2 + $0x118] sm:$0x3] %vm175_vm1, %v2020_v0  ;;  %v248_v19 = vld [vmem:[%s2128_s18 + $0xa0] sm:$0xff]  ;;  %v249_v20 = vld [vmem:[%s2128_s18 + $0xa8] sm:$0xff] }
  0x17   : > { %207 = vst.msk [vmem:[#allocation2 + $0x108] sm:$0xff] %vm172_vm0, %v2020_v0  ;;  %208 = vst.msk [vmem:[#allocation2 + $0x110] sm:$0xff] %vm172_vm0, %v2020_v0  ;;  %v234_v21 = vld [vmem:[%s2128_s18 + $0x30] sm:$0xff]  ;;  %v235_v22 = vld [vmem:[%s2128_s18 + $0x38] sm:$0xff] }
  0x18   : > { %210 = vst.msk [vmem:[#allocation2 + $0x120] sm:$0xff] %vm172_vm0, %v2020_v0  ;;  %211 = vst.msk [vmem:[#allocation2 + $0x128] sm:$0xff] %vm172_vm0, %v2020_v0  ;;  %v250_v23 = vld [vmem:[%s2128_s18 + $0xb0] sm:$0xff]  ;;  %v251_v24 = vld [vmem:[%s2128_s18 + $0xb8] sm:$0xff] }
  0x19   : > { %212 = vst.msk [vmem:[#allocation2 + $0x130] sm:$0x3] %vm175_vm1, %v2020_v0  ;;  %215 = vst.msk [vmem:[#allocation2 + $0x148] sm:$0x3] %vm175_vm1, %v2020_v0  ;;  %v236_v25 = vld [vmem:[%s2128_s18 + $0x40] sm:$0xff]  ;;  %v237_v26 = vld [vmem:[%s2128_s18 + $0x48] sm:$0xff] }
  0x1a   : > { %213 = vst.msk [vmem:[#allocation2 + $0x138] sm:$0xff] %vm172_vm0, %v2020_v0  ;;  %214 = vst.msk [vmem:[#allocation2 + $0x140] sm:$0xff] %vm172_vm0, %v2020_v0  ;;  %v293_v7 = vld [vmem:[#allocation2] sm:$0xff] }
  0x1b   : > { %216 = vst.msk [vmem:[#allocation2 + $0x150] sm:$0xff] %vm172_vm0, %v2020_v0  ;;  %217 = vst.msk [vmem:[#allocation2 + $0x158] sm:$0xff] %vm172_vm0, %v2020_v0 }
  0x1c   : > { %218 = vst.msk [vmem:[#allocation2 + $0x160] sm:$0x3] %vm175_vm1, %v2020_v0  ;;  %221 = vst.msk [vmem:[#allocation2 + $0x178] sm:$0x3] %vm175_vm1, %v2020_v0 }
  0x1d   : > { %219 = vst.msk [vmem:[#allocation2 + $0x168] sm:$0xff] %vm172_vm0, %v2020_v0  ;;  %220 = vst.msk [vmem:[#allocation2 + $0x170] sm:$0xff] %vm172_vm0, %v2020_v0 }
  0x1e   : > { %222 = vst.msk [vmem:[#allocation2 + $0x180] sm:$0xff] %vm172_vm0, %v2020_v0  ;;  %223 = vst.msk [vmem:[#allocation2 + $0x188] sm:$0xff] %vm172_vm0, %v2020_v0 }
  0x1f   : > { %224 = vst.msk [vmem:[#allocation2 + $0x190] sm:$0x3] %vm175_vm1, %v2020_v0  ;;  %227 = vst.msk [vmem:[#allocation2 + $0x1a8] sm:$0x3] %vm175_vm1, %v2020_v0 }
  0x20   : > { %225 = vst.msk [vmem:[#allocation2 + $0x198] sm:$0xff] %vm172_vm0, %v2020_v0  ;;  %226 = vst.msk [vmem:[#allocation2 + $0x1a0] sm:$0xff] %vm172_vm0, %v2020_v0 }
  0x21   : > { %261 = vst.msk [vmem:[#allocation2 + $0x19] sm:$0xff] %vm172_vm0, %v228_v1  ;;  %262 = vst.msk [vmem:[#allocation2 + $0x21] sm:$0xff] %vm172_vm0, %v229_v2 }
  0x22   : > { %277 = vst.msk [vmem:[#allocation2 + $0xd9] sm:$0xff] %vm172_vm0, %v244_v3  ;;  %278 = vst.msk [vmem:[#allocation2 + $0xe1] sm:$0xff] %vm172_vm0, %v245_v4  ;;  %v252_v4 = vld [vmem:[%s2128_s18 + $0xc0] sm:$0xff] }
  0x23   : > { %275 = vst.msk [vmem:[#allocation2 + $0xc1] sm:$0xff] %vm172_vm0, %v242_v5  ;;  %276 = vst.msk [vmem:[#allocation2 + $0xc9] sm:$0xff] %vm172_vm0, %v243_v6  ;;  %v253_v5 = vld [vmem:[%s2128_s18 + $0xc8] sm:$0xff] }
  0x24   : > { %263 = vst.msk [vmem:[#allocation2 + $0x31] sm:$0xff] %vm172_vm0, %v230_v12  ;;  %264 = vst.msk [vmem:[#allocation2 + $0x39] sm:$0xff] %vm172_vm0, %v231_v13  ;;  %v294_v6 = vld [vmem:[#allocation2 + $0x8] sm:$0xff]  ;;  %v238_v13 = vld [vmem:[%s2128_s18 + $0x50] sm:$0xff] }
  0x25   : > { %279 = vst.msk [vmem:[#allocation2 + $0xf1] sm:$0xff] %vm172_vm0, %v246_v14  ;;  %280 = vst.msk [vmem:[#allocation2 + $0xf9] sm:$0xff] %vm172_vm0, %v247_v15  ;;  %v325_v8 = vpack.c.bf16 %v294_v6, %v293_v7  ;;  %v239_v14 = vld [vmem:[%s2128_s18 + $0x58] sm:$0xff]  ;;  %v254_v15 = vld [vmem:[%s2128_s18 + $0xd0] sm:$0xff] }
  0x26   : > { %265 = vst.msk [vmem:[#allocation2 + $0x49] sm:$0xff] %vm172_vm0, %v232_v16  ;;  %266 = vst.msk [vmem:[#allocation2 + $0x51] sm:$0xff] %vm172_vm0, %v233_v18  ;;  %v255_v16 = vld [vmem:[%s2128_s18 + $0xd8] sm:$0xff] }
  0x27   : > { %281 = vst.msk [vmem:[#allocation2 + $0x109] sm:$0xff] %vm172_vm0, %v248_v19  ;;  %282 = vst.msk [vmem:[#allocation2 + $0x111] sm:$0xff] %vm172_vm0, %v249_v20 }
  0x28   : > { %267 = vst.msk [vmem:[#allocation2 + $0x61] sm:$0xff] %vm172_vm0, %v234_v21  ;;  %268 = vst.msk [vmem:[#allocation2 + $0x69] sm:$0xff] %vm172_vm0, %v235_v22  ;;  %v359_v27 = vld [vmem:[#allocation2 + $0x19] sm:$0xff]  ;;  %v360_v28 = vld [vmem:[#allocation2 + $0x21] sm:$0xff] }
  0x29   : > { %283 = vst.msk [vmem:[#allocation2 + $0x121] sm:$0xff] %vm172_vm0, %v250_v23  ;;  %v375_v29 = vld [vmem:[#allocation2 + $0xd9] sm:$0xff]  ;;  %284 = vst.msk [vmem:[#allocation2 + $0x129] sm:$0xff] %vm172_vm0, %v251_v24  ;;  %v2171_v30 = vpack.c.bf16 %v360_v28, %v359_v27  ;;  %v376_v31 = vld [vmem:[#allocation2 + $0xe1] sm:$0xff] }
  0x2a   : > { %269 = vst.msk [vmem:[#allocation2 + $0x79] sm:$0xff] %vm172_vm0, %v236_v25  ;;  %270 = vst.msk [vmem:[#allocation2 + $0x81] sm:$0xff] %vm172_vm0, %v237_v26  ;;  %v373_v32 = vld [vmem:[#allocation2 + $0xc1] sm:$0xff]  ;;  %v374_v33 = vld [vmem:[#allocation2 + $0xc9] sm:$0xff]  ;;  %v2176_v36 = vpack.c.bf16 %v376_v31, %v375_v29 }
  0x2b   : > { %v397_v34 = vpack.c.bf16 %v374_v33, %v373_v32  ;;  %v488_v35 = vld [vmem:[#allocation2 + $0x1a] sm:$0xff]  ;;  %423 = vrot.lane.b32.xlu1 %v2171_v30, %s2021_s19  ;;  %v502_v37 = vld [vmem:[#allocation2 + $0xc2] sm:$0xff]  ;;  %v503_v38 = vld [vmem:[#allocation2 + $0xca] sm:$0xff]  ;;  %285 = vst.msk [vmem:[#allocation2 + $0x139] sm:$0xff] %vm172_vm0, %v252_v4 }
  0x2c   : > { %v489_v39 = vld [vmem:[#allocation2 + $0x22] sm:$0xff]  ;;  %v615_v40 = vld [vmem:[#allocation2 + $0x18] sm:$0xff]  ;;  %v617_v46 = vld [vmem:[#allocation2 + $0x30] sm:$0xff]  ;;  %v526_v52 = vpack.c.bf16 %v503_v38, %v502_v37  ;;  %286 = vst.msk [vmem:[#allocation2 + $0x141] sm:$0xff] %vm172_vm0, %v253_v5 }
  0x2d   : > { %v616_v41 = vld [vmem:[#allocation2 + $0x20] sm:$0xff]  ;;  %v631_v42 = vld [vmem:[#allocation2 + $0xd8] sm:$0xff]  ;;  %437 = vrot.lane.b32.xlu0 %v397_v34, %s2021_s19  ;;  %v2179_v43 = vpack.c.bf16 %v489_v39, %v488_v35  ;;  %v633_v50 = vld [vmem:[#allocation2 + $0xf0] sm:$0xff]  ;;  %341 = vst.msk [vmem:[#allocation3] sm:$0xff] %vm172_vm0, %v325_v8 }
  0x2e   : > { %v647_v44 = vpack.c.bf16 %v616_v41, %v615_v40  ;;  %v632_v45 = vld [vmem:[#allocation2 + $0xe0] sm:$0xff]  ;;  %v618_v47 = vld [vmem:[#allocation2 + $0x38] sm:$0xff]  ;;  %v1005_v56 = vld [vmem:[#allocation2 + $0x48] sm:$0xff]  ;;  %271 = vst.msk [vmem:[#allocation2 + $0x91] sm:$0xff] %vm172_vm0, %v238_v13 }
  0x2f   : > { %v655_v48 = vpack.c.bf16 %v632_v45, %v631_v42  ;;  %v2181_v49 = vpack.c.bf16 %v618_v47, %v617_v46  ;;  %v634_v51 = vld [vmem:[#allocation2 + $0xf8] sm:$0xff]  ;;  %439 = vrot.lane.b32.xlu1 %v2176_v36, %s2021_s19  ;;  %v505_v55 = vld [vmem:[#allocation2 + $0xe2] sm:$0xff]  ;;  %v1006_v57 = vld [vmem:[#allocation2 + $0x50] sm:$0xff]  ;;  %272 = vst.msk [vmem:[#allocation2 + $0x99] sm:$0xff] %vm172_vm0, %v239_v14 }
  0x30   : > { %v2185_v53 = vpack.c.bf16 %v634_v51, %v633_v50  ;;  %342 = vst.msk [vmem:[#allocation3 + $0x8] sm:$0xff] %vm172_vm0, %v647_v44  ;;  %v504_v54 = vld [vmem:[#allocation2 + $0xda] sm:$0xff]  ;;  %v2195_v58 = vpack.c.bf16 %v1006_v57, %v1005_v56  ;;  %v1021_v59 = vld [vmem:[#allocation2 + $0x108] sm:$0xff]  ;;  %v1022_v60 = vld [vmem:[#allocation2 + $0x110] sm:$0xff]  ;;  %v2028_v50 = vmov 65535  }
  0x31   : > { %350 = vst.msk [vmem:[#allocation3 + $0x48] sm:$0xff] %vm172_vm0, %v655_v48  ;;  %343 = vst.msk [vmem:[#allocation3 + $0x10] sm:$0xff] %vm172_vm0, %v2181_v49  ;;  %552 = vrot.lane.b32.xlu0 %v2179_v43, %s2022_s20  ;;  %v2198_v61 = vpack.c.bf16 %v505_v55, %v504_v54  ;;  %v2200_v62 = vpack.c.bf16 %v1022_v60, %v1021_v59  ;;  %v746_v63 = vld [vmem:[#allocation2 + $0x31] sm:$0xff]  ;;  %v747_v0 = vld [vmem:[#allocation2 + $0x39] sm:$0xff]  ;;  %v1479_v51 = vsel %vm1477_vm2, 4294967295, %v2028_v50 }
  0x32   : > { %351 = vst.msk [vmem:[#allocation3 + $0x50] sm:$0xff] %vm172_vm0, %v2185_v53  ;;  %344 = vst.msk [vmem:[#allocation3 + $0x18] sm:$0xff] %vm172_vm0, %v2195_v58  ;;  %v1009_v1 = vld [vmem:[#allocation2 + $0x78] sm:$0xff]  ;;  %v1010_v2 = vld [vmem:[#allocation2 + $0x80] sm:$0xff]  ;;  %v2222_v11 = vpack.c.bf16 %v747_v0, %v746_v63 }
  0x33   : > { %566 = vrot.lane.b32.xlu1 %v526_v52, %s2022_s20  ;;  %352 = vst.msk [vmem:[#allocation3 + $0x58] sm:$0xff] %vm172_vm0, %v2200_v62  ;;  %v2211_v3 = vpack.c.bf16 %v1010_v2, %v1009_v1  ;;  %v309_v9 = vld [vmem:[#allocation2 + $0xc0] sm:$0xff]  ;;  %v310_v10 = vld [vmem:[#allocation2 + $0xc8] sm:$0xff]  ;;  %287 = vst.msk [vmem:[#allocation2 + $0x151] sm:$0xff] %vm172_vm0, %v254_v15  ;;  %v1480_v52 = vsel %vm1478_vm3, %v1479_v51, 0 }
  0x34   : > { %v2224_v12 = vpack.c.bf16 %v310_v10, %v309_v9  ;;  %288 = vst.msk [vmem:[#allocation2 + $0x159] sm:$0xff] %vm172_vm0, %v255_v16  ;;  %v762_v17 = vld [vmem:[#allocation2 + $0xf1] sm:$0xff]  ;;  %v763_v18 = vld [vmem:[#allocation2 + $0xf9] sm:$0xff]  ;;  %v241_v32 = vld [vmem:[%s2128_s18 + $0x68] sm:$0xff] }
  0x35   : > { %679 = vrot.lane.b32.xlu0 %v647_v44, %s2023_s21  ;;  %346 = vst.msk [vmem:[#allocation3 + $0x28] sm:$0xff] %vm172_vm0, %v2211_v3  ;;  %v875_v19 = vld [vmem:[#allocation2 + $0x32] sm:$0xff]  ;;  %v876_v20 = vld [vmem:[#allocation2 + $0x3a] sm:$0xff]  ;;  %v2243_v21 = vpack.c.bf16 %v763_v18, %v762_v17  ;;  %274 = vst.msk [vmem:[#allocation2 + $0xb1] sm:$0xff] %vm172_vm0, %v241_v32 }
  0x36   : > { %349 = vst.msk [vmem:[#allocation3 + $0x40] sm:$0xff] %vm172_vm0, %v2224_v12  ;;  %v2247_v22 = vpack.c.bf16 %v876_v20, %v875_v19  ;;  %v625_v23 = vld [vmem:[#allocation2 + $0x90] sm:$0xff]  ;;  %v626_v24 = vld [vmem:[#allocation2 + $0x98] sm:$0xff]  ;;  %v240_v31 = vld [vmem:[%s2128_s18 + $0x60] sm:$0xff] }
  0x37   : > { %568 = vrot.lane.b32.xlu1 %v2198_v61, %s2022_s20  ;;  %v2249_v25 = vpack.c.bf16 %v626_v24, %v625_v23  ;;  %v891_v29 = vld [vmem:[#allocation2 + $0xf2] sm:$0xff]  ;;  %273 = vst.msk [vmem:[#allocation2 + $0xa9] sm:$0xff] %vm172_vm0, %v240_v31  ;;  %v256_v34 = vld [vmem:[%s2128_s18 + $0xe0] sm:$0xff]  ;;  %v257_v35 = vld [vmem:[%s2128_s18 + $0xe8] sm:$0xff] }
  0x38   : > { %289 = vst.msk [vmem:[#allocation2 + $0x169] sm:$0xff] %vm172_vm0, %v256_v34  ;;  %290 = vst.msk [vmem:[#allocation2 + $0x171] sm:$0xff] %vm172_vm0, %v257_v35  ;;  %v1134_v37 = vld [vmem:[#allocation2 + $0x49] sm:$0xff]  ;;  %v1135_v38 = vld [vmem:[#allocation2 + $0x51] sm:$0xff] }
  0x39   : > { %681 = vrot.lane.b32.xlu0 %v2181_v49, %s2023_s21  ;;  %347 = vst.msk [vmem:[#allocation3 + $0x30] sm:$0xff] %vm172_vm0, %v2249_v25  ;;  %v1165_v42 = vpack.c.bf16 %v1135_v38, %v1134_v37  ;;  %v1150_v45 = vld [vmem:[#allocation2 + $0x109] sm:$0xff]  ;;  %v1151_v46 = vld [vmem:[#allocation2 + $0x111] sm:$0xff]  ;;  %v2010_v47 = vld [vmem:[%s2764_s1] sm:$0xff]  }
  0x3a   : > { %v641_v26 = vld [vmem:[#allocation2 + $0x150] sm:$0xff]  ;;  %1952 = vmatprep.subr.bf16.mxu0 %v2010_v47  ;;  %1988 = vmatprep.subr.bf16.mxu1 %v2010_v47  ;;  %v622_v63 = vld [vmem:[#allocation2 + $0x68] sm:$0xff]  ;;  %v259_v1 = vld [vmem:[%s2128_s18 + $0xf8] sm:$0xff] }
  0x3b   : > { %695 = vrot.lane.b32.xlu1 %v655_v48, %s2023_s21  ;;  %v642_v27 = vld [vmem:[#allocation2 + $0x158] sm:$0xff]  ;;  %v1173_v48 = vpack.c.bf16 %v1151_v46, %v1150_v45  ;;  %1953 = vmatpush3.bf16.msra.mxu0 %v2010_v47  ;;  %v1263_v54 = vld [vmem:[#allocation2 + $0x4a] sm:$0xff]  ;;  %292 = vst.msk [vmem:[#allocation2 + $0x189] sm:$0xff] %vm172_vm0, %v259_v1  ;;  %v637_v4 = vld [vmem:[#allocation2 + $0x120] sm:$0xff] }
  0x3c   : > { %v2253_v28 = vpack.c.bf16 %v642_v27, %v641_v26  ;;  %1990 = vmatpush3.bf16.msra.mxu1 %v2010_v47  ;;  %v1264_v55 = vld [vmem:[#allocation2 + $0x52] sm:$0xff]  ;;  %v1279_v57 = vld [vmem:[#allocation2 + $0x10a] sm:$0xff]  ;;  %v750_v6 = vld [vmem:[#allocation2 + $0x61] sm:$0xff] }
  0x3d   : > { %808 = vrot.lane.b32.xlu0 %v2171_v30, %s2024_s22  ;;  %v892_v30 = vld [vmem:[#allocation2 + $0xfa] sm:$0xff]  ;;  %v1294_v56 = vpack.c.bf16 %v1264_v55, %v1263_v54  ;;  %v1280_v59 = vld [vmem:[#allocation2 + $0x112] sm:$0xff]  ;;  %v638_v5 = vld [vmem:[#allocation2 + $0x128] sm:$0xff] }
  0x3e   : > { %355 = vst.msk [vmem:[#allocation3 + $0x70] sm:$0xff] %vm172_vm0, %v2253_v28  ;;  %v2266_v33 = vpack.c.bf16 %v892_v30, %v891_v29  ;;  %v1014_v39 = vld [vmem:[#allocation2 + $0xb0] sm:$0xff]  ;;  %v1302_v60 = vpack.c.bf16 %v1280_v59, %v1279_v57  ;;  %v658_v8 = vpack.c.bf16 %v638_v5, %v637_v4  ;;  %v766_v9 = vld [vmem:[#allocation2 + $0x121] sm:$0xff]  ;;  %v1025_v18 = vld [vmem:[#allocation2 + $0x138] sm:$0xff] }
  0x3f   : > { %697 = vrot.lane.b32.xlu1 %v2185_v53, %s2023_s21  ;;  %v1029_v41 = vld [vmem:[#allocation2 + $0x168] sm:$0xff]  ;;  %v258_v0 = vld [vmem:[%s2128_s18 + $0xf0] sm:$0xff]  ;;  %v1026_v19 = vld [vmem:[#allocation2 + $0x140] sm:$0xff] }
  0x40   : > { %291 = vst.msk [vmem:[#allocation2 + $0x181] sm:$0xff] %vm172_vm0, %v258_v0  ;;  %v751_v7 = vld [vmem:[#allocation2 + $0x69] sm:$0xff]  ;;  %v1138_v20 = vld [vmem:[#allocation2 + $0x79] sm:$0xff]  ;;  %v754_v1 = vld [vmem:[#allocation2 + $0x91] sm:$0xff] }
  0x41   : > { %810 = vrot.lane.b32.xlu0 %v2222_v11, %s2024_s22  ;;  %v767_v10 = vld [vmem:[#allocation2 + $0x129] sm:$0xff]  ;;  %v301_v24 = vld [vmem:[#allocation2 + $0x60] sm:$0xff] }
  0x42   : > { %v880_v13 = vld [vmem:[#allocation2 + $0x6a] sm:$0xff]  ;;  %v2334_v14 = vpack.c.bf16 %v767_v10, %v766_v9  ;;  %v317_v27 = vld [vmem:[#allocation2 + $0x120] sm:$0xff]  ;;  %v883_v9 = vld [vmem:[#allocation2 + $0x92] sm:$0xff] }
  0x43   : > { %824 = vrot.lane.b32.xlu1 %v2176_v36, %s2024_s22  ;;  %v1013_v36 = vld [vmem:[#allocation2 + $0xa8] sm:$0xff]  ;;  %v1154_v32 = vld [vmem:[#allocation2 + $0x139] sm:$0xff] }
  0x44   : > { %v2281_v40 = vpack.c.bf16 %v1014_v39, %v1013_v36  ;;  %v896_v16 = vld [vmem:[#allocation2 + $0x12a] sm:$0xff]  ;;  %v1267_v38 = vld [vmem:[#allocation2 + $0x7a] sm:$0xff]  ;;  %v1268_v39 = vld [vmem:[#allocation2 + $0x82] sm:$0xff] }
  0x45   : > { %937 = vrot.lane.b32.xlu0 %v2179_v43, %s2025_s23  ;;  %v1030_v43 = vld [vmem:[#allocation2 + $0x170] sm:$0xff]  ;;  %v302_v26 = vld [vmem:[#allocation2 + $0x68] sm:$0xff]  ;;  %v2376_v47 = vpack.c.bf16 %v1268_v39, %v1267_v38  ;;  %v884_v10 = vld [vmem:[#allocation2 + $0x9a] sm:$0xff] }
  0x46   : > { %348 = vst.msk [vmem:[#allocation3 + $0x38] sm:$0xff] %vm172_vm0, %v2281_v40  ;;  %v2287_v44 = vpack.c.bf16 %v1030_v43, %v1029_v41  ;;  %v329_v30 = vpack.c.bf16 %v302_v26, %v301_v24  ;;  %v318_v31 = vld [vmem:[#allocation2 + $0x128] sm:$0xff]  ;;  %v319_v41 = vld [vmem:[#allocation2 + $0x138] sm:$0xff] }
  0x47   : > { %826 = vrot.lane.b32.xlu1 %v2243_v21, %s2024_s22  ;;  %v337_v34 = vpack.c.bf16 %v318_v31, %v317_v27  ;;  %v1284_v50 = vld [vmem:[#allocation2 + $0x142] sm:$0xff]  ;;  %v1143_v26 = vld [vmem:[#allocation2 + $0xb1] sm:$0xff] }
  0x48   : > { %356 = vst.msk [vmem:[#allocation3 + $0x78] sm:$0xff] %vm172_vm0, %v2287_v44  ;;  %345 = vst.msk [vmem:[#allocation3 + $0x20] sm:$0xff] %vm172_vm0, %v329_v30  ;;  %v1142_v24 = vld [vmem:[#allocation2 + $0xa9] sm:$0xff]  ;;  %v1272_v39 = vld [vmem:[#allocation2 + $0xb2] sm:$0xff] }
  0x49   : > { %939 = vrot.lane.b32.xlu0 %v2247_v22, %s2025_s23  ;;  %353 = vst.msk [vmem:[#allocation3 + $0x60] sm:$0xff] %vm172_vm0, %v337_v34  ;;  %v1271_v38 = vld [vmem:[#allocation2 + $0xaa] sm:$0xff] }
  0x4b   : > { %953 = vrot.lane.b32.xlu1 %v2198_v61, %s2025_s23  ;;  %v621_v61 = vld [vmem:[#allocation2 + $0x60] sm:$0xff] }
  0x4c   : > { %v650_v2 = vpack.c.bf16 %v622_v63, %v621_v61 }
  0x4d   : > { %1067 = vrot.lane.b32.xlu0 %v2181_v49, %s2026_s24  ;;  %v2011_v49 = vld [vmem:[%s2764_s1 + $0x8] sm:$0x3f]  }
  0x4f   : > { %955 = vrot.lane.b32.xlu1 %v2266_v33, %s2025_s23 }
  0x51   : > { %1069 = vrot.lane.b32.xlu0 %v2195_v58, %s2026_s24 }
  0x53   : > { %1083 = vrot.lane.b32.xlu1 %v2185_v53, %s2026_s24  ;;  %v1482_v53 = vand.u32 %v2011_v49, %v1480_v52  ;;  %v1283_v49 = vld [vmem:[#allocation2 + $0x13a] sm:$0xff] }
  0x55   : > { %1196 = vrot.lane.b32.xlu0 %v2222_v11, %s2027_s25  ;;  %1954 = vmatprep.subr.bf16.mxu0 %v1482_v53 }
  0x56   : > { %1955 = vmatpush3.bf16.msra.mxu0 %v1482_v53  ;;  %1989 = vmatprep.subr.bf16.mxu1 %v1482_v53 }
  0x57   : > { %1085 = vrot.lane.b32.xlu1 %v2200_v62, %s2026_s24  ;;  %1991 = vmatpush3.bf16.msra.mxu1 %v1482_v53  ;;  %v2388_v53 = vpack.c.bf16 %v1284_v50, %v1283_v49 }
  0x59   : > { %1198 = vrot.lane.b32.xlu0 %v1165_v42, %s2027_s25 }
  0x5b   : > { %1212 = vrot.lane.b32.xlu1 %v2243_v21, %s2027_s25 }
  0x5d   : > { %1325 = vrot.lane.b32.xlu0 %v2247_v22, %s2029_s30 }
  0x5f   : > { %1214 = vrot.lane.b32.xlu1 %v1173_v48, %s2027_s25 }
  0x61   : > { %425 = vrot.lane.b32.xlu0 %v2222_v11, %s2021_s19  ;;  %v879_v11 = vld [vmem:[#allocation2 + $0x62] sm:$0xff] }
  0x62   : > { %v2337_v15 = vpack.c.bf16 %v880_v13, %v879_v11 }
  0x63   : > { %1341 = vrot.lane.b32.xlu1 %v2266_v33, %s2029_s30 }
  0x65   : > { %1327 = vrot.lane.b32.xlu0 %v1294_v56, %s2029_s30 }
  0x67   : > { %441 = vrot.lane.b32.xlu1 %v2243_v21, %s2021_s19  ;;  %v1139_v21 = vld [vmem:[#allocation2 + $0x81] sm:$0xff] }
  0x68   : > { %v2355_v23 = vpack.c.bf16 %v1139_v21, %v1138_v20 }
  0x69   : > { %427 = vrot.lane.b32.xlu0 %v1165_v42, %s2021_s19 }
  0x6b   : > { %1343 = vrot.lane.b32.xlu1 %v1302_v60, %s2029_s30 }
  0x6d   : > { %554 = vrot.lane.b32.xlu0 %v2247_v22, %s2022_s20  ;;  %v2352_v22 = vpack.c.bf16 %v1026_v19, %v1025_v18 }
  0x6f   : > { %443 = vrot.lane.b32.xlu1 %v1173_v48, %s2021_s19 }
  0x71   : > { %556 = vrot.lane.b32.xlu0 %v1294_v56, %s2022_s20 }
  0x73   : > { %570 = vrot.lane.b32.xlu1 %v2266_v33, %s2022_s20  ;;  %v1155_v33 = vld [vmem:[#allocation2 + $0x141] sm:$0xff] }
  0x74   : > { %v2366_v36 = vpack.c.bf16 %v1155_v33, %v1154_v32  ;;  %v1159_v32 = vld [vmem:[#allocation2 + $0x171] sm:$0xff] }
  0x75   : > { %683 = vrot.lane.b32.xlu0 %v2195_v58, %s2023_s21  ;;  %v779_v58 = vpack.c.bf16 %v751_v7, %v750_v6  ;;  %v770_v7 = vld [vmem:[#allocation2 + $0x151] sm:$0xff] }
  0x77   : > { %572 = vrot.lane.b32.xlu1 %v1302_v60, %s2022_s20 }
  0x79   : > { %685 = vrot.lane.b32.xlu0 %v650_v2, %s2023_s21 }
  0x7b   : > { %699 = vrot.lane.b32.xlu1 %v2200_v62, %s2023_s21  ;;  %v895_v62 = vld [vmem:[#allocation2 + $0x122] sm:$0xff] }
  0x7c   : > { %v2344_v17 = vpack.c.bf16 %v896_v16, %v895_v62  ;;  %v899_v16 = vld [vmem:[#allocation2 + $0x152] sm:$0xff] }
  0x7d   : > { %812 = vrot.lane.b32.xlu0 %v1165_v42, %s2024_s22  ;;  %v320_v42 = vld [vmem:[#allocation2 + $0x140] sm:$0xff] }
  0x7e   : > { %v338_v45 = vpack.c.bf16 %v320_v42, %v319_v41 }
  0x7f   : > { %701 = vrot.lane.b32.xlu1 %v658_v8, %s2023_s21 }
  0x80   : > { %354 = vst.msk [vmem:[#allocation3 + $0x68] sm:$0xff] %vm172_vm0, %v338_v45  ;;  %v2492_v45 = vpack.c.bf16 %v1272_v39, %v1271_v38  ;;  %v1275_v39 = vld [vmem:[#allocation2 + $0xda] sm:$0xff] }
  0x81   : > { %814 = vrot.lane.b32.xlu0 %v779_v58, %s2024_s22 }
  0x83   : > { %828 = vrot.lane.b32.xlu1 %v1173_v48, %s2024_s22  ;;  %v422_v29 = vpop.permute.xlu0 %421 }
  0x84   : > { %470 = vst.msk [vmem:[#allocation3] sm:$0xff] %vm469_vm4, %v422_v29  ;;  %v2467_v29 = vpack.c.bf16 %v1143_v26, %v1142_v24 }
  0x85   : > { %941 = vrot.lane.b32.xlu0 %v1294_v56, %s2025_s23 }
  0x87   : > { %830 = vrot.lane.b32.xlu1 %v2334_v14, %s2024_s22  ;;  %v551_v35 = vpop.permute.xlu0 %550 }
  0x88   : > { %599 = vst.msk [vmem:[#allocation3] sm:$0xff] %vm598_vm5, %v551_v35 }
  0x89   : > { %943 = vrot.lane.b32.xlu0 %v2337_v15, %s2025_s23 }
  0x8b   : > { %957 = vrot.lane.b32.xlu1 %v1302_v60, %s2025_s23 }
  0x8d   : > { %1071 = vrot.lane.b32.xlu0 %v650_v2, %s2026_s24  ;;  %v755_v2 = vld [vmem:[#allocation2 + $0x99] sm:$0xff] }
  0x8e   : > { %v2423_v5 = vpack.c.bf16 %v755_v2, %v754_v1  ;;  %v758_v2 = vld [vmem:[#allocation2 + $0xc1] sm:$0xff] }
  0x8f   : > { %959 = vrot.lane.b32.xlu1 %v2344_v17, %s2025_s23 }
  0x91   : > { %1073 = vrot.lane.b32.xlu0 %v2211_v3, %s2026_s24 }
  0x93   : > { %1087 = vrot.lane.b32.xlu1 %v658_v8, %s2026_s24  ;;  %v771_v8 = vld [vmem:[#allocation2 + $0x159] sm:$0xff] }
  0x94   : > { %v2434_v13 = vpack.c.bf16 %v771_v8, %v770_v7  ;;  %v774_v8 = vld [vmem:[#allocation2 + $0x181] sm:$0xff] }
  0x95   : > { %1200 = vrot.lane.b32.xlu0 %v779_v58, %s2027_s25 }
  0x97   : > { %1089 = vrot.lane.b32.xlu1 %v2352_v22, %s2026_s24 }
  0x99   : > { %1202 = vrot.lane.b32.xlu0 %v2355_v23, %s2027_s25 }
  0x9b   : > { %1216 = vrot.lane.b32.xlu1 %v2334_v14, %s2027_s25 }
  0x9d   : > { %v424_v37 = vpop.permute.xlu1 %423  ;;  %1329 = vrot.lane.b32.xlu0 %v2337_v15, %s2029_s30 }
  0x9e   : > { %471 = vst.msk [vmem:[#allocation3 + $0x8] sm:$0xff] %vm469_vm4, %v424_v37 }
  0x9f   : > { %1218 = vrot.lane.b32.xlu1 %v2366_v36, %s2027_s25  ;;  %v438_v43 = vpop.permute.xlu0 %437 }
  0xa0   : > { %478 = vst.msk [vmem:[#allocation3 + $0x40] sm:$0xff] %vm469_vm4, %v438_v43 }
  0xa1   : > { %v440_v46 = vpop.permute.xlu1 %439  ;;  %429 = vrot.lane.b32.xlu0 %v779_v58, %s2021_s19 }
  0xa2   : > { %479 = vst.msk [vmem:[#allocation3 + $0x48] sm:$0xff] %vm469_vm4, %v440_v46 }
  0xa3   : > { %1345 = vrot.lane.b32.xlu1 %v2344_v17, %s2029_s30  ;;  %v553_v48 = vpop.permute.xlu0 %552 }
  0xa4   : > { %600 = vst.msk [vmem:[#allocation3 + $0x8] sm:$0xff] %vm598_vm5, %v553_v48  ;;  %v1288_v48 = vld [vmem:[#allocation2 + $0x172] sm:$0xff] }
  0xa5   : > { %v567_v51 = vpop.permute.xlu1 %566  ;;  %1331 = vrot.lane.b32.xlu0 %v2376_v47, %s2029_s30 }
  0xa6   : > { %607 = vst.msk [vmem:[#allocation3 + $0x40] sm:$0xff] %vm598_vm5, %v567_v51 }
  0xa7   : > { %445 = vrot.lane.b32.xlu1 %v2334_v14, %s2021_s19  ;;  %v680_v52 = vpop.permute.xlu0 %679 }
  0xa8   : > { %728 = vst.msk [vmem:[#allocation3] sm:$0xff] %vm727_vm6, %v680_v52 }
  0xa9   : > { %v569_v54 = vpop.permute.xlu1 %568  ;;  %431 = vrot.lane.b32.xlu0 %v2355_v23, %s2021_s19 }
  0xaa   : > { %608 = vst.msk [vmem:[#allocation3 + $0x48] sm:$0xff] %vm598_vm5, %v569_v54 }
  0xab   : > { %1347 = vrot.lane.b32.xlu1 %v2388_v53, %s2029_s30  ;;  %v682_v55 = vpop.permute.xlu0 %681 }
  0xac   : > { %729 = vst.msk [vmem:[#allocation3 + $0x8] sm:$0xff] %vm727_vm6, %v682_v55 }
  0xad   : > { %v696_v56 = vpop.permute.xlu1 %695  ;;  %558 = vrot.lane.b32.xlu0 %v2337_v15, %s2022_s20  ;;  %v2439_v15 = vpack.c.bf16 %v884_v10, %v883_v9  ;;  %v888_v10 = vld [vmem:[#allocation2 + $0xca] sm:$0xff] }
  0xae   : > { %736 = vst.msk [vmem:[#allocation3 + $0x40] sm:$0xff] %vm727_vm6, %v696_v56 }
  0xaf   : > { %447 = vrot.lane.b32.xlu1 %v2366_v36, %s2021_s19  ;;  %v809_v57 = vpop.permute.xlu0 %808 }
  0xb0   : > { %857 = vst.msk [vmem:[#allocation3] sm:$0xff] %vm856_vm7, %v809_v57 }
  0xb1   : > { %v698_v59 = vpop.permute.xlu1 %697  ;;  %560 = vrot.lane.b32.xlu0 %v2376_v47, %s2022_s20 }
  0xb2   : > { %737 = vst.msk [vmem:[#allocation3 + $0x48] sm:$0xff] %vm727_vm6, %v698_v59 }
  0xb3   : > { %574 = vrot.lane.b32.xlu1 %v2344_v17, %s2022_s20  ;;  %v811_v60 = vpop.permute.xlu0 %810  ;;  %v900_v17 = vld [vmem:[#allocation2 + $0x15a] sm:$0xff] }
  0xb4   : > { %858 = vst.msk [vmem:[#allocation3 + $0x8] sm:$0xff] %vm856_vm7, %v811_v60  ;;  %v2450_v20 = vpack.c.bf16 %v900_v17, %v899_v16  ;;  %v903_v16 = vld [vmem:[#allocation2 + $0x182] sm:$0xff]  ;;  %v904_v17 = vld [vmem:[#allocation2 + $0x18a] sm:$0xff] }
  0xb5   : > { %v825_v61 = vpop.permute.xlu1 %824  ;;  %687 = vrot.lane.b32.xlu0 %v2211_v3, %s2023_s21 }
  0xb6   : > { %865 = vst.msk [vmem:[#allocation3 + $0x40] sm:$0xff] %vm856_vm7, %v825_v61 }
  0xb7   : > { %576 = vrot.lane.b32.xlu1 %v2388_v53, %s2022_s20  ;;  %v938_v63 = vpop.permute.xlu0 %937 }
  0xb8   : > { %986 = vst.msk [vmem:[#allocation3] sm:$0xff] %vm985_vm8, %v938_v63  ;;  %v645_v63 = vld [vmem:[#allocation2 + $0x180] sm:$0xff] }
  0xb9   : > { %v827_v0 = vpop.permute.xlu1 %826  ;;  %689 = vrot.lane.b32.xlu0 %v2249_v25, %s2023_s21 }
  0xba   : > { %866 = vst.msk [vmem:[#allocation3 + $0x48] sm:$0xff] %vm856_vm7, %v827_v0  ;;  %v646_v0 = vld [vmem:[#allocation2 + $0x188] sm:$0xff] }
  0xbb   : > { %703 = vrot.lane.b32.xlu1 %v2352_v22, %s2023_s21  ;;  %v940_v3 = vpop.permute.xlu0 %939 }
  0xbc   : > { %987 = vst.msk [vmem:[#allocation3 + $0x8] sm:$0xff] %vm985_vm8, %v940_v3  ;;  %v759_v3 = vld [vmem:[#allocation2 + $0xc9] sm:$0xff] }
  0xbd   : > { %v954_v4 = vpop.permute.xlu1 %953  ;;  %816 = vrot.lane.b32.xlu0 %v2355_v23, %s2024_s22 }
  0xbe   : > { %994 = vst.msk [vmem:[#allocation3 + $0x40] sm:$0xff] %vm985_vm8, %v954_v4  ;;  %v662_v4 = vpack.c.bf16 %v646_v0, %v645_v63 }
  0xbf   : > { %705 = vrot.lane.b32.xlu1 %v2253_v28, %s2023_s21  ;;  %v1068_v6 = vpop.permute.xlu0 %1067 }
  0xc0   : > { %1116 = vst.msk [vmem:[#allocation3] sm:$0xff] %vm1115_vm9, %v1068_v6  ;;  %v783_v6 = vpack.c.bf16 %v759_v3, %v758_v2 }
  0xc1   : > { %v956_v58 = vpop.permute.xlu1 %955  ;;  %818 = vrot.lane.b32.xlu0 %v2423_v5, %s2024_s22 }
  0xc2   : > { %995 = vst.msk [vmem:[#allocation3 + $0x48] sm:$0xff] %vm985_vm8, %v956_v58  ;;  %v775_v58 = vld [vmem:[#allocation2 + $0x189] sm:$0xff] }
  0xc3   : > { %832 = vrot.lane.b32.xlu1 %v2366_v36, %s2024_s22  ;;  %v1070_v11 = vpop.permute.xlu0 %1069 }
  0xc4   : > { %1117 = vst.msk [vmem:[#allocation3 + $0x8] sm:$0xff] %vm1115_vm9, %v1070_v11 }
  0xc5   : > { %v1084_v14 = vpop.permute.xlu1 %1083  ;;  %945 = vrot.lane.b32.xlu0 %v2376_v47, %s2025_s23  ;;  %v1287_v47 = vld [vmem:[#allocation2 + $0x16a] sm:$0xff] }
  0xc6   : > { %1124 = vst.msk [vmem:[#allocation3 + $0x40] sm:$0xff] %vm1115_vm9, %v1084_v14  ;;  %v2504_v52 = vpack.c.bf16 %v1288_v48, %v1287_v47 }
  0xc7   : > { %834 = vrot.lane.b32.xlu1 %v2434_v13, %s2024_s22  ;;  %v1197_v62 = vpop.permute.xlu0 %1196 }
  0xc8   : > { %1245 = vst.msk [vmem:[#allocation3] sm:$0xff] %vm1244_vm10, %v1197_v62 }
  0xc9   : > { %v1086_v18 = vpop.permute.xlu1 %1085  ;;  %947 = vrot.lane.b32.xlu0 %v2439_v15, %s2025_s23 }
  0xca   : > { %1125 = vst.msk [vmem:[#allocation3 + $0x48] sm:$0xff] %vm1115_vm9, %v1086_v18 }
  0xcb   : > { %961 = vrot.lane.b32.xlu1 %v2388_v53, %s2025_s23  ;;  %v1199_v19 = vpop.permute.xlu0 %1198 }
  0xcc   : > { %1246 = vst.msk [vmem:[#allocation3 + $0x8] sm:$0xff] %vm1244_vm10, %v1199_v19  ;;  %v1017_v19 = vld [vmem:[#allocation2 + $0xd8] sm:$0xff] }
  0xcd   : > { %v1213_v21 = vpop.permute.xlu1 %1212  ;;  %1075 = vrot.lane.b32.xlu0 %v2249_v25, %s2026_s24 }
  0xce   : > { %1253 = vst.msk [vmem:[#allocation3 + $0x40] sm:$0xff] %vm1244_vm10, %v1213_v21 }
  0xcf   : > { %963 = vrot.lane.b32.xlu1 %v2450_v20, %s2025_s23  ;;  %v1326_v22 = vpop.permute.xlu0 %1325 }
  0xd0   : > { %1374 = vst.msk [vmem:[#allocation3] sm:$0xff] %vm1373_vm11, %v1326_v22  ;;  %v920_v22 = vpack.c.bf16 %v904_v17, %v903_v16 }
  0xd1   : > { %v1215_v23 = vpop.permute.xlu1 %1214  ;;  %1077 = vrot.lane.b32.xlu0 %v2281_v40, %s2026_s24 }
  0xd2   : > { %1254 = vst.msk [vmem:[#allocation3 + $0x48] sm:$0xff] %vm1244_vm10, %v1215_v23 }
  0xd3   : > { %1091 = vrot.lane.b32.xlu1 %v2253_v28, %s2026_s24  ;;  %v426_v25 = vpop.permute.xlu0 %425  ;;  %v1158_v28 = vld [vmem:[#allocation2 + $0x169] sm:$0xff] }
  0xd4   : > { %472 = vst.msk [vmem:[#allocation3 + $0x10] sm:$0xff] %vm469_vm4, %v426_v25  ;;  %v2479_v35 = vpack.c.bf16 %v1159_v32, %v1158_v28  ;;  %v1033_v25 = vld [vmem:[#allocation2 + $0x198] sm:$0xff] }
  0xd5   : > { %v1342_v27 = vpop.permute.xlu1 %1341  ;;  %1204 = vrot.lane.b32.xlu0 %v2423_v5, %s2027_s25 }
  0xd6   : > { %1382 = vst.msk [vmem:[#allocation3 + $0x40] sm:$0xff] %vm1373_vm11, %v1342_v27  ;;  %v1034_v27 = vld [vmem:[#allocation2 + $0x1a0] sm:$0xff] }
  0xd7   : > { %1093 = vrot.lane.b32.xlu1 %v2287_v44, %s2026_s24  ;;  %v1328_v30 = vpop.permute.xlu0 %1327  ;;  %v1390_v31 = vld [vmem:[#allocation3] sm:$0xff]  ;;  %v1050_v28 = vpack.c.bf16 %v1034_v27, %v1033_v25 }
  0xd8   : > { %1375 = vst.msk [vmem:[#allocation3 + $0x8] sm:$0xff] %vm1373_vm11, %v1328_v30  ;;  %1956 = vmatprep.mubr.msk.bf16.mxu0 %vm1428_vm12, %v1390_v31  ;;  %v1146_v30 = vld [vmem:[#allocation2 + $0xd9] sm:$0xff]  ;;  %v1147_v31 = vld [vmem:[#allocation2 + $0xe1] sm:$0xff] }
  0xd9   : > { %v442_v33 = vpop.permute.xlu1 %441  ;;  %1206 = vrot.lane.b32.xlu0 %v2467_v29, %s2027_s25 }
  0xda   : > { %480 = vst.msk [vmem:[#allocation3 + $0x50] sm:$0xff] %vm469_vm4, %v442_v33  ;;  %v1171_v33 = vpack.c.bf16 %v1147_v31, %v1146_v30 }
  0xdb   : > { %1220 = vrot.lane.b32.xlu1 %v2434_v13, %s2027_s25  ;;  %v428_v34 = vpop.permute.xlu0 %427 }
  0xdc   : > { %473 = vst.msk [vmem:[#allocation3 + $0x18] sm:$0xff] %vm469_vm4, %v428_v34 }
  0xdd   : > { %v1344_v36 = vpop.permute.xlu1 %1343  ;;  %v1398_v37 = vld [vmem:[#allocation3 + $0x40] sm:$0xff]  ;;  %1333 = vrot.lane.b32.xlu0 %v2439_v15, %s2029_s30 }
  0xde   : > { %1383 = vst.msk [vmem:[#allocation3 + $0x48] sm:$0xff] %vm1373_vm11, %v1344_v36  ;;  %1972 = vmatprep.mubr.msk.bf16.mxu1 %vm1428_vm12, %v1398_v37  ;;  %v1162_v36 = vld [vmem:[#allocation2 + $0x199] sm:$0xff]  ;;  %v1163_v37 = vld [vmem:[#allocation2 + $0x1a1] sm:$0xff] }
  0xdf   : > { %1222 = vrot.lane.b32.xlu1 %v2479_v35, %s2027_s25  ;;  %v555_v41 = vpop.permute.xlu0 %554  ;;  %v1391_v42 = vld [vmem:[#allocation3 + $0x8] sm:$0xff] }
  0xe0   : > { %601 = vst.msk [vmem:[#allocation3 + $0x10] sm:$0xff] %vm598_vm5, %v555_v41  ;;  %1957 = vmatmul.mubr.msk.bf16.vlgmr.msra.gmra.mrb[0].mxu0 %vm1428_vm12, %v1391_v42  ;;  %v1276_v41 = vld [vmem:[#allocation2 + $0xe2] sm:$0xff] }
  0xe1   : > { %v444_v43 = vpop.permute.xlu1 %443  ;;  %433 = vrot.lane.b32.xlu0 %v2423_v5, %s2021_s19  ;;  %v1300_v47 = vpack.c.bf16 %v1276_v41, %v1275_v39 }
  0xe2   : > { %481 = vst.msk [vmem:[#allocation3 + $0x58] sm:$0xff] %vm469_vm4, %v444_v43  ;;  %v1179_v43 = vpack.c.bf16 %v1163_v37, %v1162_v36 }
  0xe3   : > { %1349 = vrot.lane.b32.xlu1 %v2450_v20, %s2029_s30  ;;  %v557_v46 = vpop.permute.xlu0 %556 }
  0xe4   : > { %602 = vst.msk [vmem:[#allocation3 + $0x18] sm:$0xff] %vm598_vm5, %v557_v46 }
  0xe5   : > { %v571_v49 = vpop.permute.xlu1 %570  ;;  %v1399_v50 = vld [vmem:[#allocation3 + $0x48] sm:$0xff]  ;;  %1335 = vrot.lane.b32.xlu0 %v2492_v45, %s2029_s30 }
  0xe6   : > { %609 = vst.msk [vmem:[#allocation3 + $0x50] sm:$0xff] %vm598_vm5, %v571_v49  ;;  %1973 = vmatmul.mubr.msk.bf16.vlgmr.msra.gmra.mrb[0].mxu1 %vm1428_vm12, %v1399_v50  ;;  %v1291_v50 = vld [vmem:[#allocation2 + $0x19a] sm:$0xff] }
  0xe7   : > { %449 = vrot.lane.b32.xlu1 %v2434_v13, %s2021_s19  ;;  %v684_v51 = vpop.permute.xlu0 %683  ;;  %v791_v13 = vpack.c.bf16 %v775_v58, %v774_v8 }
  0xe8   : > { %730 = vst.msk [vmem:[#allocation3 + $0x10] sm:$0xff] %vm727_vm6, %v684_v51  ;;  %v1292_v51 = vld [vmem:[#allocation2 + $0x1a2] sm:$0xff] }
  0xe9   : > { %v573_v53 = vpop.permute.xlu1 %572  ;;  %435 = vrot.lane.b32.xlu0 %v2467_v29, %s2021_s19 }
  0xea   : > { %610 = vst.msk [vmem:[#allocation3 + $0x58] sm:$0xff] %vm598_vm5, %v573_v53 }
  0xeb   : > { %1351 = vrot.lane.b32.xlu1 %v2504_v52, %s2029_s30  ;;  %v686_v54 = vpop.permute.xlu0 %685 }
  0xec   : > { %731 = vst.msk [vmem:[#allocation3 + $0x18] sm:$0xff] %vm727_vm6, %v686_v54  ;;  %v1308_v54 = vpack.c.bf16 %v1292_v51, %v1291_v50 }
  0xed   : > { %v700_v55 = vpop.permute.xlu1 %699  ;;  %562 = vrot.lane.b32.xlu0 %v2439_v15, %s2022_s20 }
  0xee   : > { %738 = vst.msk [vmem:[#allocation3 + $0x50] sm:$0xff] %vm727_vm6, %v700_v55 }
  0xef   : > { %451 = vrot.lane.b32.xlu1 %v2479_v35, %s2021_s19  ;;  %v813_v56 = vpop.permute.xlu0 %812 }
  0xf0   : > { %859 = vst.msk [vmem:[#allocation3 + $0x10] sm:$0xff] %vm856_vm7, %v813_v56 }
  0xf1   : > { %v702_v57 = vpop.permute.xlu1 %701  ;;  %564 = vrot.lane.b32.xlu0 %v2492_v45, %s2022_s20 }
  0xf2   : > { %739 = vst.msk [vmem:[#allocation3 + $0x58] sm:$0xff] %vm727_vm6, %v702_v57 }
  0xf3   : > { %578 = vrot.lane.b32.xlu1 %v2450_v20, %s2022_s20  ;;  %v815_v59 = vpop.permute.xlu0 %814  ;;  %v1018_v20 = vld [vmem:[#allocation2 + $0xe0] sm:$0xff] }
  0xf4   : > { %860 = vst.msk [vmem:[#allocation3 + $0x18] sm:$0xff] %vm856_vm7, %v815_v59  ;;  %v1042_v24 = vpack.c.bf16 %v1018_v20, %v1017_v19 }
  0xf5   : > { %v829_v60 = vpop.permute.xlu1 %828  ;;  %691 = vrot.lane.b32.xlu0 %v2281_v40, %s2023_s21 }
  0xf6   : > { %867 = vst.msk [vmem:[#allocation3 + $0x50] sm:$0xff] %vm856_vm7, %v829_v60 }
  0xf7   : > { %580 = vrot.lane.b32.xlu1 %v2504_v52, %s2022_s20  ;;  %v942_v61 = vpop.permute.xlu0 %941 }
  0xf8   : > { %988 = vst.msk [vmem:[#allocation3 + $0x10] sm:$0xff] %vm985_vm8, %v942_v61 }
  0xf9   : > { %v831_v1 = vpop.permute.xlu1 %830  ;;  %693 = vrot.lane.b32.xlu0 %v2224_v12, %s2023_s21 }
  0xfa   : > { %868 = vst.msk [vmem:[#allocation3 + $0x58] sm:$0xff] %vm856_vm7, %v831_v1 }
  0xfb   : > { %707 = vrot.lane.b32.xlu1 %v2287_v44, %s2023_s21  ;;  %v944_v40 = vpop.permute.xlu0 %943  ;;  %v887_v44 = vld [vmem:[#allocation2 + $0xc2] sm:$0xff] }
  0xfc   : > { %989 = vst.msk [vmem:[#allocation3 + $0x18] sm:$0xff] %vm985_vm8, %v944_v40  ;;  %v912_v15 = vpack.c.bf16 %v888_v10, %v887_v44 }
  0xfd   : > { %v958_v5 = vpop.permute.xlu1 %957  ;;  %820 = vrot.lane.b32.xlu0 %v2467_v29, %s2024_s22 }
  0xfe   : > { %996 = vst.msk [vmem:[#allocation3 + $0x50] sm:$0xff] %vm985_vm8, %v958_v5 }
  0xff   : > { %709 = vrot.lane.b32.xlu1 %v662_v4, %s2023_s21  ;;  %v1072_v7 = vpop.permute.xlu0 %1071 }
 0x100   : > { %1118 = vst.msk [vmem:[#allocation3 + $0x10] sm:$0xff] %vm1115_vm9, %v1072_v7 }
 0x101   : > { %v960_v9 = vpop.permute.xlu1 %959  ;;  %822 = vrot.lane.b32.xlu0 %v783_v6, %s2024_s22 }
 0x102   : > { %997 = vst.msk [vmem:[#allocation3 + $0x58] sm:$0xff] %vm985_vm8, %v960_v9 }
 0x103   : > { %836 = vrot.lane.b32.xlu1 %v2479_v35, %s2024_s22  ;;  %v1074_v11 = vpop.permute.xlu0 %1073 }
 0x104   : > { %1119 = vst.msk [vmem:[#allocation3 + $0x18] sm:$0xff] %vm1115_vm9, %v1074_v11 }
 0x105   : > { %v1088_v14 = vpop.permute.xlu1 %1087  ;;  %949 = vrot.lane.b32.xlu0 %v2492_v45, %s2025_s23 }
 0x106   : > { %1126 = vst.msk [vmem:[#allocation3 + $0x50] sm:$0xff] %vm1115_vm9, %v1088_v14 }
 0x107   : > { %838 = vrot.lane.b32.xlu1 %v791_v13, %s2024_s22  ;;  %v1201_v62 = vpop.permute.xlu0 %1200 }
 0x108   : > { %1247 = vst.msk [vmem:[#allocation3 + $0x10] sm:$0xff] %vm1244_vm10, %v1201_v62 }
 0x109   : > { %v1090_v18 = vpop.permute.xlu1 %1089  ;;  %951 = vrot.lane.b32.xlu0 %v912_v15, %s2025_s23 }
 0x10a   : > { %1127 = vst.msk [vmem:[#allocation3 + $0x58] sm:$0xff] %vm1115_vm9, %v1090_v18 }
 0x10b   : > { %965 = vrot.lane.b32.xlu1 %v2504_v52, %s2025_s23  ;;  %v1203_v21 = vpop.permute.xlu0 %1202 }
 0x10c   : > { %1248 = vst.msk [vmem:[#allocation3 + $0x18] sm:$0xff] %vm1244_vm10, %v1203_v21 }
 0x10d   : > { %v1217_v23 = vpop.permute.xlu1 %1216  ;;  %1079 = vrot.lane.b32.xlu0 %v2224_v12, %s2026_s24 }
 0x10e   : > { %1255 = vst.msk [vmem:[#allocation3 + $0x50] sm:$0xff] %vm1244_vm10, %v1217_v23 }
 0x10f   : > { %967 = vrot.lane.b32.xlu1 %v920_v22, %s2025_s23  ;;  %v1330_v26 = vpop.permute.xlu0 %1329 }
 0x110   : > { %1376 = vst.msk [vmem:[#allocation3 + $0x10] sm:$0xff] %vm1373_vm11, %v1330_v26 }
 0x111   : > { %v1219_v29 = vpop.permute.xlu1 %1218  ;;  %1081 = vrot.lane.b32.xlu0 %v1042_v24, %s2026_s24 }
 0x112   : > { %1256 = vst.msk [vmem:[#allocation3 + $0x58] sm:$0xff] %vm1244_vm10, %v1219_v29 }
 0x113   : > { %1095 = vrot.lane.b32.xlu1 %v662_v4, %s2026_s24  ;;  %v430_v12 = vpop.permute.xlu0 %429 }
 0x114   : > { %474 = vst.msk [vmem:[#allocation3 + $0x20] sm:$0xff] %vm469_vm4, %v430_v12 }
 0x115   : > { %v1346_v32 = vpop.permute.xlu1 %1345  ;;  %1208 = vrot.lane.b32.xlu0 %v783_v6, %s2027_s25 }
 0x116   : > { %1384 = vst.msk [vmem:[#allocation3 + $0x50] sm:$0xff] %vm1373_vm11, %v1346_v32 }
 0x117   : > { %1097 = vrot.lane.b32.xlu1 %v1050_v28, %s2026_s24  ;;  %v1332_v34 = vpop.permute.xlu0 %1331  ;;  %v1392_v35 = vld [vmem:[#allocation3 + $0x10] sm:$0xff] }
 0x118   : > { %1377 = vst.msk [vmem:[#allocation3 + $0x18] sm:$0xff] %vm1373_vm11, %v1332_v34  ;;  %1960 = vmatprep.mubr.msk.bf16.mxu0 %vm1428_vm12, %v1392_v35 }
 0x119   : > { %v446_v38 = vpop.permute.xlu1 %445  ;;  %1210 = vrot.lane.b32.xlu0 %v1171_v33, %s2027_s25 }
 0x11a   : > { %482 = vst.msk [vmem:[#allocation3 + $0x60] sm:$0xff] %vm469_vm4, %v446_v38 }
 0x11b   : > { %1224 = vrot.lane.b32.xlu1 %v791_v13, %s2027_s25  ;;  %v432_v42 = vpop.permute.xlu0 %431 }
 0x11c   : > { %475 = vst.msk [vmem:[#allocation3 + $0x28] sm:$0xff] %vm469_vm4, %v432_v42 }
 0x11d   : > { %v1348_v45 = vpop.permute.xlu1 %1347  ;;  %v1400_v46 = vld [vmem:[#allocation3 + $0x50] sm:$0xff]  ;;  %1337 = vrot.lane.b32.xlu0 %v912_v15, %s2029_s30 }
 0x11e   : > { %1385 = vst.msk [vmem:[#allocation3 + $0x58] sm:$0xff] %vm1373_vm11, %v1348_v45  ;;  %1976 = vmatprep.mubr.msk.bf16.mxu1 %vm1428_vm12, %v1400_v46 }
 0x11f   : > { %1226 = vrot.lane.b32.xlu1 %v1179_v43, %s2027_s25  ;;  %v559_v48 = vpop.permute.xlu0 %558  ;;  %v1393_v49 = vld [vmem:[#allocation3 + $0x18] sm:$0xff] }
 0x120   : > { %603 = vst.msk [vmem:[#allocation3 + $0x20] sm:$0xff] %vm598_vm5, %v559_v48  ;;  %1961 = vmatmul.mubr.msk.bf16.gmra.mrb[4].mxu0 %vm1428_vm12, %v1393_v49 }
 0x121   : > { %v448_v52 = vpop.permute.xlu1 %447  ;;  %1339 = vrot.lane.b32.xlu0 %v1300_v47, %s2029_s30 }
 0x122   : > { %483 = vst.msk [vmem:[#allocation3 + $0x68] sm:$0xff] %vm469_vm4, %v448_v52 }
 0x123   : > { %1353 = vrot.lane.b32.xlu1 %v920_v22, %s2029_s30  ;;  %v561_v53 = vpop.permute.xlu0 %560 }
 0x124   : > { %604 = vst.msk [vmem:[#allocation3 + $0x28] sm:$0xff] %vm598_vm5, %v561_v53 }
 0x125   : > { %v575_v55 = vpop.permute.xlu1 %574  ;;  %v1401_v56 = vld [vmem:[#allocation3 + $0x58] sm:$0xff] }
 0x126   : > { %611 = vst.msk [vmem:[#allocation3 + $0x60] sm:$0xff] %vm598_vm5, %v575_v55  ;;  %1977 = vmatmul.mubr.msk.bf16.gmra.mrb[4].mxu1 %vm1428_vm12, %v1401_v56 }
 0x127   : > { %1355 = vrot.lane.b32.xlu1 %v1308_v54, %s2029_s30  ;;  %v688_v57 = vpop.permute.xlu0 %687 }
 0x128   : > { %732 = vst.msk [vmem:[#allocation3 + $0x20] sm:$0xff] %vm727_vm6, %v688_v57 }
 0x129   : > { %v577_v59 = vpop.permute.xlu1 %576 }
 0x12a   : > { %612 = vst.msk [vmem:[#allocation3 + $0x68] sm:$0xff] %vm598_vm5, %v577_v59  ;;  %v2656_v59 = vld [vmem:[%s2765_s2] ss:$0 sm:$0xff] }
 0x12b   : > { %v690_v60 = vpop.permute.xlu0 %689 }
 0x12c   : > { %733 = vst.msk [vmem:[#allocation3 + $0x28] sm:$0xff] %vm727_vm6, %v690_v60 }
 0x12d   : > { %v704_v61 = vpop.permute.xlu1 %703 }
 0x12e   : > { %740 = vst.msk [vmem:[#allocation3 + $0x60] sm:$0xff] %vm727_vm6, %v704_v61 }
 0x12f   : > { %v817_v63 = vpop.permute.xlu0 %816 }
 0x130   : > { %861 = vst.msk [vmem:[#allocation3 + $0x20] sm:$0xff] %vm856_vm7, %v817_v63 }
 0x131   : > { %v706_v0 = vpop.permute.xlu1 %705 }
 0x132   : > { %741 = vst.msk [vmem:[#allocation3 + $0x68] sm:$0xff] %vm727_vm6, %v706_v0 }
 0x133   : > { %v819_v1 = vpop.permute.xlu0 %818 }
 0x134   : > { %862 = vst.msk [vmem:[#allocation3 + $0x28] sm:$0xff] %vm856_vm7, %v819_v1 }
 0x135   : > { %v833_v2 = vpop.permute.xlu1 %832 }
 0x136   : > { %869 = vst.msk [vmem:[#allocation3 + $0x60] sm:$0xff] %vm856_vm7, %v833_v2 }
 0x137   : > { %v946_v3 = vpop.permute.xlu0 %945 }
 0x138   : > { %990 = vst.msk [vmem:[#allocation3 + $0x20] sm:$0xff] %vm985_vm8, %v946_v3 }
 0x139   : > { %v835_v40 = vpop.permute.xlu1 %834 }
 0x13a   : > { %870 = vst.msk [vmem:[#allocation3 + $0x68] sm:$0xff] %vm856_vm7, %v835_v40 }
 0x13b   : > { %v948_v4 = vpop.permute.xlu0 %947 }
 0x13c   : > { %991 = vst.msk [vmem:[#allocation3 + $0x28] sm:$0xff] %vm985_vm8, %v948_v4 }
 0x13d   : > { %v962_v5 = vpop.permute.xlu1 %961 }
 0x13e   : > { %998 = vst.msk [vmem:[#allocation3 + $0x60] sm:$0xff] %vm985_vm8, %v962_v5 }
 0x13f   : > { %v1076_v6 = vpop.permute.xlu0 %1075 }
 0x140   : > { %1120 = vst.msk [vmem:[#allocation3 + $0x20] sm:$0xff] %vm1115_vm9, %v1076_v6 }
 0x141   : > { %v964_v7 = vpop.permute.xlu1 %963 }
 0x142   : > { %999 = vst.msk [vmem:[#allocation3 + $0x68] sm:$0xff] %vm985_vm8, %v964_v7 }
 0x143   : > { %v1078_v8 = vpop.permute.xlu0 %1077 }
 0x144   : > { %1121 = vst.msk [vmem:[#allocation3 + $0x28] sm:$0xff] %vm1115_vm9, %v1078_v8 }
 0x145   : > { %v1092_v58 = vpop.permute.xlu1 %1091 }
 0x146   : > { %1128 = vst.msk [vmem:[#allocation3 + $0x60] sm:$0xff] %vm1115_vm9, %v1092_v58 }
 0x147   : > { %v1205_v9 = vpop.permute.xlu0 %1204 }
 0x148   : > { %1249 = vst.msk [vmem:[#allocation3 + $0x20] sm:$0xff] %vm1244_vm10, %v1205_v9 }
 0x149   : > { %v1094_v44 = vpop.permute.xlu1 %1093 }
 0x14a   : > { %1129 = vst.msk [vmem:[#allocation3 + $0x68] sm:$0xff] %vm1115_vm9, %v1094_v44 }
 0x14b   : > { %v1207_v10 = vpop.permute.xlu0 %1206 }
 0x14c   : > { %1250 = vst.msk [vmem:[#allocation3 + $0x28] sm:$0xff] %vm1244_vm10, %v1207_v10 }
 0x14d   : > { %v1221_v11 = vpop.permute.xlu1 %1220 }
 0x14e   : > { %1257 = vst.msk [vmem:[#allocation3 + $0x60] sm:$0xff] %vm1244_vm10, %v1221_v11 }
 0x14f   : > { %v1334_v13 = vpop.permute.xlu0 %1333 }
 0x150   : > { %1378 = vst.msk [vmem:[#allocation3 + $0x20] sm:$0xff] %vm1373_vm11, %v1334_v13 }
 0x151   : > { %v1223_v14 = vpop.permute.xlu1 %1222 }
 0x152   : > { %1258 = vst.msk [vmem:[#allocation3 + $0x68] sm:$0xff] %vm1244_vm10, %v1223_v14 }
 0x153   : > { %v434_v15 = vpop.permute.xlu0 %433 }
 0x154   : > { %476 = vst.msk [vmem:[#allocation3 + $0x30] sm:$0xff] %vm469_vm4, %v434_v15 }
 0x155   : > { %v1350_v62 = vpop.permute.xlu1 %1349 }
 0x156   : > { %1386 = vst.msk [vmem:[#allocation3 + $0x60] sm:$0xff] %vm1373_vm11, %v1350_v62 }
 0x157   : > { %v1336_v16 = vpop.permute.xlu0 %1335  ;;  %v1394_v17 = vld [vmem:[#allocation3 + $0x20] sm:$0xff] }
 0x158   : > { %1379 = vst.msk [vmem:[#allocation3 + $0x28] sm:$0xff] %vm1373_vm11, %v1336_v16  ;;  %1964 = vmatprep.mubr.msk.bf16.mxu0 %vm1428_vm12, %v1394_v17 }
 0x159   : > { %v450_v18 = vpop.permute.xlu1 %449 }
 0x15a   : > { %484 = vst.msk [vmem:[#allocation3 + $0x70] sm:$0xff] %vm469_vm4, %v450_v18 }
 0x15b   : > { %v436_v19 = vpop.permute.xlu0 %435 }
 0x15c   : > { %477 = vst.msk [vmem:[#allocation3 + $0x38] sm:$0xff] %vm469_vm4, %v436_v19 }
 0x15d   : > { %v1352_v20 = vpop.permute.xlu1 %1351  ;;  %v1402_v21 = vld [vmem:[#allocation3 + $0x60] sm:$0xff] }
 0x15e   : > { %1387 = vst.msk [vmem:[#allocation3 + $0x68] sm:$0xff] %vm1373_vm11, %v1352_v20  ;;  %1980 = vmatprep.mubr.msk.bf16.mxu1 %vm1428_vm12, %v1402_v21 }
 0x15f   : > { %v563_v22 = vpop.permute.xlu0 %562  ;;  %v1395_v23 = vld [vmem:[#allocation3 + $0x28] sm:$0xff] }
 0x160   : > { %605 = vst.msk [vmem:[#allocation3 + $0x30] sm:$0xff] %vm598_vm5, %v563_v22  ;;  %1965 = vmatmul.mubr.msk.bf16.gmra.mrb[8].mxu0 %vm1428_vm12, %v1395_v23 }
 0x161   : > { %v452_v24 = vpop.permute.xlu1 %451 }
 0x162   : > { %485 = vst.msk [vmem:[#allocation3 + $0x78] sm:$0xff] %vm469_vm4, %v452_v24 }
 0x163   : > { %v565_v26 = vpop.permute.xlu0 %564 }
 0x164   : > { %606 = vst.msk [vmem:[#allocation3 + $0x38] sm:$0xff] %vm598_vm5, %v565_v26 }
 0x165   : > { %v579_v25 = vpop.permute.xlu1 %578  ;;  %v1403_v27 = vld [vmem:[#allocation3 + $0x68] sm:$0xff] }
 0x166   : > { %613 = vst.msk [vmem:[#allocation3 + $0x70] sm:$0xff] %vm598_vm5, %v579_v25  ;;  %1981 = vmatmul.mubr.msk.bf16.gmra.mrb[8].mxu1 %vm1428_vm12, %v1403_v27 }
 0x167   : > { %v692_v29 = vpop.permute.xlu0 %691 }
 0x168   : > { %734 = vst.msk [vmem:[#allocation3 + $0x30] sm:$0xff] %vm727_vm6, %v692_v29 }
 0x169   : > { %v581_v30 = vpop.permute.xlu1 %580 }
 0x16a   : > { %614 = vst.msk [vmem:[#allocation3 + $0x78] sm:$0xff] %vm598_vm5, %v581_v30 }
 0x16b   : > { %v694_v31 = vpop.permute.xlu0 %693 }
 0x16c   : > { %735 = vst.msk [vmem:[#allocation3 + $0x38] sm:$0xff] %vm727_vm6, %v694_v31 }
 0x16d   : > { %v708_v12 = vpop.permute.xlu1 %707 }
 0x16e   : > { %742 = vst.msk [vmem:[#allocation3 + $0x70] sm:$0xff] %vm727_vm6, %v708_v12 }
 0x16f   : > { %v821_v28 = vpop.permute.xlu0 %820 }
 0x170   : > { %863 = vst.msk [vmem:[#allocation3 + $0x30] sm:$0xff] %vm856_vm7, %v821_v28 }
 0x171   : > { %v710_v32 = vpop.permute.xlu1 %709 }
 0x172   : > { %743 = vst.msk [vmem:[#allocation3 + $0x78] sm:$0xff] %vm727_vm6, %v710_v32 }
 0x173   : > { %v823_v33 = vpop.permute.xlu0 %822 }
 0x174   : > { %864 = vst.msk [vmem:[#allocation3 + $0x38] sm:$0xff] %vm856_vm7, %v823_v33 }
 0x175   : > { %v837_v34 = vpop.permute.xlu1 %836 }
 0x176   : > { %871 = vst.msk [vmem:[#allocation3 + $0x70] sm:$0xff] %vm856_vm7, %v837_v34 }
 0x177   : > { %v950_v35 = vpop.permute.xlu0 %949 }
 0x178   : > { %992 = vst.msk [vmem:[#allocation3 + $0x30] sm:$0xff] %vm985_vm8, %v950_v35 }
 0x179   : > { %v839_v36 = vpop.permute.xlu1 %838 }
 0x17a   : > { %872 = vst.msk [vmem:[#allocation3 + $0x78] sm:$0xff] %vm856_vm7, %v839_v36 }
 0x17b   : > { %v952_v37 = vpop.permute.xlu0 %951 }
 0x17c   : > { %993 = vst.msk [vmem:[#allocation3 + $0x38] sm:$0xff] %vm985_vm8, %v952_v37 }
 0x17d   : > { %v966_v38 = vpop.permute.xlu1 %965 }
 0x17e   : > { %1000 = vst.msk [vmem:[#allocation3 + $0x70] sm:$0xff] %vm985_vm8, %v966_v38 }
 0x17f   : > { %v1080_v39 = vpop.permute.xlu0 %1079 }
 0x180   : > { %1122 = vst.msk [vmem:[#allocation3 + $0x30] sm:$0xff] %vm1115_vm9, %v1080_v39 }
 0x181   : > { %v968_v41 = vpop.permute.xlu1 %967 }
 0x182   : > { %1001 = vst.msk [vmem:[#allocation3 + $0x78] sm:$0xff] %vm985_vm8, %v968_v41 }
 0x183   : > { %v1082_v42 = vpop.permute.xlu0 %1081 }
 0x184   : > { %1123 = vst.msk [vmem:[#allocation3 + $0x38] sm:$0xff] %vm1115_vm9, %v1082_v42 }
 0x185   : > { %v1096_v43 = vpop.permute.xlu1 %1095 }
 0x186   : > { %1130 = vst.msk [vmem:[#allocation3 + $0x70] sm:$0xff] %vm1115_vm9, %v1096_v43 }
 0x187   : > { %v1209_v45 = vpop.permute.xlu0 %1208 }
 0x188   : > { %1251 = vst.msk [vmem:[#allocation3 + $0x30] sm:$0xff] %vm1244_vm10, %v1209_v45 }
 0x189   : > { %v1098_v46 = vpop.permute.xlu1 %1097 }
 0x18a   : > { %1131 = vst.msk [vmem:[#allocation3 + $0x78] sm:$0xff] %vm1115_vm9, %v1098_v46 }
 0x18b   : > { %v1211_v47 = vpop.permute.xlu0 %1210 }
 0x18c   : > { %1252 = vst.msk [vmem:[#allocation3 + $0x38] sm:$0xff] %vm1244_vm10, %v1211_v47 }
 0x18d   : > { %v1225_v48 = vpop.permute.xlu1 %1224 }
 0x18e   : > { %1259 = vst.msk [vmem:[#allocation3 + $0x70] sm:$0xff] %vm1244_vm10, %v1225_v48 }
 0x18f   : > { %v1338_v49 = vpop.permute.xlu0 %1337 }
 0x190   : > { %1380 = vst.msk [vmem:[#allocation3 + $0x30] sm:$0xff] %vm1373_vm11, %v1338_v49 }
 0x191   : > { %v1227_v50 = vpop.permute.xlu1 %1226 }
 0x192   : > { %1260 = vst.msk [vmem:[#allocation3 + $0x78] sm:$0xff] %vm1244_vm10, %v1227_v50 }
 0x193   : > { %v1340_v51 = vpop.permute.xlu0 %1339 }
 0x194   : > { %1381 = vst.msk [vmem:[#allocation3 + $0x38] sm:$0xff] %vm1373_vm11, %v1340_v51 }
 0x195   : > { %v1354_v52 = vpop.permute.xlu1 %1353 }
 0x196   : > { %1388 = vst.msk [vmem:[#allocation3 + $0x70] sm:$0xff] %vm1373_vm11, %v1354_v52 }
 0x197   : > { %v1396_v53 = vld [vmem:[#allocation3 + $0x30] sm:$0xff] }
 0x198   : > { %1968 = vmatprep.mubr.msk.bf16.mxu0 %vm1428_vm12, %v1396_v53 }
 0x199   : > { %v1356_v54 = vpop.permute.xlu1 %1355 }
 0x19a   : > { %1389 = vst.msk [vmem:[#allocation3 + $0x78] sm:$0xff] %vm1373_vm11, %v1356_v54 }
 0x19b   : > { %v1397_v55 = vld [vmem:[#allocation3 + $0x38] sm:$0xff] }
 0x19c   : > { %1969 = vmatmul.mubr.msk.bf16.gmra.mrb[12].mxu0 %vm1428_vm12, %v1397_v55 }
 0x19d   : > { %v1404_v56 = vld [vmem:[#allocation3 + $0x70] sm:$0xff] }
 0x19e   : > { %1984 = vmatprep.mubr.msk.bf16.mxu1 %vm1428_vm12, %v1404_v56 }
 0x1a1   : > { %v1405_v57 = vld [vmem:[#allocation3 + $0x78] sm:$0xff] }
 0x1a2   : > { %1985 = vmatmul.mubr.msk.bf16.gmra.mrb[12].mxu1 %vm1428_vm12, %v1405_v57 }
 0x1b3   : > { %v1958_v60 = vpop.f32.mrb[0].mxu0 }
 0x1b4   : > { %v1527_v61 = vadd.f32 %v1958_v60, %v2656_v59  ;;  %v1518_v63 = vpop.f32.mrb[1].mxu0 }
 0x1b5   : > { %v1519_v0 = vadd.f32 %v2656_v59, %v1518_v63  ;;  %v1959_v1 = vpop.f32.mrb[2].mxu0 }
 0x1b6   : > { %v1647_v2 = vmax.f32 %v1527_v61, 0.0  ;;  %v1530_v3 = vadd.f32 %v1959_v1, %v2656_v59  ;;  %v1521_v40 = vpop.f32.mrb[3].mxu0 }
 0x1b7   : > { %v1645_v4 = vmax.f32 %v1519_v0, 0.0  ;;  %v1522_v5 = vadd.f32 %v2656_v59, %v1521_v40 }
 0x1b8   : > { %1680 = vst.msk [vmem:[#allocation4 + $0x10] sm:$0xff] %vm1677_vm13, %v1647_v2  ;;  %v1648_v6 = vmax.f32 %v1530_v3, 0.0 }
 0x1b9   : > { %1678 = vst.msk [vmem:[#allocation4] sm:$0xff] %vm1677_vm13, %v1645_v4  ;;  %v1646_v7 = vmax.f32 %v1522_v5, 0.0  ;;  %v1974_v8 = vpop.f32.mrb[0].mxu1 }
 0x1ba   : > { %1681 = vst.msk [vmem:[#allocation4 + $0x18] sm:$0xff] %vm1677_vm13, %v1648_v6  ;;  %v1591_v58 = vadd.f32 %v1974_v8, %v2656_v59  ;;  %v1582_v9 = vpop.f32.mrb[1].mxu1 }
 0x1bb   : > { %1679 = vst.msk [vmem:[#allocation4 + $0x8] sm:$0xff] %vm1677_vm13, %v1646_v7  ;;  %v1583_v44 = vadd.f32 %v2656_v59, %v1582_v9  ;;  %v1975_v10 = vpop.f32.mrb[2].mxu1 }
 0x1bc   : > { %v1663_v11 = vmax.f32 %v1591_v58, 0.0  ;;  %v1594_v13 = vadd.f32 %v1975_v10, %v2656_v59  ;;  %v1585_v14 = vpop.f32.mrb[3].mxu1 }
 0x1bd   : > { %v1661_v15 = vmax.f32 %v1583_v44, 0.0  ;;  %v1586_v62 = vadd.f32 %v2656_v59, %v1585_v14 }
 0x1be   : > { %1696 = vst.msk [vmem:[#allocation4 + $0x90] sm:$0xff] %vm1677_vm13, %v1663_v11  ;;  %v1664_v16 = vmax.f32 %v1594_v13, 0.0 }
 0x1bf   : > { %1694 = vst.msk [vmem:[#allocation4 + $0x80] sm:$0xff] %vm1677_vm13, %v1661_v15  ;;  %v1662_v17 = vmax.f32 %v1586_v62, 0.0 }
 0x1c0   : > { %1697 = vst.msk [vmem:[#allocation4 + $0x98] sm:$0xff] %vm1677_vm13, %v1664_v16 }
 0x1c1   : > { %v1712_v18 = vld [vmem:[#allocation4 + $0x10] ss:$2 sm:$0xff]  ;;  %v1744_v19 = vld [vmem:[#allocation4 + $0x11] ss:$2 sm:$0xff]  ;;  %1695 = vst.msk [vmem:[#allocation4 + $0x88] sm:$0xff] %vm1677_vm13, %v1662_v17 }
 0x1c2   : > { %v1774_v20 = vmax.f32 %v1712_v18, %v1744_v19  ;;  %v1710_v21 = vld [vmem:[#allocation4] ss:$2 sm:$0xff]  ;;  %v1742_v22 = vld [vmem:[#allocation4 + $0x1] ss:$2 sm:$0xff] }
 0x1c3   : > { %v1773_v23 = vmax.f32 %v1710_v21, %v1742_v22 }
 0x1c4   : > { %1790 = vst.msk [vmem:[#allocation5 + $0x8] sm:$0xff] %vm1677_vm13, %v1774_v20 }
 0x1c5   : > { %1789 = vst.msk [vmem:[#allocation5] sm:$0xff] %vm1677_vm13, %v1773_v23 }
 0x1c7   : > { %v1728_v24 = vld [vmem:[#allocation4 + $0x90] ss:$2 sm:$0xff]  ;;  %v1760_v26 = vld [vmem:[#allocation4 + $0x91] ss:$2 sm:$0xff] }
 0x1c8   : > { %v1782_v25 = vmax.f32 %v1728_v24, %v1760_v26  ;;  %v1726_v27 = vld [vmem:[#allocation4 + $0x80] ss:$2 sm:$0xff]  ;;  %v1758_v29 = vld [vmem:[#allocation4 + $0x81] ss:$2 sm:$0xff] }
 0x1c9   : > { %v1781_v30 = vmax.f32 %v1726_v27, %v1758_v29 }
 0x1ca   : > { %1798 = vst.msk [vmem:[#allocation5 + $0x48] sm:$0xff] %vm1677_vm13, %v1782_v25 }
 0x1cb   : > { %v1814_v31 = vld [vmem:[#allocation5 + $0x8] sm:$0xff]  ;;  %1797 = vst.msk [vmem:[#allocation5 + $0x40] sm:$0xff] %vm1677_vm13, %v1781_v30 }
 0x1cc   : > { %v1805_v12 = vld [vmem:[#allocation5] sm:$0xff] }
 0x1cd   : > { %v1822_v28 = vmax.f32 %v1805_v12, %v1814_v31 }
 0x1cf   : > { %v1830_v32 = vpack.c.bf16 %v1822_v28, %v1822_v28 }
 0x1d1   : > { %1839 = vst.msk [vmem:[%s2682_s9] sm:$0xf] %vm1838_vm14, %v1830_v32  ;;  %v1818_v33 = vld [vmem:[#allocation5 + $0x48] sm:$0xff] }
 0x1d2   : > { %v1809_v34 = vld [vmem:[#allocation5 + $0x40] sm:$0xff] }
 0x1d3   : > { %v1826_v35 = vmax.f32 %v1809_v34, %v1818_v33 }
 0x1d5   : > { %v1834_v36 = vpack.c.bf16 %v1826_v35, %v1826_v35 }
 0x1d7   : > { %1843 = vst.msk [vmem:[%s2682_s9 + $0x10] sm:$0xf] %vm1838_vm14, %v1834_v36 }
 0x1f3   : > { %v1962_v37 = vpop.f32.mrb[4].mxu0 }
 0x1f4   : > { %v1543_v38 = vadd.f32 %v1962_v37, %v2656_v59  ;;  %v1534_v39 = vpop.f32.mrb[5].mxu0 }
 0x1f5   : > { %v1535_v41 = vadd.f32 %v2656_v59, %v1534_v39  ;;  %v1963_v42 = vpop.f32.mrb[6].mxu0 }
 0x1f6   : > { %v1651_v43 = vmax.f32 %v1543_v38, 0.0  ;;  %v1546_v45 = vadd.f32 %v1963_v42, %v2656_v59  ;;  %v1537_v46 = vpop.f32.mrb[7].mxu0 }
 0x1f7   : > { %v1649_v47 = vmax.f32 %v1535_v41, 0.0  ;;  %v1538_v48 = vadd.f32 %v2656_v59, %v1537_v46 }
 0x1f8   : > { %1684 = vst.msk [vmem:[#allocation4 + $0x30] sm:$0xff] %vm1677_vm13, %v1651_v43  ;;  %v1652_v49 = vmax.f32 %v1546_v45, 0.0 }
 0x1f9   : > { %1682 = vst.msk [vmem:[#allocation4 + $0x20] sm:$0xff] %vm1677_vm13, %v1649_v47  ;;  %v1650_v50 = vmax.f32 %v1538_v48, 0.0  ;;  %v1978_v51 = vpop.f32.mrb[4].mxu1 }
 0x1fa   : > { %1685 = vst.msk [vmem:[#allocation4 + $0x38] sm:$0xff] %vm1677_vm13, %v1652_v49  ;;  %v1607_v52 = vadd.f32 %v1978_v51, %v2656_v59  ;;  %v1598_v53 = vpop.f32.mrb[5].mxu1 }
 0x1fb   : > { %1683 = vst.msk [vmem:[#allocation4 + $0x28] sm:$0xff] %vm1677_vm13, %v1650_v50  ;;  %v1599_v54 = vadd.f32 %v2656_v59, %v1598_v53  ;;  %v1979_v55 = vpop.f32.mrb[6].mxu1 }
 0x1fc   : > { %v1667_v56 = vmax.f32 %v1607_v52, 0.0  ;;  %v1610_v57 = vadd.f32 %v1979_v55, %v2656_v59  ;;  %v1601_v60 = vpop.f32.mrb[7].mxu1 }
 0x1fd   : > { %v1665_v61 = vmax.f32 %v1599_v54, 0.0  ;;  %v1602_v63 = vadd.f32 %v2656_v59, %v1601_v60 }
 0x1fe   : > { %1700 = vst.msk [vmem:[#allocation4 + $0xb0] sm:$0xff] %vm1677_vm13, %v1667_v56  ;;  %v1668_v0 = vmax.f32 %v1610_v57, 0.0 }
 0x1ff   : > { %1698 = vst.msk [vmem:[#allocation4 + $0xa0] sm:$0xff] %vm1677_vm13, %v1665_v61  ;;  %v1666_v1 = vmax.f32 %v1602_v63, 0.0 }
 0x200   : > { %1701 = vst.msk [vmem:[#allocation4 + $0xb8] sm:$0xff] %vm1677_vm13, %v1668_v0 }
 0x201   : > { %v1716_v2 = vld [vmem:[#allocation4 + $0x30] ss:$2 sm:$0xff]  ;;  %v1748_v3 = vld [vmem:[#allocation4 + $0x31] ss:$2 sm:$0xff]  ;;  %1699 = vst.msk [vmem:[#allocation4 + $0xa8] sm:$0xff] %vm1677_vm13, %v1666_v1 }
 0x202   : > { %v1776_v40 = vmax.f32 %v1716_v2, %v1748_v3  ;;  %v1714_v4 = vld [vmem:[#allocation4 + $0x20] ss:$2 sm:$0xff]  ;;  %v1746_v5 = vld [vmem:[#allocation4 + $0x21] ss:$2 sm:$0xff] }
 0x203   : > { %v1775_v6 = vmax.f32 %v1714_v4, %v1746_v5 }
 0x204   : > { %1792 = vst.msk [vmem:[#allocation5 + $0x18] sm:$0xff] %vm1677_vm13, %v1776_v40 }
 0x205   : > { %1791 = vst.msk [vmem:[#allocation5 + $0x10] sm:$0xff] %vm1677_vm13, %v1775_v6 }
 0x207   : > { %v1732_v7 = vld [vmem:[#allocation4 + $0xb0] ss:$2 sm:$0xff]  ;;  %v1764_v8 = vld [vmem:[#allocation4 + $0xb1] ss:$2 sm:$0xff] }
 0x208   : > { %v1784_v58 = vmax.f32 %v1732_v7, %v1764_v8  ;;  %v1730_v9 = vld [vmem:[#allocation4 + $0xa0] ss:$2 sm:$0xff]  ;;  %v1762_v44 = vld [vmem:[#allocation4 + $0xa1] ss:$2 sm:$0xff] }
 0x209   : > { %v1783_v10 = vmax.f32 %v1730_v9, %v1762_v44 }
 0x20a   : > { %1800 = vst.msk [vmem:[#allocation5 + $0x58] sm:$0xff] %vm1677_vm13, %v1784_v58 }
 0x20b   : > { %v1815_v11 = vld [vmem:[#allocation5 + $0x18] sm:$0xff]  ;;  %1799 = vst.msk [vmem:[#allocation5 + $0x50] sm:$0xff] %vm1677_vm13, %v1783_v10 }
 0x20c   : > { %v1806_v13 = vld [vmem:[#allocation5 + $0x10] sm:$0xff] }
 0x20d   : > { %v1823_v14 = vmax.f32 %v1806_v13, %v1815_v11 }
 0x20f   : > { %v1831_v15 = vpack.c.bf16 %v1823_v14, %v1823_v14 }
 0x211   : > { %1840 = vst.msk [vmem:[%s2682_s9 + $0x4] sm:$0xf] %vm1838_vm14, %v1831_v15  ;;  %v1819_v62 = vld [vmem:[#allocation5 + $0x58] sm:$0xff] }
 0x212   : > { %v1810_v16 = vld [vmem:[#allocation5 + $0x50] sm:$0xff] }
 0x213   : > { %v1827_v17 = vmax.f32 %v1810_v16, %v1819_v62 }
 0x215   : > { %v1835_v18 = vpack.c.bf16 %v1827_v17, %v1827_v17 }
 0x217   : > { %1844 = vst.msk [vmem:[%s2682_s9 + $0x14] sm:$0xf] %vm1838_vm14, %v1835_v18 }
 0x233   : > { %v1966_v19 = vpop.f32.mrb[8].mxu0 }
 0x234   : > { %v1559_v20 = vadd.f32 %v1966_v19, %v2656_v59  ;;  %v1550_v21 = vpop.f32.mrb[9].mxu0 }
 0x235   : > { %v1551_v22 = vadd.f32 %v2656_v59, %v1550_v21  ;;  %v1967_v23 = vpop.f32.mrb[10].mxu0 }
 0x236   : > { %v1655_v24 = vmax.f32 %v1559_v20, 0.0  ;;  %v1562_v26 = vadd.f32 %v1967_v23, %v2656_v59  ;;  %v1553_v25 = vpop.f32.mrb[11].mxu0 }
 0x237   : > { %v1653_v27 = vmax.f32 %v1551_v22, 0.0  ;;  %v1554_v29 = vadd.f32 %v2656_v59, %v1553_v25 }
 0x238   : > { %1688 = vst.msk [vmem:[#allocation4 + $0x50] sm:$0xff] %vm1677_vm13, %v1655_v24  ;;  %v1656_v30 = vmax.f32 %v1562_v26, 0.0 }
 0x239   : > { %1686 = vst.msk [vmem:[#allocation4 + $0x40] sm:$0xff] %vm1677_vm13, %v1653_v27  ;;  %v1654_v31 = vmax.f32 %v1554_v29, 0.0  ;;  %v1982_v12 = vpop.f32.mrb[8].mxu1 }
 0x23a   : > { %1689 = vst.msk [vmem:[#allocation4 + $0x58] sm:$0xff] %vm1677_vm13, %v1656_v30  ;;  %v1623_v28 = vadd.f32 %v1982_v12, %v2656_v59  ;;  %v1614_v32 = vpop.f32.mrb[9].mxu1 }
 0x23b   : > { %1687 = vst.msk [vmem:[#allocation4 + $0x48] sm:$0xff] %vm1677_vm13, %v1654_v31  ;;  %v1615_v33 = vadd.f32 %v2656_v59, %v1614_v32  ;;  %v1983_v34 = vpop.f32.mrb[10].mxu1 }
 0x23c   : > { %v1671_v35 = vmax.f32 %v1623_v28, 0.0  ;;  %v1626_v36 = vadd.f32 %v1983_v34, %v2656_v59  ;;  %v1617_v37 = vpop.f32.mrb[11].mxu1 }
 0x23d   : > { %v1669_v38 = vmax.f32 %v1615_v33, 0.0  ;;  %v1618_v39 = vadd.f32 %v2656_v59, %v1617_v37 }
 0x23e   : > { %1704 = vst.msk [vmem:[#allocation4 + $0xd0] sm:$0xff] %vm1677_vm13, %v1671_v35  ;;  %v1672_v41 = vmax.f32 %v1626_v36, 0.0 }
 0x23f   : > { %1702 = vst.msk [vmem:[#allocation4 + $0xc0] sm:$0xff] %vm1677_vm13, %v1669_v38  ;;  %v1670_v42 = vmax.f32 %v1618_v39, 0.0 }
 0x240   : > { %1705 = vst.msk [vmem:[#allocation4 + $0xd8] sm:$0xff] %vm1677_vm13, %v1672_v41 }
 0x241   : > { %v1720_v43 = vld [vmem:[#allocation4 + $0x50] ss:$2 sm:$0xff]  ;;  %v1752_v45 = vld [vmem:[#allocation4 + $0x51] ss:$2 sm:$0xff]  ;;  %1703 = vst.msk [vmem:[#allocation4 + $0xc8] sm:$0xff] %vm1677_vm13, %v1670_v42 }
 0x242   : > { %v1778_v46 = vmax.f32 %v1720_v43, %v1752_v45  ;;  %v1718_v47 = vld [vmem:[#allocation4 + $0x40] ss:$2 sm:$0xff]  ;;  %v1750_v48 = vld [vmem:[#allocation4 + $0x41] ss:$2 sm:$0xff] }
 0x243   : > { %v1777_v49 = vmax.f32 %v1718_v47, %v1750_v48 }
 0x244   : > { %1794 = vst.msk [vmem:[#allocation5 + $0x28] sm:$0xff] %vm1677_vm13, %v1778_v46 }
 0x245   : > { %1793 = vst.msk [vmem:[#allocation5 + $0x20] sm:$0xff] %vm1677_vm13, %v1777_v49 }
 0x247   : > { %v1736_v50 = vld [vmem:[#allocation4 + $0xd0] ss:$2 sm:$0xff]  ;;  %v1768_v51 = vld [vmem:[#allocation4 + $0xd1] ss:$2 sm:$0xff] }
 0x248   : > { %v1786_v52 = vmax.f32 %v1736_v50, %v1768_v51  ;;  %v1734_v53 = vld [vmem:[#allocation4 + $0xc0] ss:$2 sm:$0xff]  ;;  %v1766_v54 = vld [vmem:[#allocation4 + $0xc1] ss:$2 sm:$0xff] }
 0x249   : > { %v1785_v55 = vmax.f32 %v1734_v53, %v1766_v54 }
 0x24a   : > { %1802 = vst.msk [vmem:[#allocation5 + $0x68] sm:$0xff] %vm1677_vm13, %v1786_v52 }
 0x24b   : > { %v1816_v56 = vld [vmem:[#allocation5 + $0x28] sm:$0xff]  ;;  %1801 = vst.msk [vmem:[#allocation5 + $0x60] sm:$0xff] %vm1677_vm13, %v1785_v55 }
 0x24c   : > { %v1807_v57 = vld [vmem:[#allocation5 + $0x20] sm:$0xff] }
 0x24d   : > { %v1824_v60 = vmax.f32 %v1807_v57, %v1816_v56 }
 0x24f   : > { %v1832_v61 = vpack.c.bf16 %v1824_v60, %v1824_v60 }
 0x251   : > { %1841 = vst.msk [vmem:[%s2682_s9 + $0x8] sm:$0xf] %vm1838_vm14, %v1832_v61  ;;  %v1820_v63 = vld [vmem:[#allocation5 + $0x68] sm:$0xff] }
 0x252   : > { %v1811_v0 = vld [vmem:[#allocation5 + $0x60] sm:$0xff] }
 0x253   : > { %v1828_v1 = vmax.f32 %v1811_v0, %v1820_v63 }
 0x255   : > { %v1836_v2 = vpack.c.bf16 %v1828_v1, %v1828_v1 }
 0x257   : > { %1845 = vst.msk [vmem:[%s2682_s9 + $0x18] sm:$0xf] %vm1838_vm14, %v1836_v2 }
 0x26f   : > { %v1970_v3 = vpop.f32.mrb[12].mxu0 }
 0x270   : > { %v1575_v40 = vadd.f32 %v1970_v3, %v2656_v59  ;;  %v1566_v4 = vpop.f32.mrb[13].mxu0 }
 0x271   : > { %v1567_v5 = vadd.f32 %v2656_v59, %v1566_v4  ;;  %v1971_v6 = vpop.f32.mrb[14].mxu0 }
 0x272   : > { %v1659_v7 = vmax.f32 %v1575_v40, 0.0  ;;  %v1578_v8 = vadd.f32 %v1971_v6, %v2656_v59  ;;  %v1569_v58 = vpop.f32.mrb[15].mxu0 }
 0x273   : > { %v1657_v9 = vmax.f32 %v1567_v5, 0.0  ;;  %v1570_v44 = vadd.f32 %v2656_v59, %v1569_v58 }
 0x274   : > { %1692 = vst.msk [vmem:[#allocation4 + $0x70] sm:$0xff] %vm1677_vm13, %v1659_v7  ;;  %v1660_v10 = vmax.f32 %v1578_v8, 0.0 }
 0x275   : > { %1690 = vst.msk [vmem:[#allocation4 + $0x60] sm:$0xff] %vm1677_vm13, %v1657_v9  ;;  %v1658_v11 = vmax.f32 %v1570_v44, 0.0  ;;  %v1986_v13 = vpop.f32.mrb[12].mxu1 }
 0x276   : > { %1693 = vst.msk [vmem:[#allocation4 + $0x78] sm:$0xff] %vm1677_vm13, %v1660_v10  ;;  %v1639_v14 = vadd.f32 %v1986_v13, %v2656_v59  ;;  %v1630_v15 = vpop.f32.mrb[13].mxu1 }
 0x277   : > { %1691 = vst.msk [vmem:[#allocation4 + $0x68] sm:$0xff] %vm1677_vm13, %v1658_v11  ;;  %v1631_v62 = vadd.f32 %v2656_v59, %v1630_v15  ;;  %v1987_v16 = vpop.f32.mrb[14].mxu1 }
 0x278   : > { %v1675_v17 = vmax.f32 %v1639_v14, 0.0  ;;  %v1642_v18 = vadd.f32 %v1987_v16, %v2656_v59  ;;  %v1633_v19 = vpop.f32.mrb[15].mxu1 }
 0x279   : > { %v1673_v20 = vmax.f32 %v1631_v62, 0.0  ;;  %v1634_v21 = vadd.f32 %v2656_v59, %v1633_v19 }
 0x27a   : > { %1708 = vst.msk [vmem:[#allocation4 + $0xf0] sm:$0xff] %vm1677_vm13, %v1675_v17  ;;  %v1676_v22 = vmax.f32 %v1642_v18, 0.0 }
 0x27b   : > { %1706 = vst.msk [vmem:[#allocation4 + $0xe0] sm:$0xff] %vm1677_vm13, %v1673_v20  ;;  %v1674_v23 = vmax.f32 %v1634_v21, 0.0 }
 0x27c   : > { %1709 = vst.msk [vmem:[#allocation4 + $0xf8] sm:$0xff] %vm1677_vm13, %v1676_v22 }
 0x27d   : > { %v1724_v24 = vld [vmem:[#allocation4 + $0x70] ss:$2 sm:$0xff]  ;;  %v1756_v26 = vld [vmem:[#allocation4 + $0x71] ss:$2 sm:$0xff]  ;;  %1707 = vst.msk [vmem:[#allocation4 + $0xe8] sm:$0xff] %vm1677_vm13, %v1674_v23 }
 0x27e   : > { %v1780_v25 = vmax.f32 %v1724_v24, %v1756_v26  ;;  %v1722_v27 = vld [vmem:[#allocation4 + $0x60] ss:$2 sm:$0xff]  ;;  %v1754_v29 = vld [vmem:[#allocation4 + $0x61] ss:$2 sm:$0xff] }
 0x27f   : > { %v1779_v30 = vmax.f32 %v1722_v27, %v1754_v29 }
 0x280   : > { %1796 = vst.msk [vmem:[#allocation5 + $0x38] sm:$0xff] %vm1677_vm13, %v1780_v25 }
 0x281   : > { %1795 = vst.msk [vmem:[#allocation5 + $0x30] sm:$0xff] %vm1677_vm13, %v1779_v30 }
 0x283   : > { %v1740_v59 = vld [vmem:[#allocation4 + $0xf0] ss:$2 sm:$0xff]  ;;  %v1772_v31 = vld [vmem:[#allocation4 + $0xf1] ss:$2 sm:$0xff] }
 0x284   : > { %v1788_v12 = vmax.f32 %v1740_v59, %v1772_v31  ;;  %v1738_v28 = vld [vmem:[#allocation4 + $0xe0] ss:$2 sm:$0xff]  ;;  %v1770_v32 = vld [vmem:[#allocation4 + $0xe1] ss:$2 sm:$0xff] }
 0x285   : > { %v1787_v33 = vmax.f32 %v1738_v28, %v1770_v32 }
 0x286   : > { %1804 = vst.msk [vmem:[#allocation5 + $0x78] sm:$0xff] %vm1677_vm13, %v1788_v12 }
 0x287   : > { %v1817_v34 = vld [vmem:[#allocation5 + $0x38] sm:$0xff]  ;;  %1803 = vst.msk [vmem:[#allocation5 + $0x70] sm:$0xff] %vm1677_vm13, %v1787_v33 }
 0x288   : > { %v1808_v35 = vld [vmem:[#allocation5 + $0x30] sm:$0xff] }
 0x289   : > { %v1825_v36 = vmax.f32 %v1808_v35, %v1817_v34 }
 0x28b   : > { %v1833_v37 = vpack.c.bf16 %v1825_v36, %v1825_v36 }
 0x28d   : > { %1842 = vst.msk [vmem:[%s2682_s9 + $0xc] sm:$0xf] %vm1838_vm14, %v1833_v37  ;;  %v1821_v38 = vld [vmem:[#allocation5 + $0x78] sm:$0xff] }
 0x28e   : > { %v1812_v39 = vld [vmem:[#allocation5 + $0x70] sm:$0xff] }
 0x28f   : > { %v1829_v41 = vmax.f32 %v1812_v39, %v1821_v38 }
 0x291   : > { %v1837_v42 = vpack.c.bf16 %v1829_v41, %v1829_v41 }
 0x293   : > { %1846 = vst.msk [vmem:[%s2682_s9 + $0x1c] sm:$0xf] %vm1838_vm14, %v1837_v42 }
 0x294 PF: > { %s13_s12 = sadd.s32 1, %s2018_s12  }
 0x295   : > { %p10_p4 = scmp.ge.s32.totalorder %s13_s12, 4  }
 0x297   :  { %12 = sbr.rel (!%p10_p4) target bundleno = 1 (0x1), region = 96 }

</bundles_post_ra>
